<compile_context>
chip_gen: v5e
topology: v5e:2x2
jax: 0.10.0
libtpu: 0.0.40
codegen_flags: <defaults>
</compile_context>

<pallas_src>
import functools

import jax
import jax.numpy as jnp
from jax.experimental import pallas as pl
from jax.experimental.pallas import tpu as pltpu

EPS = 1e-5
LANE = 128      # padded lane width for the log-prob output
XYZ_PAD = 8     # xyz padded from 3 -> 8 columns so its MXU contraction is K=8


# ------------------------------------------------------------------ kernel --

def _fused_forward_kernel(*refs, n_points, strides, block_batch):
    n_sa = len(strides)
    x_ref, xyz_ref, ws_ref, bs_ref = refs[:4]
    sa_refs = refs[4:4 + 3 * n_sa]
    (wp_ref, bp_ref, nscale_ref, nshift_ref,
     wh1_ref, bh1_ref, wh2_ref, bh2_ref, wh3_ref, bh3_ref,
     pc_ref, logp_ref) = refs[4 + 3 * n_sa:]

    bt = block_batch
    n = n_points
    cin = x_ref.shape[-1]

    # ---- stem: 1x1 Conv1d == per-point matmul (BN folded) + ReLU -----------
    x2 = x_ref[...].reshape(bt * n, cin)                         # (bt*N, Cin) bf16
    h2 = jnp.dot(x2, ws_ref[...], preferred_element_type=jnp.float32)
    h2 = jnp.maximum(h2 + bs_ref[...], 0.0)                      # (bt*N, 32) f32

    # ---- strided set-abstraction stages -------------------------------------
    # Current point set of every stage == first n rows of each sample's xyz
    # (group g's center is point g).  Bias / center-subtract / ReLU are hoisted
    # out of the k-way max (exact: relu is monotone, b - czx is constant over
    # group members).
    for i, k in enumerate(strides):
        wx_ref, wf_ref, b_ref = sa_refs[3 * i:3 * i + 3]
        m = n // k
        cout = wf_ref.shape[1]

        # feature part: one big (bt*n, Cin)@(Cin, cout) MXU panel
        zf2 = jnp.dot(h2.astype(jnp.bfloat16), wf_ref[...],
                      preferred_element_type=jnp.float32)        # (bt*n, cout)
        # absolute-xyz part: K=8 MXU pass (MXU is otherwise idle here)
        xyz_cur2 = xyz_ref[:, 0:n, :].reshape(bt * n, XYZ_PAD)   # bf16
        zx2 = jnp.dot(xyz_cur2, wx_ref[...],
                      preferred_element_type=jnp.float32)        # (bt*n, cout)
        z3 = (zf2 + zx2).reshape(bt, n, cout)

        # k-way chunked max over group members (elementwise maxima over
        # contiguous, 8-aligned row chunks — no cross-sublane reduce)
        zmax = z3[:, 0:m, :]
        for j in range(1, k):
            zmax = jnp.maximum(zmax, z3[:, j * m:(j + 1) * m, :])

        # center contribution (rel_xyz = xyz - center), bias and ReLU applied
        # once on the pooled (bt, m, cout) result
        xyz_c2 = xyz_ref[:, 0:m, :].reshape(bt * m, XYZ_PAD)
        czx = jnp.dot(xyz_c2, wx_ref[...],
                      preferred_element_type=jnp.float32).reshape(bt, m, cout)
        h2 = jnp.maximum(zmax - czx + b_ref[...], 0.0).reshape(bt * m, cout)
        n = m

    # ---- projection conv to emb_dims (no activation) -------------------------
    hp2 = jnp.dot(h2.astype(jnp.bfloat16), wp_ref[...],
                  preferred_element_type=jnp.float32) + bp_ref[...]   # (bt*nf, emb)

    # ---- self.norm (eval BN -> scale/shift); emit per-point features ---------
    pc2 = hp2 * nscale_ref[...] + nshift_ref[...]
    emb = pc2.shape[-1]
    pc3 = pc2.reshape(bt, n, emb)
    pc_ref[...] = pc3.astype(pc_ref.dtype)                       # lane-dense emb

    # ---- mean over points -> ReLU -> cls_head -> log_softmax ----------------
    pooled = jnp.maximum(jnp.mean(pc3, axis=1), 0.0)             # (bt, emb)
    t = jnp.dot(pooled.astype(jnp.bfloat16), wh1_ref[...],
                preferred_element_type=jnp.float32) + bh1_ref[...]
    t = jnp.maximum(t, 0.0)                                      # Dropout = id
    t = jnp.dot(t.astype(jnp.bfloat16), wh2_ref[...],
                preferred_element_type=jnp.float32) + bh2_ref[...]
    t = jnp.maximum(t, 0.0)                                      # Dropout = id
    # final weight/bias are padded to LANE columns (pad bias = -1e30 so the
    # pad columns never win the max and contribute exp() = 0 to the sum)
    logits = jnp.dot(t.astype(jnp.bfloat16), wh3_ref[...],
                     preferred_element_type=jnp.float32) + bh3_ref[...]  # (bt, LANE)
    mx = jnp.max(logits, axis=-1, keepdims=True)
    lse = jnp.log(jnp.sum(jnp.exp(logits - mx), axis=-1, keepdims=True)) + mx
    logp_ref[...] = (logits - lse).reshape(bt, 1, LANE).astype(logp_ref.dtype)


# ----------------------------------------------------------------- wrapper --

def _const_spec(shape):
    zeros = (0,) * len(shape)
    return pl.BlockSpec(shape, lambda g, _z=zeros: _z)


def _pick_block_batch(batch, n_points, cin, budget_bytes=20 * 1024 * 1024):
    """Largest per-step batch packing that keeps a crude live-VMEM estimate
    under budget; prefers an even grid length so both v7x TCs get work."""
    per_sample = 2 * 2 * n_points * (cin + XYZ_PAD)   # double-buffered bf16 inputs
    per_sample += n_points * 288 * 4                  # peak f32 temporaries (stem + stage 1)
    cap = max(1, budget_bytes // max(per_sample, 1))
    divisors = [d for d in range(1, batch + 1) if batch % d == 0 and d <= cap]
    even = [d for d in divisors if (batch // d) % 2 == 0]
    pool = even if even else divisors
    return max(pool)


def make_forward(config, block_batch=None):
    strides = tuple(config['strides'])
    n_classes = config['n_classes']
    emb = config['emb_dims']
    assert n_classes <= LANE

    def forward(pc_feat, xyz, params):
        B, Cin, N = pc_feat.shape
        n_final = N
        for s in strides:
            assert n_final % s == 0
            n_final //= s

        bt = block_batch if block_batch is not None else _pick_block_batch(B, N, Cin)
        assert B % bt == 0

        # PyTorch NCW -> points-major + bf16 for the MXU (tiny XLA glue);
        # xyz padded to 8 lanes so its contraction runs as a K=8 MXU pass.
        x = jnp.transpose(pc_feat, (0, 2, 1)).astype(jnp.bfloat16)        # (B,N,Cin)
        xyz8 = jnp.pad(xyz.astype(jnp.float32),
                       ((0, 0), (0, 0), (0, XYZ_PAD - xyz.shape[-1]))
                       ).astype(jnp.bfloat16)                              # (B,N,8)

        ws, bs = params['stem']
        flat = [ws, bs]
        for (wx, wf, b) in params['sa']:
            flat += [wx, wf, b]
        wp, bp = params['proj']
        flat += [wp, bp, params['norm_scale'], params['norm_shift']]
        for (w, b) in params['head']:
            flat += [w, b]

        in_specs = [
            pl.BlockSpec((bt, N, Cin), lambda g: (g, 0, 0)),
            pl.BlockSpec((bt, N, XYZ_PAD), lambda g: (g, 0, 0)),
        ] + [_const_spec(a.shape) for a in flat]

        out_specs = (
            pl.BlockSpec((bt, n_final, emb), lambda g: (g, 0, 0)),
            pl.BlockSpec((bt, 1, LANE), lambda g: (g, 0, 0)),
        )
        out_shape = (
            jax.ShapeDtypeStruct((B, n_final, emb), jnp.float32),
            jax.ShapeDtypeStruct((B, 1, LANE), jnp.float32),
        )

        kernel = functools.partial(_fused_forward_kernel,
                                   n_points=N, strides=strides, block_batch=bt)
        pc_cl, logp = pl.pallas_call(
            kernel,
            grid=(B // bt,),
            in_specs=in_specs,
            out_specs=out_specs,
            out_shape=out_shape,
            compiler_params=pltpu.CompilerParams(
                dimension_semantics=("parallel",),
                vmem_limit_bytes=32 * 1024 * 1024),
        )(x, xyz8, *flat)

        log_probs = logp.reshape(B, LANE)[:, :n_classes]
        # Kernel writes lane-dense (emb-last) tiles; transpose the small
        # (B, n_final, emb) result back to the PyTorch (B, emb, N_final) layout.
        pc_feats = jnp.transpose(pc_cl, (0, 2, 1))
        return log_probs, pc_feats

    return jax.jit(forward)


# --------------------------------------------------------------- param glue --

def init_linear(key, cin, cout):
    k1, k2 = jax.random.split(key)
    lim = 1.0 / jnp.sqrt(cin)
    w = jax.random.uniform(k1, (cin, cout), jnp.float32, -lim, lim)
    b = jax.random.uniform(k2, (1, cout), jnp.float32, -lim, lim)
    return w, b


def init_bn(key, c):
    k1, k2, k3, k4 = jax.random.split(key, 4)
    gamma = 1.0 + 0.1 * jax.random.normal(k1, (1, c), jnp.float32)
    beta = 0.1 * jax.random.normal(k2, (1, c), jnp.float32)
    rmean = 0.1 * jax.random.normal(k3, (1, c), jnp.float32)
    rvar = 1.0 + 0.1 * jax.random.uniform(k4, (1, c), jnp.float32)
    return gamma, beta, rmean, rvar


def fold_bn(w, b, bn):
    gamma, beta, rmean, rvar = bn
    scale = gamma / jnp.sqrt(rvar + EPS)              # (1, cout)
    return w * scale, (b - rmean) * scale + beta


# -------------------------------------------------------------------- main ---

if __name__ == "__main__":
    config = dict(n_classes=10, task='classify', encoder='s',
                  emb_dims=256, dp_pc=0.5, strides=(4, 4, 4))
    B, in_dim, N = 4, 4, 512          # N chosen so n_final = N/64 = 8 (aligned)
    emb = config['emb_dims']
    nC = config['n_classes']

    keys = iter(jax.random.split(jax.random.PRNGKey(0), 20))

    params = {}
    # stem: Conv1d(in_dim, 32, 1) + BN + ReLU  (BN folded into the conv)
    w, b = init_linear(next(keys), in_dim, 32)
    w, b = fold_bn(w, b, init_bn(next(keys), 32))
    params['stem'] = (w.astype(jnp.bfloat16), b)

    # set-abstraction stages (widths 32 -> 64 -> 128 -> 256, stride 4 each);
    # weight rows 0:3 act on relative xyz (zero-padded to 8 rows for the MXU),
    # rows 3: act on features
    widths = [32, 64, 128, 256]
    sa = []
    for i in range(3):
        w, b = init_linear(next(keys), widths[i] + 3, widths[i + 1])
        w, b = fold_bn(w, b, init_bn(next(keys), widths[i + 1]))
        wx = jnp.zeros((XYZ_PAD, widths[i + 1]), jnp.float32).at[:3].set(w[:3])
        sa.append((wx.astype(jnp.bfloat16), w[3:].astype(jnp.bfloat16), b))
    params['sa'] = sa

    # projection conv to emb_dims (PointNext wrapper head)
    w, b = init_linear(next(keys), widths[-1], emb)
    params['proj'] = (w.astype(jnp.bfloat16), b)

    # self.norm = BatchNorm1d(emb_dims), eval mode -> scale/shift
    gamma, beta, rmean, rvar = init_bn(next(keys), emb)
    scale = gamma / jnp.sqrt(rvar + EPS)
    params['norm_scale'] = scale
    params['norm_shift'] = beta - rmean * scale

    # cls head: Linear->BN->ReLU->Drop->Linear->BN->ReLU->Drop->Linear
    # (last layer padded to LANE columns; pad bias = -1e30 keeps softmax exact)
    head = []
    w, b = init_linear(next(keys), emb, 512)
    w, b = fold_bn(w, b, init_bn(next(keys), 512))
    head.append((w.astype(jnp.bfloat16), b))
    w, b = init_linear(next(keys), 512, 256)
    w, b = fold_bn(w, b, init_bn(next(keys), 256))
    head.append((w.astype(jnp.bfloat16), b))
    w, b = init_linear(next(keys), 256, nC)
    w_pad = jnp.zeros((256, LANE), jnp.float32).at[:, :nC].set(w)
    b_pad = jnp.full((1, LANE), -1e30, jnp.float32).at[:, :nC].set(b)
    head.append((w_pad.astype(jnp.bfloat16), b_pad))
    params['head'] = head

    kx, kf = jax.random.split(next(keys))
    xyz = jax.random.normal(kx, (B, N, 3), jnp.float32)
    pc_feat = jax.random.normal(kf, (B, in_dim, N), jnp.float32)

    forward = make_forward(config)
    log_probs, pc_feats = forward(pc_feat, xyz, params)
    jax.block_until_ready((log_probs, pc_feats))

    n_final = N // (4 * 4 * 4)
    assert log_probs.shape == (B, nC)
    assert pc_feats.shape == (B, emb, n_final)
    assert bool(jnp.all(jnp.isfinite(log_probs)))
    assert bool(jnp.all(jnp.isfinite(pc_feats)))
    assert bool(jnp.allclose(jnp.exp(log_probs).sum(axis=1), 1.0, atol=1e-4))
    print("KERNEL_OK")
</pallas_src>

<mosaic_0001>
module attributes {stable_mosaic.version = 11 : i64} {
  func.func @_fused_forward_kernel(%arg0: i32, %arg1: memref<2x512x4xbf16, #tpu.memory_space<vmem>>, %arg2: memref<2x512x8xbf16, #tpu.memory_space<vmem>>, %arg3: memref<4x32xbf16, #tpu.memory_space<vmem>>, %arg4: memref<1x32xf32, #tpu.memory_space<vmem>>, %arg5: memref<8x64xbf16, #tpu.memory_space<vmem>>, %arg6: memref<32x64xbf16, #tpu.memory_space<vmem>>, %arg7: memref<1x64xf32, #tpu.memory_space<vmem>>, %arg8: memref<8x128xbf16, #tpu.memory_space<vmem>>, %arg9: memref<64x128xbf16, #tpu.memory_space<vmem>>, %arg10: memref<1x128xf32, #tpu.memory_space<vmem>>, %arg11: memref<8x256xbf16, #tpu.memory_space<vmem>>, %arg12: memref<128x256xbf16, #tpu.memory_space<vmem>>, %arg13: memref<1x256xf32, #tpu.memory_space<vmem>>, %arg14: memref<256x256xbf16, #tpu.memory_space<vmem>>, %arg15: memref<1x256xf32, #tpu.memory_space<vmem>>, %arg16: memref<1x256xf32, #tpu.memory_space<vmem>>, %arg17: memref<1x256xf32, #tpu.memory_space<vmem>>, %arg18: memref<256x512xbf16, #tpu.memory_space<vmem>>, %arg19: memref<1x512xf32, #tpu.memory_space<vmem>>, %arg20: memref<512x256xbf16, #tpu.memory_space<vmem>>, %arg21: memref<1x256xf32, #tpu.memory_space<vmem>>, %arg22: memref<256x128xbf16, #tpu.memory_space<vmem>>, %arg23: memref<1x128xf32, #tpu.memory_space<vmem>>, %arg24: memref<2x8x256xf32, #tpu.memory_space<vmem>>, %arg25: memref<2x1x128xf32, #tpu.memory_space<vmem>>) attributes {dimension_semantics = [#tpu.dimension_semantics<parallel>], iteration_bounds = array<i64: 2>, scalar_prefetch = 0 : i64, scratch_operands = 0 : i64, tpu.core_type = #tpu.core_type<tc>, window_params = [{transform_indices = @transform_0, window_bounds = array<i64: 2, 512, 4>}, {transform_indices = @transform_1, window_bounds = array<i64: 2, 512, 8>}, {pipeline_mode = #tpu.pipeline_mode<synchronous>, transform_indices = @transform_2, window_bounds = array<i64: 4, 32>}, {pipeline_mode = #tpu.pipeline_mode<synchronous>, transform_indices = @transform_3, window_bounds = array<i64: 1, 32>}, {pipeline_mode = #tpu.pipeline_mode<synchronous>, transform_indices = @transform_4, window_bounds = array<i64: 8, 64>}, {pipeline_mode = #tpu.pipeline_mode<synchronous>, transform_indices = @transform_5, window_bounds = array<i64: 32, 64>}, {pipeline_mode = #tpu.pipeline_mode<synchronous>, transform_indices = @transform_6, window_bounds = array<i64: 1, 64>}, {pipeline_mode = #tpu.pipeline_mode<synchronous>, transform_indices = @transform_7, window_bounds = array<i64: 8, 128>}, {pipeline_mode = #tpu.pipeline_mode<synchronous>, transform_indices = @transform_8, window_bounds = array<i64: 64, 128>}, {pipeline_mode = #tpu.pipeline_mode<synchronous>, transform_indices = @transform_9, window_bounds = array<i64: 1, 128>}, {pipeline_mode = #tpu.pipeline_mode<synchronous>, transform_indices = @transform_10, window_bounds = array<i64: 8, 256>}, {pipeline_mode = #tpu.pipeline_mode<synchronous>, transform_indices = @transform_11, window_bounds = array<i64: 128, 256>}, {pipeline_mode = #tpu.pipeline_mode<synchronous>, transform_indices = @transform_12, window_bounds = array<i64: 1, 256>}, {pipeline_mode = #tpu.pipeline_mode<synchronous>, transform_indices = @transform_13, window_bounds = array<i64: 256, 256>}, {pipeline_mode = #tpu.pipeline_mode<synchronous>, transform_indices = @transform_14, window_bounds = array<i64: 1, 256>}, {pipeline_mode = #tpu.pipeline_mode<synchronous>, transform_indices = @transform_15, window_bounds = array<i64: 1, 256>}, {pipeline_mode = #tpu.pipeline_mode<synchronous>, transform_indices = @transform_16, window_bounds = array<i64: 1, 256>}, {pipeline_mode = #tpu.pipeline_mode<synchronous>, transform_indices = @transform_17, window_bounds = array<i64: 256, 512>}, {pipeline_mode = #tpu.pipeline_mode<synchronous>, transform_indices = @transform_18, window_bounds = array<i64: 1, 512>}, {pipeline_mode = #tpu.pipeline_mode<synchronous>, transform_indices = @transform_19, window_bounds = array<i64: 512, 256>}, {pipeline_mode = #tpu.pipeline_mode<synchronous>, transform_indices = @transform_20, window_bounds = array<i64: 1, 256>}, {pipeline_mode = #tpu.pipeline_mode<synchronous>, transform_indices = @transform_21, window_bounds = array<i64: 256, 128>}, {pipeline_mode = #tpu.pipeline_mode<synchronous>, transform_indices = @transform_22, window_bounds = array<i64: 1, 128>}, {transform_indices = @transform_23, window_bounds = array<i64: 2, 8, 256>}, {transform_indices = @transform_24, window_bounds = array<i64: 2, 1, 128>}]} {
    %c0 = arith.constant 0 : index
    %c0_0 = arith.constant 0 : index
    %c0_1 = arith.constant 0 : index
    %0 = vector.load %arg1[%c0, %c0_0, %c0_1] : memref<2x512x4xbf16, #tpu.memory_space<vmem>>, vector<2x512x4xbf16>
    %1 = vector.shape_cast %0 : vector<2x512x4xbf16> to vector<1024x4xbf16>
    %c0_2 = arith.constant 0 : index
    %c0_3 = arith.constant 0 : index
    %2 = vector.load %arg3[%c0_2, %c0_3] : memref<4x32xbf16, #tpu.memory_space<vmem>>, vector<4x32xbf16>
    %cst = arith.constant dense<0.000000e+00> : vector<1024x32xf32>
    %3 = tpu.matmul %1, %2, %cst {dimension_numbers = #tpu.dot_dimension_numbers<[1], [0], [0], [1], [0, 0, 1, 1], [], []>} : vector<1024x4xbf16>, vector<4x32xbf16>, vector<1024x32xf32> -> vector<1024x32xf32>
    %c0_4 = arith.constant 0 : index
    %c0_5 = arith.constant 0 : index
    %4 = vector.load %arg4[%c0_4, %c0_5] : memref<1x32xf32, #tpu.memory_space<vmem>>, vector<1x32xf32>
    %5 = vector.broadcast %4 : vector<1x32xf32> to vector<1024x32xf32>
    %6 = arith.addf %3, %5 : vector<1024x32xf32>
    %cst_6 = arith.constant 0.000000e+00 : f32
    %7 = vector.broadcast %cst_6 : f32 to vector<1024x32xf32>
    %8 = arith.maximumf %6, %7 : vector<1024x32xf32>
    %9 = arith.truncf %8 : vector<1024x32xf32> to vector<1024x32xbf16>
    %c0_7 = arith.constant 0 : index
    %c0_8 = arith.constant 0 : index
    %10 = vector.load %arg6[%c0_7, %c0_8] : memref<32x64xbf16, #tpu.memory_space<vmem>>, vector<32x64xbf16>
    %cst_9 = arith.constant dense<0.000000e+00> : vector<1024x64xf32>
    %11 = tpu.matmul %9, %10, %cst_9 {dimension_numbers = #tpu.dot_dimension_numbers<[1], [0], [0], [1], [0, 0, 1, 1], [], []>} : vector<1024x32xbf16>, vector<32x64xbf16>, vector<1024x64xf32> -> vector<1024x64xf32>
    %c0_10 = arith.constant 0 : index
    %c0_11 = arith.constant 0 : index
    %c0_12 = arith.constant 0 : index
    %12 = vector.load %arg2[%c0_10, %c0_11, %c0_12] : memref<2x512x8xbf16, #tpu.memory_space<vmem>>, vector<2x512x8xbf16>
    %13 = vector.shape_cast %12 : vector<2x512x8xbf16> to vector<1024x8xbf16>
    %c0_13 = arith.constant 0 : index
    %c0_14 = arith.constant 0 : index
    %14 = vector.load %arg5[%c0_13, %c0_14] : memref<8x64xbf16, #tpu.memory_space<vmem>>, vector<8x64xbf16>
    %cst_15 = arith.constant dense<0.000000e+00> : vector<1024x64xf32>
    %15 = tpu.matmul %13, %14, %cst_15 {dimension_numbers = #tpu.dot_dimension_numbers<[1], [0], [0], [1], [0, 0, 1, 1], [], []>} : vector<1024x8xbf16>, vector<8x64xbf16>, vector<1024x64xf32> -> vector<1024x64xf32>
    %16 = arith.addf %11, %15 : vector<1024x64xf32>
    %17 = vector.shape_cast %16 : vector<1024x64xf32> to vector<2x512x64xf32>
    %18 = vector.extract_strided_slice %17 {offsets = [0, 0, 0], sizes = [2, 128, 64], strides = [1, 1, 1]} : vector<2x512x64xf32> to vector<2x128x64xf32>
    %19 = vector.extract_strided_slice %17 {offsets = [0, 128, 0], sizes = [2, 128, 64], strides = [1, 1, 1]} : vector<2x512x64xf32> to vector<2x128x64xf32>
    %20 = arith.maximumf %18, %19 : vector<2x128x64xf32>
    %21 = vector.extract_strided_slice %17 {offsets = [0, 256, 0], sizes = [2, 128, 64], strides = [1, 1, 1]} : vector<2x512x64xf32> to vector<2x128x64xf32>
    %22 = arith.maximumf %20, %21 : vector<2x128x64xf32>
    %23 = vector.extract_strided_slice %17 {offsets = [0, 384, 0], sizes = [2, 128, 64], strides = [1, 1, 1]} : vector<2x512x64xf32> to vector<2x128x64xf32>
    %24 = arith.maximumf %22, %23 : vector<2x128x64xf32>
    %c0_16 = arith.constant 0 : index
    %c0_17 = arith.constant 0 : index
    %c0_18 = arith.constant 0 : index
    %25 = vector.load %arg2[%c0_16, %c0_17, %c0_18] : memref<2x512x8xbf16, #tpu.memory_space<vmem>>, vector<2x128x8xbf16>
    %26 = vector.shape_cast %25 : vector<2x128x8xbf16> to vector<256x8xbf16>
    %c0_19 = arith.constant 0 : index
    %c0_20 = arith.constant 0 : index
    %27 = vector.load %arg5[%c0_19, %c0_20] : memref<8x64xbf16, #tpu.memory_space<vmem>>, vector<8x64xbf16>
    %cst_21 = arith.constant dense<0.000000e+00> : vector<256x64xf32>
    %28 = tpu.matmul %26, %27, %cst_21 {dimension_numbers = #tpu.dot_dimension_numbers<[1], [0], [0], [1], [0, 0, 1, 1], [], []>} : vector<256x8xbf16>, vector<8x64xbf16>, vector<256x64xf32> -> vector<256x64xf32>
    %29 = vector.shape_cast %28 : vector<256x64xf32> to vector<2x128x64xf32>
    %30 = arith.subf %24, %29 : vector<2x128x64xf32>
    %c0_22 = arith.constant 0 : index
    %c0_23 = arith.constant 0 : index
    %31 = vector.load %arg7[%c0_22, %c0_23] : memref<1x64xf32, #tpu.memory_space<vmem>>, vector<1x64xf32>
    %32 = vector.shape_cast %31 : vector<1x64xf32> to vector<1x1x64xf32>
    %33 = vector.broadcast %32 : vector<1x1x64xf32> to vector<2x128x64xf32>
    %34 = arith.addf %30, %33 : vector<2x128x64xf32>
    %cst_24 = arith.constant 0.000000e+00 : f32
    %35 = vector.broadcast %cst_24 : f32 to vector<2x128x64xf32>
    %36 = arith.maximumf %34, %35 : vector<2x128x64xf32>
    %37 = vector.shape_cast %36 : vector<2x128x64xf32> to vector<256x64xf32>
    %38 = arith.truncf %37 : vector<256x64xf32> to vector<256x64xbf16>
    %c0_25 = arith.constant 0 : index
    %c0_26 = arith.constant 0 : index
    %39 = vector.load %arg9[%c0_25, %c0_26] : memref<64x128xbf16, #tpu.memory_space<vmem>>, vector<64x128xbf16>
    %cst_27 = arith.constant dense<0.000000e+00> : vector<256x128xf32>
    %40 = tpu.matmul %38, %39, %cst_27 {dimension_numbers = #tpu.dot_dimension_numbers<[1], [0], [0], [1], [0, 0, 1, 1], [], []>} : vector<256x64xbf16>, vector<64x128xbf16>, vector<256x128xf32> -> vector<256x128xf32>
    %c0_28 = arith.constant 0 : index
    %c0_29 = arith.constant 0 : index
    %c0_30 = arith.constant 0 : index
    %41 = vector.load %arg2[%c0_28, %c0_29, %c0_30] : memref<2x512x8xbf16, #tpu.memory_space<vmem>>, vector<2x128x8xbf16>
    %42 = vector.shape_cast %41 : vector<2x128x8xbf16> to vector<256x8xbf16>
    %c0_31 = arith.constant 0 : index
    %c0_32 = arith.constant 0 : index
    %43 = vector.load %arg8[%c0_31, %c0_32] : memref<8x128xbf16, #tpu.memory_space<vmem>>, vector<8x128xbf16>
    %cst_33 = arith.constant dense<0.000000e+00> : vector<256x128xf32>
    %44 = tpu.matmul %42, %43, %cst_33 {dimension_numbers = #tpu.dot_dimension_numbers<[1], [0], [0], [1], [0, 0, 1, 1], [], []>} : vector<256x8xbf16>, vector<8x128xbf16>, vector<256x128xf32> -> vector<256x128xf32>
    %45 = arith.addf %40, %44 : vector<256x128xf32>
    %46 = vector.shape_cast %45 : vector<256x128xf32> to vector<2x128x128xf32>
    %47 = vector.extract_strided_slice %46 {offsets = [0, 0, 0], sizes = [2, 32, 128], strides = [1, 1, 1]} : vector<2x128x128xf32> to vector<2x32x128xf32>
    %48 = vector.extract_strided_slice %46 {offsets = [0, 32, 0], sizes = [2, 32, 128], strides = [1, 1, 1]} : vector<2x128x128xf32> to vector<2x32x128xf32>
    %49 = arith.maximumf %47, %48 : vector<2x32x128xf32>
    %50 = vector.extract_strided_slice %46 {offsets = [0, 64, 0], sizes = [2, 32, 128], strides = [1, 1, 1]} : vector<2x128x128xf32> to vector<2x32x128xf32>
    %51 = arith.maximumf %49, %50 : vector<2x32x128xf32>
    %52 = vector.extract_strided_slice %46 {offsets = [0, 96, 0], sizes = [2, 32, 128], strides = [1, 1, 1]} : vector<2x128x128xf32> to vector<2x32x128xf32>
    %53 = arith.maximumf %51, %52 : vector<2x32x128xf32>
    %c0_34 = arith.constant 0 : index
    %c0_35 = arith.constant 0 : index
    %c0_36 = arith.constant 0 : index
    %54 = vector.load %arg2[%c0_34, %c0_35, %c0_36] : memref<2x512x8xbf16, #tpu.memory_space<vmem>>, vector<2x32x8xbf16>
    %55 = vector.shape_cast %54 : vector<2x32x8xbf16> to vector<64x8xbf16>
    %c0_37 = arith.constant 0 : index
    %c0_38 = arith.constant 0 : index
    %56 = vector.load %arg8[%c0_37, %c0_38] : memref<8x128xbf16, #tpu.memory_space<vmem>>, vector<8x128xbf16>
    %cst_39 = arith.constant dense<0.000000e+00> : vector<64x128xf32>
    %57 = tpu.matmul %55, %56, %cst_39 {dimension_numbers = #tpu.dot_dimension_numbers<[1], [0], [0], [1], [0, 0, 1, 1], [], []>} : vector<64x8xbf16>, vector<8x128xbf16>, vector<64x128xf32> -> vector<64x128xf32>
    %58 = vector.shape_cast %57 : vector<64x128xf32> to vector<2x32x128xf32>
    %59 = arith.subf %53, %58 : vector<2x32x128xf32>
    %c0_40 = arith.constant 0 : index
    %c0_41 = arith.constant 0 : index
    %60 = vector.load %arg10[%c0_40, %c0_41] : memref<1x128xf32, #tpu.memory_space<vmem>>, vector<1x128xf32>
    %61 = vector.shape_cast %60 : vector<1x128xf32> to vector<1x1x128xf32>
    %62 = vector.broadcast %61 : vector<1x1x128xf32> to vector<2x32x128xf32>
    %63 = arith.addf %59, %62 : vector<2x32x128xf32>
    %cst_42 = arith.constant 0.000000e+00 : f32
    %64 = vector.broadcast %cst_42 : f32 to vector<2x32x128xf32>
    %65 = arith.maximumf %63, %64 : vector<2x32x128xf32>
    %66 = vector.shape_cast %65 : vector<2x32x128xf32> to vector<64x128xf32>
    %67 = arith.truncf %66 : vector<64x128xf32> to vector<64x128xbf16>
    %c0_43 = arith.constant 0 : index
    %c0_44 = arith.constant 0 : index
    %68 = vector.load %arg12[%c0_43, %c0_44] : memref<128x256xbf16, #tpu.memory_space<vmem>>, vector<128x256xbf16>
    %cst_45 = arith.constant dense<0.000000e+00> : vector<64x256xf32>
    %69 = tpu.matmul %67, %68, %cst_45 {dimension_numbers = #tpu.dot_dimension_numbers<[1], [0], [0], [1], [0, 0, 1, 1], [], []>} : vector<64x128xbf16>, vector<128x256xbf16>, vector<64x256xf32> -> vector<64x256xf32>
    %c0_46 = arith.constant 0 : index
    %c0_47 = arith.constant 0 : index
    %c0_48 = arith.constant 0 : index
    %70 = vector.load %arg2[%c0_46, %c0_47, %c0_48] : memref<2x512x8xbf16, #tpu.memory_space<vmem>>, vector<2x32x8xbf16>
    %71 = vector.shape_cast %70 : vector<2x32x8xbf16> to vector<64x8xbf16>
    %c0_49 = arith.constant 0 : index
    %c0_50 = arith.constant 0 : index
    %72 = vector.load %arg11[%c0_49, %c0_50] : memref<8x256xbf16, #tpu.memory_space<vmem>>, vector<8x256xbf16>
    %cst_51 = arith.constant dense<0.000000e+00> : vector<64x256xf32>
    %73 = tpu.matmul %71, %72, %cst_51 {dimension_numbers = #tpu.dot_dimension_numbers<[1], [0], [0], [1], [0, 0, 1, 1], [], []>} : vector<64x8xbf16>, vector<8x256xbf16>, vector<64x256xf32> -> vector<64x256xf32>
    %74 = arith.addf %69, %73 : vector<64x256xf32>
    %75 = vector.shape_cast %74 : vector<64x256xf32> to vector<2x32x256xf32>
    %76 = vector.extract_strided_slice %75 {offsets = [0, 0, 0], sizes = [2, 8, 256], strides = [1, 1, 1]} : vector<2x32x256xf32> to vector<2x8x256xf32>
    %77 = vector.extract_strided_slice %75 {offsets = [0, 8, 0], sizes = [2, 8, 256], strides = [1, 1, 1]} : vector<2x32x256xf32> to vector<2x8x256xf32>
    %78 = arith.maximumf %76, %77 : vector<2x8x256xf32>
    %79 = vector.extract_strided_slice %75 {offsets = [0, 16, 0], sizes = [2, 8, 256], strides = [1, 1, 1]} : vector<2x32x256xf32> to vector<2x8x256xf32>
    %80 = arith.maximumf %78, %79 : vector<2x8x256xf32>
    %81 = vector.extract_strided_slice %75 {offsets = [0, 24, 0], sizes = [2, 8, 256], strides = [1, 1, 1]} : vector<2x32x256xf32> to vector<2x8x256xf32>
    %82 = arith.maximumf %80, %81 : vector<2x8x256xf32>
    %c0_52 = arith.constant 0 : index
    %c0_53 = arith.constant 0 : index
    %c0_54 = arith.constant 0 : index
    %83 = vector.load %arg2[%c0_52, %c0_53, %c0_54] : memref<2x512x8xbf16, #tpu.memory_space<vmem>>, vector<2x8x8xbf16>
    %84 = vector.shape_cast %83 : vector<2x8x8xbf16> to vector<16x8xbf16>
    %c0_55 = arith.constant 0 : index
    %c0_56 = arith.constant 0 : index
    %85 = vector.load %arg11[%c0_55, %c0_56] : memref<8x256xbf16, #tpu.memory_space<vmem>>, vector<8x256xbf16>
    %cst_57 = arith.constant dense<0.000000e+00> : vector<16x256xf32>
    %86 = tpu.matmul %84, %85, %cst_57 {dimension_numbers = #tpu.dot_dimension_numbers<[1], [0], [0], [1], [0, 0, 1, 1], [], []>} : vector<16x8xbf16>, vector<8x256xbf16>, vector<16x256xf32> -> vector<16x256xf32>
    %87 = vector.shape_cast %86 : vector<16x256xf32> to vector<2x8x256xf32>
    %88 = arith.subf %82, %87 : vector<2x8x256xf32>
    %c0_58 = arith.constant 0 : index
    %c0_59 = arith.constant 0 : index
    %89 = vector.load %arg13[%c0_58, %c0_59] : memref<1x256xf32, #tpu.memory_space<vmem>>, vector<1x256xf32>
    %90 = vector.shape_cast %89 : vector<1x256xf32> to vector<1x1x256xf32>
    %91 = vector.broadcast %90 : vector<1x1x256xf32> to vector<2x8x256xf32>
    %92 = arith.addf %88, %91 : vector<2x8x256xf32>
    %cst_60 = arith.constant 0.000000e+00 : f32
    %93 = vector.broadcast %cst_60 : f32 to vector<2x8x256xf32>
    %94 = arith.maximumf %92, %93 : vector<2x8x256xf32>
    %95 = vector.shape_cast %94 : vector<2x8x256xf32> to vector<16x256xf32>
    %96 = arith.truncf %95 : vector<16x256xf32> to vector<16x256xbf16>
    %c0_61 = arith.constant 0 : index
    %c0_62 = arith.constant 0 : index
    %97 = vector.load %arg14[%c0_61, %c0_62] : memref<256x256xbf16, #tpu.memory_space<vmem>>, vector<256x256xbf16>
    %cst_63 = arith.constant dense<0.000000e+00> : vector<16x256xf32>
    %98 = tpu.matmul %96, %97, %cst_63 {dimension_numbers = #tpu.dot_dimension_numbers<[1], [0], [0], [1], [0, 0, 1, 1], [], []>} : vector<16x256xbf16>, vector<256x256xbf16>, vector<16x256xf32> -> vector<16x256xf32>
    %c0_64 = arith.constant 0 : index
    %c0_65 = arith.constant 0 : index
    %99 = vector.load %arg15[%c0_64, %c0_65] : memref<1x256xf32, #tpu.memory_space<vmem>>, vector<1x256xf32>
    %100 = vector.broadcast %99 : vector<1x256xf32> to vector<16x256xf32>
    %101 = arith.addf %98, %100 : vector<16x256xf32>
    %c0_66 = arith.constant 0 : index
    %c0_67 = arith.constant 0 : index
    %102 = vector.load %arg16[%c0_66, %c0_67] : memref<1x256xf32, #tpu.memory_space<vmem>>, vector<1x256xf32>
    %103 = vector.broadcast %102 : vector<1x256xf32> to vector<16x256xf32>
    %104 = arith.mulf %101, %103 : vector<16x256xf32>
    %c0_68 = arith.constant 0 : index
    %c0_69 = arith.constant 0 : index
    %105 = vector.load %arg17[%c0_68, %c0_69] : memref<1x256xf32, #tpu.memory_space<vmem>>, vector<1x256xf32>
    %106 = vector.broadcast %105 : vector<1x256xf32> to vector<16x256xf32>
    %107 = arith.addf %104, %106 : vector<16x256xf32>
    %108 = vector.shape_cast %107 : vector<16x256xf32> to vector<2x8x256xf32>
    %c0_70 = arith.constant 0 : index
    %c0_71 = arith.constant 0 : index
    %c0_72 = arith.constant 0 : index
    %109 = vector.load %arg24[%c0_70, %c0_71, %c0_72] : memref<2x8x256xf32, #tpu.memory_space<vmem>>, vector<2x8x256xf32>
    tpu.vector_store %arg24[%c0_70, %c0_71, %c0_72], %108 {strides = array<i32>} : memref<2x8x256xf32, #tpu.memory_space<vmem>>, vector<2x8x256xf32>,
    %cst_73 = arith.constant dense<0.000000e+00> : vector<2x256xf32>
    %110 = vector.multi_reduction <add>, %108, %cst_73 [1] : vector<2x8x256xf32> to vector<2x256xf32>
    %cst_74 = arith.constant 8.000000e+00 : f32
    %111 = vector.broadcast %cst_74 : f32 to vector<2x256xf32>
    %112 = arith.divf %110, %111 : vector<2x256xf32>
    %cst_75 = arith.constant 0.000000e+00 : f32
    %113 = vector.broadcast %cst_75 : f32 to vector<2x256xf32>
    %114 = arith.maximumf %112, %113 : vector<2x256xf32>
    %115 = arith.truncf %114 : vector<2x256xf32> to vector<2x256xbf16>
    %c0_76 = arith.constant 0 : index
    %c0_77 = arith.constant 0 : index
    %116 = vector.load %arg18[%c0_76, %c0_77] : memref<256x512xbf16, #tpu.memory_space<vmem>>, vector<256x512xbf16>
    %cst_78 = arith.constant dense<0.000000e+00> : vector<2x512xf32>
    %117 = tpu.matmul %115, %116, %cst_78 {dimension_numbers = #tpu.dot_dimension_numbers<[1], [0], [0], [1], [0, 0, 1, 1], [], []>} : vector<2x256xbf16>, vector<256x512xbf16>, vector<2x512xf32> -> vector<2x512xf32>
    %c0_79 = arith.constant 0 : index
    %c0_80 = arith.constant 0 : index
    %118 = vector.load %arg19[%c0_79, %c0_80] : memref<1x512xf32, #tpu.memory_space<vmem>>, vector<1x512xf32>
    %119 = vector.broadcast %118 : vector<1x512xf32> to vector<2x512xf32>
    %120 = arith.addf %117, %119 : vector<2x512xf32>
    %cst_81 = arith.constant 0.000000e+00 : f32
    %121 = vector.broadcast %cst_81 : f32 to vector<2x512xf32>
    %122 = arith.maximumf %120, %121 : vector<2x512xf32>
    %123 = arith.truncf %122 : vector<2x512xf32> to vector<2x512xbf16>
    %c0_82 = arith.constant 0 : index
    %c0_83 = arith.constant 0 : index
    %124 = vector.load %arg20[%c0_82, %c0_83] : memref<512x256xbf16, #tpu.memory_space<vmem>>, vector<512x256xbf16>
    %cst_84 = arith.constant dense<0.000000e+00> : vector<2x256xf32>
    %125 = tpu.matmul %123, %124, %cst_84 {dimension_numbers = #tpu.dot_dimension_numbers<[1], [0], [0], [1], [0, 0, 1, 1], [], []>} : vector<2x512xbf16>, vector<512x256xbf16>, vector<2x256xf32> -> vector<2x256xf32>
    %c0_85 = arith.constant 0 : index
    %c0_86 = arith.constant 0 : index
    %126 = vector.load %arg21[%c0_85, %c0_86] : memref<1x256xf32, #tpu.memory_space<vmem>>, vector<1x256xf32>
    %127 = vector.broadcast %126 : vector<1x256xf32> to vector<2x256xf32>
    %128 = arith.addf %125, %127 : vector<2x256xf32>
    %cst_87 = arith.constant 0.000000e+00 : f32
    %129 = vector.broadcast %cst_87 : f32 to vector<2x256xf32>
    %130 = arith.maximumf %128, %129 : vector<2x256xf32>
    %131 = arith.truncf %130 : vector<2x256xf32> to vector<2x256xbf16>
    %c0_88 = arith.constant 0 : index
    %c0_89 = arith.constant 0 : index
    %132 = vector.load %arg22[%c0_88, %c0_89] : memref<256x128xbf16, #tpu.memory_space<vmem>>, vector<256x128xbf16>
    %cst_90 = arith.constant dense<0.000000e+00> : vector<2x128xf32>
    %133 = tpu.matmul %131, %132, %cst_90 {dimension_numbers = #tpu.dot_dimension_numbers<[1], [0], [0], [1], [0, 0, 1, 1], [], []>} : vector<2x256xbf16>, vector<256x128xbf16>, vector<2x128xf32> -> vector<2x128xf32>
    %c0_91 = arith.constant 0 : index
    %c0_92 = arith.constant 0 : index
    %134 = vector.load %arg23[%c0_91, %c0_92] : memref<1x128xf32, #tpu.memory_space<vmem>>, vector<1x128xf32>
    %135 = vector.broadcast %134 : vector<1x128xf32> to vector<2x128xf32>
    %136 = arith.addf %133, %135 : vector<2x128xf32>
    %cst_93 = arith.constant dense<0xFF800000> : vector<2xf32>
    %137 = vector.multi_reduction <maximumf>, %136, %cst_93 [1] : vector<2x128xf32> to vector<2xf32>
    %138 = vector.shape_cast %137 : vector<2xf32> to vector<2x1xf32>
    %139 = vector.broadcast %138 : vector<2x1xf32> to vector<2x128xf32>
    %140 = arith.subf %136, %139 : vector<2x128xf32>
    %141 = math.exp %140 : vector<2x128xf32>
    %cst_94 = arith.constant dense<0.000000e+00> : vector<2xf32>
    %142 = vector.multi_reduction <add>, %141, %cst_94 [1] : vector<2x128xf32> to vector<2xf32>
    %143 = vector.shape_cast %142 : vector<2xf32> to vector<2x1xf32>
    %144 = math.log %143 : vector<2x1xf32>
    %145 = arith.addf %144, %138 : vector<2x1xf32>
    %146 = vector.broadcast %145 : vector<2x1xf32> to vector<2x128xf32>
    %147 = arith.subf %136, %146 : vector<2x128xf32>
    %148 = vector.shape_cast %147 : vector<2x128xf32> to vector<2x1x128xf32>
    %c0_95 = arith.constant 0 : index
    %c0_96 = arith.constant 0 : index
    %c0_97 = arith.constant 0 : index
    %149 = vector.load %arg25[%c0_95, %c0_96, %c0_97] : memref<2x1x128xf32, #tpu.memory_space<vmem>>, vector<2x1x128xf32>
    tpu.vector_store %arg25[%c0_95, %c0_96, %c0_97], %148 {strides = array<i32>} : memref<2x1x128xf32, #tpu.memory_space<vmem>>, vector<2x1x128xf32>,
    return
  }
  func.func @transform_0(%arg0: i32) -> (i32, i32, i32) {
    %c0_i32 = arith.constant 0 : i32
    %c0_i32_0 = arith.constant 0 : i32
    %c0_i32_1 = arith.constant 0 : i32
    return %arg0, %c0_i32, %c0_i32_0 : i32, i32, i32
  }
  func.func @transform_1(%arg0: i32) -> (i32, i32, i32) {
    %c0_i32 = arith.constant 0 : i32
    %c0_i32_0 = arith.constant 0 : i32
    %c0_i32_1 = arith.constant 0 : i32
    return %arg0, %c0_i32, %c0_i32_0 : i32, i32, i32
  }
  func.func @transform_2(%arg0: i32) -> (i32, i32) {
    %c0_i32 = arith.constant 0 : i32
    %c0_i32_0 = arith.constant 0 : i32
    %c0_i32_1 = arith.constant 0 : i32
    return %c0_i32, %c0_i32_0 : i32, i32
  }
  func.func @transform_3(%arg0: i32) -> (i32, i32) {
    %c0_i32 = arith.constant 0 : i32
    %c0_i32_0 = arith.constant 0 : i32
    %c0_i32_1 = arith.constant 0 : i32
    return %c0_i32, %c0_i32_0 : i32, i32
  }
  func.func @transform_4(%arg0: i32) -> (i32, i32) {
    %c0_i32 = arith.constant 0 : i32
    %c0_i32_0 = arith.constant 0 : i32
    %c0_i32_1 = arith.constant 0 : i32
    return %c0_i32, %c0_i32_0 : i32, i32
  }
  func.func @transform_5(%arg0: i32) -> (i32, i32) {
    %c0_i32 = arith.constant 0 : i32
    %c0_i32_0 = arith.constant 0 : i32
    %c0_i32_1 = arith.constant 0 : i32
    return %c0_i32, %c0_i32_0 : i32, i32
  }
  func.func @transform_6(%arg0: i32) -> (i32, i32) {
    %c0_i32 = arith.constant 0 : i32
    %c0_i32_0 = arith.constant 0 : i32
    %c0_i32_1 = arith.constant 0 : i32
    return %c0_i32, %c0_i32_0 : i32, i32
  }
  func.func @transform_7(%arg0: i32) -> (i32, i32) {
    %c0_i32 = arith.constant 0 : i32
    %c0_i32_0 = arith.constant 0 : i32
    %c0_i32_1 = arith.constant 0 : i32
    return %c0_i32, %c0_i32_0 : i32, i32
  }
  func.func @transform_8(%arg0: i32) -> (i32, i32) {
    %c0_i32 = arith.constant 0 : i32
    %c0_i32_0 = arith.constant 0 : i32
    %c0_i32_1 = arith.constant 0 : i32
    return %c0_i32, %c0_i32_0 : i32, i32
  }
  func.func @transform_9(%arg0: i32) -> (i32, i32) {
    %c0_i32 = arith.constant 0 : i32
    %c0_i32_0 = arith.constant 0 : i32
    %c0_i32_1 = arith.constant 0 : i32
    return %c0_i32, %c0_i32_0 : i32, i32
  }
  func.func @transform_10(%arg0: i32) -> (i32, i32) {
    %c0_i32 = arith.constant 0 : i32
    %c0_i32_0 = arith.constant 0 : i32
    %c0_i32_1 = arith.constant 0 : i32
    return %c0_i32, %c0_i32_0 : i32, i32
  }
  func.func @transform_11(%arg0: i32) -> (i32, i32) {
    %c0_i32 = arith.constant 0 : i32
    %c0_i32_0 = arith.constant 0 : i32
    %c0_i32_1 = arith.constant 0 : i32
    return %c0_i32, %c0_i32_0 : i32, i32
  }
  func.func @transform_12(%arg0: i32) -> (i32, i32) {
    %c0_i32 = arith.constant 0 : i32
    %c0_i32_0 = arith.constant 0 : i32
    %c0_i32_1 = arith.constant 0 : i32
    return %c0_i32, %c0_i32_0 : i32, i32
  }
  func.func @transform_13(%arg0: i32) -> (i32, i32) {
    %c0_i32 = arith.constant 0 : i32
    %c0_i32_0 = arith.constant 0 : i32
    %c0_i32_1 = arith.constant 0 : i32
    return %c0_i32, %c0_i32_0 : i32, i32
  }
  func.func @transform_14(%arg0: i32) -> (i32, i32) {
    %c0_i32 = arith.constant 0 : i32
    %c0_i32_0 = arith.constant 0 : i32
    %c0_i32_1 = arith.constant 0 : i32
    return %c0_i32, %c0_i32_0 : i32, i32
  }
  func.func @transform_15(%arg0: i32) -> (i32, i32) {
    %c0_i32 = arith.constant 0 : i32
    %c0_i32_0 = arith.constant 0 : i32
    %c0_i32_1 = arith.constant 0 : i32
    return %c0_i32, %c0_i32_0 : i32, i32
  }
  func.func @transform_16(%arg0: i32) -> (i32, i32) {
    %c0_i32 = arith.constant 0 : i32
    %c0_i32_0 = arith.constant 0 : i32
    %c0_i32_1 = arith.constant 0 : i32
    return %c0_i32, %c0_i32_0 : i32, i32
  }
  func.func @transform_17(%arg0: i32) -> (i32, i32) {
    %c0_i32 = arith.constant 0 : i32
    %c0_i32_0 = arith.constant 0 : i32
    %c0_i32_1 = arith.constant 0 : i32
    return %c0_i32, %c0_i32_0 : i32, i32
  }
  func.func @transform_18(%arg0: i32) -> (i32, i32) {
    %c0_i32 = arith.constant 0 : i32
    %c0_i32_0 = arith.constant 0 : i32
    %c0_i32_1 = arith.constant 0 : i32
    return %c0_i32, %c0_i32_0 : i32, i32
  }
  func.func @transform_19(%arg0: i32) -> (i32, i32) {
    %c0_i32 = arith.constant 0 : i32
    %c0_i32_0 = arith.constant 0 : i32
    %c0_i32_1 = arith.constant 0 : i32
    return %c0_i32, %c0_i32_0 : i32, i32
  }
  func.func @transform_20(%arg0: i32) -> (i32, i32) {
    %c0_i32 = arith.constant 0 : i32
    %c0_i32_0 = arith.constant 0 : i32
    %c0_i32_1 = arith.constant 0 : i32
    return %c0_i32, %c0_i32_0 : i32, i32
  }
  func.func @transform_21(%arg0: i32) -> (i32, i32) {
    %c0_i32 = arith.constant 0 : i32
    %c0_i32_0 = arith.constant 0 : i32
    %c0_i32_1 = arith.constant 0 : i32
    return %c0_i32, %c0_i32_0 : i32, i32
  }
  func.func @transform_22(%arg0: i32) -> (i32, i32) {
    %c0_i32 = arith.constant 0 : i32
    %c0_i32_0 = arith.constant 0 : i32
    %c0_i32_1 = arith.constant 0 : i32
    return %c0_i32, %c0_i32_0 : i32, i32
  }
  func.func @transform_23(%arg0: i32) -> (i32, i32, i32) {
    %c0_i32 = arith.constant 0 : i32
    %c0_i32_0 = arith.constant 0 : i32
    %c0_i32_1 = arith.constant 0 : i32
    return %arg0, %c0_i32, %c0_i32_0 : i32, i32, i32
  }
  func.func @transform_24(%arg0: i32) -> (i32, i32, i32) {
    %c0_i32 = arith.constant 0 : i32
    %c0_i32_0 = arith.constant 0 : i32
    %c0_i32_1 = arith.constant 0 : i32
    return %arg0, %c0_i32, %c0_i32_0 : i32, i32, i32
  }
}

</mosaic_0001>

<bundles_post_ra>
// kernel: forward.1
= control target key start
LH: loop header
LB: loop body
LE: loop exit
PB: predicated region body
PF: predicated region fallthrough
CT: control target
= control target key end

     0   :  { %s11432_s0 = inlined_call_operand.vmem [shape: bf16[4,512,4], index: 0, kind: input, shape index: {}]   ;;  %s11433_s1 = inlined_call_operand.vmem [shape: bf16[4,512,8], index: 1, kind: input, shape index: {}]   ;;  %s11434_s2 = inlined_call_operand.vmem [shape: bf16[4,32], index: 2, kind: input, shape index: {}]   ;;  %s11435_s3 = inlined_call_operand.vmem [shape: f32[1,32], index: 3, kind: input, shape index: {}]   ;;  %s11436_s4 = inlined_call_operand.vmem [shape: bf16[8,64], index: 4, kind: input, shape index: {}]   ;;  %s11437_s5 = inlined_call_operand.vmem [shape: bf16[32,64], index: 5, kind: input, shape index: {}]   ;;  %s11438_s6 = inlined_call_operand.vmem [shape: f32[1,64], index: 6, kind: input, shape index: {}]   ;;  %s11439_s7 = inlined_call_operand.vmem [shape: bf16[8,128], index: 7, kind: input, shape index: {}]   ;;  %s11440_s8 = inlined_call_operand.vmem [shape: bf16[64,128], index: 8, kind: input, shape index: {}]   ;;  %s11441_s9 = inlined_call_operand.vmem [shape: f32[1,128], index: 9, kind: input, shape index: {}]   ;;  %s11442_s10 = inlined_call_operand.vmem [shape: bf16[8,256], index: 10, kind: input, shape index: {}]   ;;  %s11443_s11 = inlined_call_operand.vmem [shape: bf16[128,256], index: 11, kind: input, shape index: {}]   ;;  %s11444_s12 = inlined_call_operand.vmem [shape: f32[1,256], index: 12, kind: input, shape index: {}]   ;;  %s11445_s13 = inlined_call_operand.vmem [shape: bf16[256,256], index: 13, kind: input, shape index: {}]   ;;  %s11446_s14 = inlined_call_operand.vmem [shape: f32[1,256], index: 14, kind: input, shape index: {}]   ;;  %s11447_s15 = inlined_call_operand.vmem [shape: f32[1,256], index: 15, kind: input, shape index: {}]   ;;  %s11448_s16 = inlined_call_operand.vmem [shape: f32[1,256], index: 16, kind: input, shape index: {}]   ;;  %s11449_s17 = inlined_call_operand.vmem [shape: bf16[256,512], index: 17, kind: input, shape index: {}]   ;;  %s11450_s18 = inlined_call_operand.vmem [shape: f32[1,512], index: 18, kind: input, shape index: {}]   ;;  %s11451_s19 = inlined_call_operand.vmem [shape: bf16[512,256], index: 19, kind: input, shape index: {}]   ;;  %s11452_s20 = inlined_call_operand.vmem [shape: f32[1,256], index: 20, kind: input, shape index: {}]   ;;  %s11453_s21 = inlined_call_operand.vmem [shape: bf16[256,128], index: 21, kind: input, shape index: {}]   ;;  %s11454_s22 = inlined_call_operand.vmem [shape: f32[1,128], index: 22, kind: input, shape index: {}]   ;;  %s11455_s23 = inlined_call_operand.hbm [shape: f32[4,8,256], index: 23, kind: output, shape index: {0}]   ;;  %s11456_s24 = inlined_call_operand.hbm [shape: f32[4,1,128], index: 24, kind: output, shape index: {1}]  }
   0x1   :  { %11475 = sst [smem:[#allocation56_spill]] %s11432_s0 }
   0x2   :  { %11476 = sst [smem:[#allocation57_spill]] %s11433_s1 }
   0x3   :  { %11477 = sst [smem:[#allocation58_spill]] %s11434_s2 }
   0x4   :  { %11478 = sst [smem:[#allocation59_spill]] %s11435_s3 }
   0x5   :  { %11479 = sst [smem:[#allocation60_spill]] %s11436_s4 }
   0x6   :  { %11480 = sst [smem:[#allocation61_spill]] %s11437_s5 }
   0x7   :  { %11481 = sst [smem:[#allocation62_spill]] %s11438_s6 }
   0x8   :  { %11482 = sst [smem:[#allocation63_spill]] %s11439_s7 }
   0x9   :  { %11483 = sst [smem:[#allocation64_spill]] %s11440_s8 }
   0xa   :  { %11484 = sst [smem:[#allocation65_spill]] %s11441_s9 }
   0xb   :  { %11485 = sst [smem:[#allocation66_spill]] %s11442_s10 }
   0xc   :  { %11486 = sst [smem:[#allocation67_spill]] %s11443_s11 }
   0xd   :  { %11487 = sst [smem:[#allocation68_spill]] %s11444_s12 }
   0xe   :  { %11488 = sst [smem:[#allocation69_spill]] %s11456_s24 }
   0xf   :  { %30 = vsyncpa [#allocation3], 0 }
  0x10   :  { %32 = vsyncpa [#allocation3 + $0x1], 0 }
  0x11   :  { %33 = vsyncpa [#allocation5], 0 }
  0x12   :  { %35 = vsyncpa [#allocation5 + $0x1], 0  ;;  %s8568_s5 = smov 0   ;;  %s8570_s26 = smov 0  }
  0x13   :  { %s8572_s27 = smov 0   ;;  %s8574_s28 = smov 0  }
  0x14 LB: > { %11489 = sst [smem:[#allocation8_spill]] %s8425_s5  ;;  %s8589_s6 = sadd.s32 4294967295, %s8437_s28   ;;  %s8437_s28 = sphi %s8574_s28, %s11662_s28   ;;  %s8433_s27 = sphi %s8572_s27, %s11664_s27   ;;  %s8429_s26 = sphi %s8570_s26, %s11666_s26   ;;  %s8425_s5 = sphi %s8568_s5, %s11665_s5  }
  0x15   : > { %11490 = sst [smem:[#allocation9_spill]] %s8433_s27  ;;  %s6268_s2 = sadd.s32 4294967294, %s8437_s28  }
  0x16   : > { %11491 = sst [smem:[#allocation10_spill]] %s8437_s28  ;;  %s8593_s29 = sadd.s32 1, %s8437_s28  }
  0x17   : > { %11492 = sst [smem:[#allocation11_spill]] %s8593_s29  ;;  %s541_s0 = sadd.s32 1, %s8433_s27 }
  0x18   : > { %s538_s7 = ssub.s32 %s8437_s28, %s8593_s29  ;;  %p551_p0 = scmp.ne.s32.totalorder %s8433_s27, %s8429_s26 }
  0x19   : > { %p539_p1 = scmp.eq.s32.totalorder %s538_s7, 0  ;;  %p552_p2 = scmp.eq.s32.totalorder %s8589_s6, 1 }
  0x1a   : > { %p557_p3 = scmp.ne.s32.totalorder %s8429_s26, %s8425_s5  ;;  %p558_p4 = scmp.eq.s32.totalorder %s6268_s2, 1 }
  0x1b   : > { %s8604_s30 = scalar_select %p539_p1, %s8433_s27, %s541_s0  }
  0x1c   : > { %p8606_p5 = por %p552_p2, %p551_p0  ;;  %p8610_p6 = por %p558_p4, %p557_p3 }
  0x1d   : > { %11493 = sst [smem:[#allocation12_spill]] %s8604_s30  ;;  %p6271_p7 = scmp.ge.s32.totalorder %s8437_s28, 1 }
  0x1e   : > { %s11495_s25 = scalar_select %p8610_p6, 1, 0 }
  0x1f   : > { %p685_p8 = scmp.lt.s32.totalorder %s8437_s28, 3 }
  0x20   : > { %11496 = sst [smem:[#allocation13_spill]] %s11495_s25 }
  0x21   : > { %p686_p9 = pnand %p6271_p7, %p685_p8 }
  0x23   : > { %689 = sbr.rel (%p686_p9) target bundleno = 2644 (0xa54), region = 112 }
  0x28   : > { %s11497_s1 = sld [smem:[#allocation58_spill]]  ;;  %vm1426_vm0 = vcmask 1041408   ;;  %s8620_s2 = sshll.u32 %s8589_s6, 1  ;;  %vm1233_vm1 = vcmask 31744   ;;  %vm2597_vm2 = vcmask 1043456   ;;  %vm2404_vm3 = vcmask 64512  }
  0x29   : > { %p764_p10 = scmp.lt.s32.totalorder %s8620_s2, 3  ;;  %s11498_s29 = sld [smem:[#allocation56_spill]]  ;;  %vm2942_vm4 = vcmask 261120   ;;  %vm4050_vm5 = vcmask 523264   ;;  %vm5010_vm7 = vcmask 1041409  }
  0x2a   : > { %s11499_s30 = sld [smem:[#allocation61_spill]] }
  0x2b   : > { %s765_s0 = scalar_select %p764_p10, %s8620_s2, 3 }
  0x2c   : > { %s11501_s24 = sld [smem:[#allocation60_spill]] }
  0x2d   : > { %s7930_s7 = sshll.u32 %s765_s0, 8  ;;  %s11502_s28 = sld [smem:[#allocation59_spill]] }
  0x2e   : > { %v908_v0 = vld [vmem:[%s11497_s1] sm:$0x3]  ;;  %s11500_s1 = sld [smem:[#allocation57_spill]] }
  0x2f   : > { %v1428_v1 = vsel %vm1426_vm0, %v908_v0, 0  ;;  %s8628_s25 = scalar_lea.vmem %s11498_s29, %s7930_s7  ;;  %s11529_s11 = sld [smem:[#allocation67_spill]] }
  0x30   : > { %1437 = vmatpush.bf16.msra.mxu0 %v1428_v1  ;;  %v7932_v2 = vld [vmem:[%s8628_s25] sm:$0xff]  ;;  %v7933_v3 = vld [vmem:[%s8628_s25 + $0x8] sm:$0xff]  ;;  %v7934_v4 = vld [vmem:[%s8628_s25 + $0x10] sm:$0xff]  ;;  %s11534_s10 = sld [smem:[#allocation66_spill]] }
  0x31   : > { %v7935_v5 = vld [vmem:[%s8628_s25 + $0x18] sm:$0xff]  ;;  %v7936_v6 = vld [vmem:[%s8628_s25 + $0x20] sm:$0xff]  ;;  %v7937_v7 = vld [vmem:[%s8628_s25 + $0x28] sm:$0xff]  ;;  %s11556_s4 = sld [smem:[#allocation64_spill]] }
  0x32   : > { %v7938_v8 = vld [vmem:[%s8628_s25 + $0x30] sm:$0xff]  ;;  %v7997_v9 = vld [vmem:[%s11499_s30 + $0x8] sm:$0xff]  ;;  %v2083_v10 = vld [vmem:[%s11501_s24] sm:$0xf]  ;;  %s11642_s9 = sld [smem:[#allocation65_spill]] }
  0x33   : > { %6536 = vmatmul.msk.bf16.vlgmr.msra.gmra.mxu0 %vm1233_vm1, %v7932_v2  ;;  %3141 = vmatpush.bf16.msra.mxu2 %v7997_v9  ;;  %v2599_v11 = vsel %vm2597_vm2, %v2083_v10, 0  ;;  %v7996_v12 = vld [vmem:[%s11499_s30] sm:$0xff]  ;;  %v7939_v14 = vld [vmem:[%s8628_s25 + $0x38] sm:$0xff]  ;;  %v7941_v27 = vld [vmem:[%s8628_s25 + $0x48] sm:$0xff]  ;;  %s11655_s12 = sld [smem:[#allocation68_spill]] }
  0x34   : > { %s8650_s0 = scalar_lea.vmem %s11500_s1, %s7930_s7  ;;  %2608 = vmatpush.bf16.msra.mxu1 %v2599_v11  ;;  %3727 = vmatpush.bf16.msra.mxu3 %v2599_v11  ;;  %v7940_v16 = vld [vmem:[%s8628_s25 + $0x40] sm:$0xff]  ;;  %s11503_s7 = smov %s11502_s28  ;;  %v7942_v37 = vld [vmem:[%s8628_s25 + $0x50] sm:$0xff]  ;;  %v7943_v47 = vld [vmem:[%s8628_s25 + $0x58] sm:$0xff] }
  0x35   : > { %v7998_v13 = vld [vmem:[%s8650_s0] sm:$0xff]  ;;  %v7999_v15 = vld [vmem:[%s8650_s0 + $0x8] sm:$0xff]  ;;  %v8000_v25 = vld [vmem:[%s8650_s0 + $0x10] sm:$0xff]  ;;  %s11516_s1 = sld [smem:[#allocation63_spill]] }
  0x36   : > { %v8669_v18 = vld [vmem:[%s11502_s28] ss:$0 sm:$0xff]  ;;  %v8685_v29 = vld [vmem:[%s8650_s0 + $0x8] sm:$0xff]  ;;  %v8001_v35 = vld [vmem:[%s8650_s0 + $0x18] sm:$0xff]  ;;  %s11561_s28 = sld [smem:[#allocation62_spill]] }
  0x37   : > { %3142 = vmatpush.bf16.msra.mxu2 %v7996_v12  ;;  %6856 = vmatmul.msk.bf16.vlgmr.msra.gmra.mxu1 %vm2404_vm3, %v7998_v13  ;;  %v8673_v19 = vld [vmem:[%s8650_s0] sm:$0xff]  ;;  %v8697_v39 = vld [vmem:[%s8650_s0 + $0x10] sm:$0xff]  ;;  %v8709_v49 = vld [vmem:[%s8650_s0 + $0x18] sm:$0xff] }
  0x38   : > { %7056 = vmatmul.msk.bf16.vlgmr.msra.gmra.mxu3 %vm2404_vm3, %v8673_v19  ;;  %v8002_v45 = vld [vmem:[%s8650_s0 + $0x20] sm:$0xff]  ;;  %v8003_v55 = vld [vmem:[%s8650_s0 + $0x28] sm:$0xff]  ;;  %v8004_v1 = vld [vmem:[%s8650_s0 + $0x30] sm:$0xff] }
  0x39   : > { %v7944_v57 = vld [vmem:[%s8628_s25 + $0x60] sm:$0xff]  ;;  %v8005_v11 = vld [vmem:[%s8650_s0 + $0x38] sm:$0xff]  ;;  %v7946_v13 = vld [vmem:[%s8628_s25 + $0x70] sm:$0xff] }
  0x3a   : > { %v8721_v59 = vld [vmem:[%s8650_s0 + $0x20] sm:$0xff] }
  0x3c   : > { %s11562_s8 = smov %s11561_s28 }
  0x43   : > { %6537 = vmatmul.msk.bf16.gmra.mxu0 %vm1233_vm1, %v7933_v3  ;;  %v7945_v3 = vld [vmem:[%s8628_s25 + $0x68] sm:$0xff] }
  0x47   : > { %6857 = vmatmul.msk.bf16.gmra.mxu1 %vm2404_vm3, %v7999_v15  ;;  %v8745_v15 = vld [vmem:[%s8650_s0 + $0x30] sm:$0xff] }
  0x48   : > { %7057 = vmatmul.msk.bf16.gmra.mxu3 %vm2404_vm3, %v8685_v29 }
  0x53   : > { %6538 = vmatmul.msk.bf16.gmra.mxu0 %vm1233_vm1, %v7934_v4 }
  0x57   : > { %6858 = vmatmul.msk.bf16.gmra.mxu1 %vm2404_vm3, %v8000_v25 }
  0x58   : > { %7058 = vmatmul.msk.bf16.gmra.mxu3 %vm2404_vm3, %v8697_v39 }
  0x63   : > { %6539 = vmatmul.msk.bf16.gmra.mxu0 %vm1233_vm1, %v7935_v5  ;;  %v8733_v5 = vld [vmem:[%s8650_s0 + $0x28] sm:$0xff] }
  0x67   : > { %6859 = vmatmul.msk.bf16.gmra.mxu1 %vm2404_vm3, %v8001_v35 }
  0x68   : > { %7059 = vmatmul.msk.bf16.gmra.mxu3 %vm2404_vm3, %v8709_v49 }
  0x73   : > { %6540 = vmatmul.msk.bf16.gmra.mxu0 %vm1233_vm1, %v7936_v6 }
  0x77   : > { %6860 = vmatmul.msk.bf16.gmra.mxu1 %vm2404_vm3, %v8002_v45 }
  0x78   : > { %7060 = vmatmul.msk.bf16.gmra.mxu3 %vm2404_vm3, %v8721_v59 }
  0x83   : > { %6541 = vmatmul.msk.bf16.gmra.mxu0 %vm1233_vm1, %v7937_v7 }
  0x87   : > { %6861 = vmatmul.msk.bf16.gmra.mxu1 %vm2404_vm3, %v8003_v55 }
  0x88   : > { %7061 = vmatmul.msk.bf16.gmra.mxu3 %vm2404_vm3, %v8733_v5 }
  0x93   : > { %6542 = vmatmul.msk.bf16.gmra.mxu0 %vm1233_vm1, %v7938_v8 }
  0x97   : > { %6862 = vmatmul.msk.bf16.gmra.mxu1 %vm2404_vm3, %v8004_v1 }
  0x98   : > { %7062 = vmatmul.msk.bf16.gmra.mxu3 %vm2404_vm3, %v8745_v15 }
  0xa3   : > { %6543 = vmatmul.msk.bf16.gmra.mxu0 %vm1233_vm1, %v7939_v14 }
  0xa7   : > { %6863 = vmatmul.msk.bf16.gmra.mxu1 %vm2404_vm3, %v8005_v11 }
  0xb0   : > { %v1439_v17 = vpop.f32.mrf.mxu0 }
  0xb1   : > { %v1440_v20 = vadd.f32 %v8669_v18, %v1439_v17 }
  0xb3   : > { %6544 = vmatmul.msk.bf16.gmra.mxu0 %vm1233_vm1, %v7940_v16  ;;  %v1759_v23 = vmax.f32 %v1440_v20, 0.0 }
  0xb8   : > { %v1441_v21 = vpop.f32.mrf.mxu0 }
  0xb9   : > { %v1442_v22 = vadd.f32 %v8669_v18, %v1441_v21  ;;  %v2610_v21 = vpop.f32.mrf.mxu1 }
  0xbb   : > { %v1760_v24 = vmax.f32 %v1442_v22, 0.0 }
  0xbd   : > { %v1887_v26 = vpack.c.bf16 %v1760_v24, %v1759_v23  ;;  %v8006_v24 = vld [vmem:[%s8650_s0 + $0x40] sm:$0xff] }
  0xbe   : > { %6864 = vmatmul.msk.bf16.gmra.mxu1 %vm2404_vm3, %v8006_v24 }
  0xbf   : > { %6928 = vmatmul.msk.bf16.vlgmr.msra.gmra.mxu2 %vm2942_vm4, %v1887_v26  ;;  %v7947_v26 = vld [vmem:[%s8628_s25 + $0x78] sm:$0xff] }
  0xc0   : > { %v1444_v28 = vpop.f32.mrf.mxu0 }
  0xc1   : > { %v1445_v30 = vadd.f32 %v8669_v18, %v1444_v28  ;;  %v2612_v28 = vpop.f32.mrf.mxu1 }
  0xc3   : > { %6545 = vmatmul.msk.bf16.gmra.mxu0 %vm1233_vm1, %v7941_v27  ;;  %v1761_v33 = vmax.f32 %v1445_v30, 0.0  ;;  %v8757_v30 = vld [vmem:[%s8650_s0 + $0x38] sm:$0xff] }
  0xc4   : > { %7063 = vmatmul.msk.bf16.gmra.mxu3 %vm2404_vm3, %v8757_v30 }
  0xc8   : > { %v1446_v31 = vpop.f32.mrf.mxu0 }
  0xc9   : > { %v1447_v32 = vadd.f32 %v8669_v18, %v1446_v31 }
  0xcb   : > { %v1762_v34 = vmax.f32 %v1447_v32, 0.0 }
  0xcd   : > { %v1888_v36 = vpack.c.bf16 %v1762_v34, %v1761_v33  ;;  %v2615_v34 = vpop.f32.mrf.mxu1 }
  0xcf   : > { %6929 = vmatmul.msk.bf16.gmra.mxu2 %vm2942_vm4, %v1888_v36 }
  0xd0   : > { %v1449_v38 = vpop.f32.mrf.mxu0 }
  0xd1   : > { %v1450_v40 = vadd.f32 %v8669_v18, %v1449_v38 }
  0xd3   : > { %6546 = vmatmul.msk.bf16.gmra.mxu0 %vm1233_vm1, %v7942_v37  ;;  %v1763_v43 = vmax.f32 %v1450_v40, 0.0  ;;  %v8007_v37 = vld [vmem:[%s8650_s0 + $0x48] sm:$0xff]  ;;  %v7948_v40 = vld [vmem:[%s8628_s25 + $0x80] sm:$0xff] }
  0xd4   : > { %6865 = vmatmul.msk.bf16.gmra.mxu1 %vm2404_vm3, %v8007_v37 }
  0xd8   : > { %v1451_v41 = vpop.f32.mrf.mxu0 }
  0xd9   : > { %v1452_v42 = vadd.f32 %v8669_v18, %v1451_v41 }
  0xdb   : > { %v1764_v44 = vmax.f32 %v1452_v42, 0.0  ;;  %v2617_v42 = vpop.f32.mrf.mxu1 }
  0xdd   : > { %v1889_v46 = vpack.c.bf16 %v1764_v44, %v1763_v43  ;;  %v8769_v43 = vld [vmem:[%s8650_s0 + $0x100] sm:$0xff] }
  0xde   : > { %7064 = vmatmul.msk.bf16.gmra.mxu3 %vm2404_vm3, %v8769_v43 }
  0xdf   : > { %6930 = vmatmul.msk.bf16.gmra.mxu2 %vm2942_vm4, %v1889_v46 }
  0xe0   : > { %v1454_v48 = vpop.f32.mrf.mxu0 }
  0xe1   : > { %v1455_v50 = vadd.f32 %v8669_v18, %v1454_v48  ;;  %v8775_v48 = vpop.f32.mrf.mxu3 }
  0xe3   : > { %6547 = vmatmul.msk.bf16.gmra.mxu0 %vm1233_vm1, %v7943_v47  ;;  %v1765_v53 = vmax.f32 %v1455_v50, 0.0  ;;  %v2620_v47 = vpop.f32.mrf.mxu1 }
  0xe8   : > { %v1456_v51 = vpop.f32.mrf.mxu0 }
  0xe9   : > { %v1457_v52 = vadd.f32 %v8669_v18, %v1456_v51 }
  0xeb   : > { %v1766_v54 = vmax.f32 %v1457_v52, 0.0  ;;  %v8008_v52 = vld [vmem:[%s8650_s0 + $0x50] sm:$0xff] }
  0xec   : > { %6866 = vmatmul.msk.bf16.gmra.mxu1 %vm2404_vm3, %v8008_v52 }
  0xed   : > { %v1890_v56 = vpack.c.bf16 %v1766_v54, %v1765_v53  ;;  %v7949_v54 = vld [vmem:[%s8628_s25 + $0x88] sm:$0xff] }
  0xef   : > { %6931 = vmatmul.msk.bf16.gmra.mxu2 %vm2942_vm4, %v1890_v56 }
  0xf0   : > { %v1459_v58 = vpop.f32.mrf.mxu0 }
  0xf1   : > { %v1460_v60 = vadd.f32 %v8669_v18, %v1459_v58 }
  0xf3   : > { %6548 = vmatmul.msk.bf16.gmra.mxu0 %vm1233_vm1, %v7944_v57  ;;  %v1767_v63 = vmax.f32 %v1460_v60, 0.0  ;;  %v2622_v57 = vpop.f32.mrf.mxu1  ;;  %v8784_v60 = vpop.f32.mrf.mxu3 }
  0xf8   : > { %v1461_v61 = vpop.f32.mrf.mxu0 }
  0xf9   : > { %v1462_v62 = vadd.f32 %v8669_v18, %v1461_v61  ;;  %v8787_v61 = vld [vmem:[%s8650_s0 + $0x108] sm:$0xff] }
  0xfa   : > { %7065 = vmatmul.msk.bf16.gmra.mxu3 %vm2404_vm3, %v8787_v61 }
  0xfb   : > { %v1768_v0 = vmax.f32 %v1462_v62, 0.0 }
  0xfd   : > { %v1891_v2 = vpack.c.bf16 %v1768_v0, %v1767_v63 }
  0xff   : > { %6932 = vmatmul.msk.bf16.gmra.mxu2 %vm2942_vm4, %v1891_v2  ;;  %v2625_v2 = vpop.f32.mrf.mxu1 }
 0x100   : > { %v1464_v4 = vpop.f32.mrf.mxu0 }
 0x101   : > { %v1465_v6 = vadd.f32 %v8669_v18, %v1464_v4 }
 0x103   : > { %6549 = vmatmul.msk.bf16.gmra.mxu0 %vm1233_vm1, %v7945_v3  ;;  %v1769_v9 = vmax.f32 %v1465_v6, 0.0 }
 0x108   : > { %v1466_v7 = vpop.f32.mrf.mxu0 }
 0x109   : > { %v1467_v8 = vadd.f32 %v8669_v18, %v1466_v7  ;;  %v8795_v7 = vpop.f32.mrf.mxu3 }
 0x10b   : > { %v1770_v10 = vmax.f32 %v1467_v8, 0.0  ;;  %v8009_v8 = vld [vmem:[%s8650_s0 + $0x58] sm:$0xff] }
 0x10c   : > { %6867 = vmatmul.msk.bf16.gmra.mxu1 %vm2404_vm3, %v8009_v8 }
 0x10d   : > { %v1892_v12 = vpack.c.bf16 %v1770_v10, %v1769_v9  ;;  %v7950_v10 = vld [vmem:[%s8628_s25 + $0x90] sm:$0xff] }
 0x10f   : > { %6933 = vmatmul.msk.bf16.gmra.mxu2 %vm2942_vm4, %v1892_v12 }
 0x110   : > { %v1469_v14 = vpop.f32.mrf.mxu0 }
 0x111   : > { %v1470_v16 = vadd.f32 %v8669_v18, %v1469_v14 }
 0x113   : > { %6550 = vmatmul.msk.bf16.gmra.mxu0 %vm1233_vm1, %v7946_v13  ;;  %v1771_v22 = vmax.f32 %v1470_v16, 0.0  ;;  %v2627_v13 = vpop.f32.mrf.mxu1  ;;  %v8804_v16 = vpop.f32.mrf.mxu3 }
 0x114   : > { %11504 = vst [vmem:[#allocation14_spill] sm:$0xff] %v8804_v16 }
 0x118   : > { %v1471_v17 = vpop.f32.mrf.mxu0 }
 0x119   : > { %v1472_v20 = vadd.f32 %v8669_v18, %v1471_v17  ;;  %v8807_v17 = vld [vmem:[%s8650_s0 + $0x110] sm:$0xff] }
 0x11a   : > { %7066 = vmatmul.msk.bf16.gmra.mxu3 %vm2404_vm3, %v8807_v17 }
 0x11b   : > { %v1772_v23 = vmax.f32 %v1472_v20, 0.0  ;;  %v2630_v24 = vpop.f32.mrf.mxu1 }
 0x11d   : > { %v1893_v25 = vpack.c.bf16 %v1772_v23, %v1771_v22 }
 0x11f   : > { %6934 = vmatmul.msk.bf16.gmra.mxu2 %vm2942_vm4, %v1893_v25 }
 0x120   : > { %v1474_v27 = vpop.f32.mrf.mxu0 }
 0x121   : > { %v1475_v31 = vadd.f32 %v8669_v18, %v1474_v27 }
 0x123   : > { %6551 = vmatmul.msk.bf16.gmra.mxu0 %vm1233_vm1, %v7947_v26  ;;  %v1773_v35 = vmax.f32 %v1475_v31, 0.0  ;;  %v8010_v31 = vld [vmem:[%s8650_s0 + $0x60] sm:$0xff] }
 0x124   : > { %6868 = vmatmul.msk.bf16.gmra.mxu1 %vm2404_vm3, %v8010_v31 }
 0x128   : > { %v1476_v32 = vpop.f32.mrf.mxu0 }
 0x129   : > { %v1477_v33 = vadd.f32 %v8669_v18, %v1476_v32 }
 0x12b   : > { %v1774_v36 = vmax.f32 %v1477_v33, 0.0  ;;  %v7951_v33 = vld [vmem:[%s8628_s25 + $0x98] sm:$0xff] }
 0x12d   : > { %v1894_v38 = vpack.c.bf16 %v1774_v36, %v1773_v35  ;;  %v2632_v36 = vpop.f32.mrf.mxu1 }
 0x12f   : > { %6935 = vmatmul.msk.bf16.gmra.mxu2 %vm2942_vm4, %v1894_v38 }
 0x130   : > { %v1479_v41 = vpop.f32.mrf.mxu0 }
 0x131   : > { %v1480_v44 = vadd.f32 %v8669_v18, %v1479_v41 }
 0x133   : > { %6552 = vmatmul.msk.bf16.gmra.mxu0 %vm1233_vm1, %v7948_v40  ;;  %v1775_v50 = vmax.f32 %v1480_v44, 0.0  ;;  %v8827_v40 = vld [vmem:[%s8650_s0 + $0x118] sm:$0xff] }
 0x134   : > { %7067 = vmatmul.msk.bf16.gmra.mxu3 %vm2404_vm3, %v8827_v40 }
 0x138   : > { %v1481_v45 = vpop.f32.mrf.mxu0 }
 0x139   : > { %v1482_v46 = vadd.f32 %v8669_v18, %v1481_v45 }
 0x13b   : > { %v1776_v51 = vmax.f32 %v1482_v46, 0.0  ;;  %v2635_v46 = vpop.f32.mrf.mxu1 }
 0x13d   : > { %v1895_v53 = vpack.c.bf16 %v1776_v51, %v1775_v50 }
 0x13f   : > { %6936 = vmatmul.msk.bf16.gmra.mxu2 %vm2942_vm4, %v1895_v53  ;;  %v8011_v53 = vld [vmem:[%s8650_s0 + $0x68] sm:$0xff] }
 0x140   : > { %v1484_v55 = vpop.f32.mrf.mxu0  ;;  %6869 = vmatmul.msk.bf16.gmra.mxu1 %vm2404_vm3, %v8011_v53  ;;  %v8013_v53 = vld [vmem:[%s8650_s0 + $0x78] sm:$0xff] }
 0x141   : > { %v1485_v62 = vadd.f32 %v8669_v18, %v1484_v55  ;;  %v7952_v55 = vld [vmem:[%s8628_s25 + $0xa0] sm:$0xff] }
 0x142   : > { %v3144_v56 = vpop.f32.mrf.mxu2 }
 0x143   : > { %v8781_v58 = vadd.f32 %v3144_v56, %v2610_v21  ;;  %6553 = vmatmul.msk.bf16.gmra.mxu0 %vm1233_vm1, %v7949_v54  ;;  %v1777_v3 = vmax.f32 %v1485_v62, 0.0 }
 0x148   : > { %v1486_v63 = vpop.f32.mrf.mxu0 }
 0x149   : > { %v1487_v0 = vadd.f32 %v8669_v18, %v1486_v63  ;;  %v2637_v63 = vpop.f32.mrf.mxu1 }
 0x14a   : > { %v3146_v1 = vpop.f32.mrf.mxu2 }
 0x14b   : > { %v1778_v4 = vmax.f32 %v1487_v0, 0.0  ;;  %v8793_v6 = vadd.f32 %v3146_v1, %v2612_v28  ;;  %v8815_v28 = vpop.f32.mrf.mxu3 }
 0x14c   : > { %11505 = vst [vmem:[#allocation15_spill] sm:$0xff] %v8815_v28 }
 0x14d   : > { %v1896_v9 = vpack.c.bf16 %v1778_v4, %v1777_v3 }
 0x14f   : > { %6937 = vmatmul.msk.bf16.gmra.mxu2 %vm2942_vm4, %v1896_v9 }
 0x150   : > { %v1489_v11 = vpop.f32.mrf.mxu0 }
 0x151   : > { %v1490_v20 = vadd.f32 %v8669_v18, %v1489_v11 }
 0x152   : > { %v3149_v12 = vpop.f32.mrf.mxu2 }
 0x153   : > { %v8801_v14 = vadd.f32 %v3149_v12, %v2615_v34  ;;  %6554 = vmatmul.msk.bf16.gmra.mxu0 %vm1233_vm1, %v7950_v10  ;;  %v1779_v25 = vmax.f32 %v1490_v20, 0.0  ;;  %v8824_v38 = vpop.f32.mrf.mxu3  ;;  %v2640_v10 = vpop.f32.mrf.mxu1 }
 0x154   : > { %11506 = vst [vmem:[#allocation16_spill] sm:$0xff] %v8824_v38 }
 0x158   : > { %v1491_v21 = vpop.f32.mrf.mxu0 }
 0x159   : > { %v1492_v22 = vadd.f32 %v8669_v18, %v1491_v21  ;;  %v8012_v21 = vld [vmem:[%s8650_s0 + $0x70] sm:$0xff] }
 0x15a   : > { %v3151_v23 = vpop.f32.mrf.mxu2  ;;  %6870 = vmatmul.msk.bf16.gmra.mxu1 %vm2404_vm3, %v8012_v21 }
 0x15b   : > { %v1780_v26 = vmax.f32 %v1492_v22, 0.0  ;;  %v8813_v27 = vadd.f32 %v3151_v23, %v2617_v42  ;;  %v8835_v52 = vpop.f32.mrf.mxu3  ;;  %v7953_v23 = vld [vmem:[%s8628_s25 + $0xa8] sm:$0xff]  ;;  %v2642_v31 = vpop.f32.mrf.mxu1 }
 0x15c   : > { %11507 = vst [vmem:[#allocation17_spill] sm:$0xff] %v8835_v52 }
 0x15d   : > { %v1897_v32 = vpack.c.bf16 %v1780_v26, %v1779_v25 }
 0x15f   : > { %6938 = vmatmul.msk.bf16.gmra.mxu2 %vm2942_vm4, %v1897_v32 }
 0x160   : > { %v1494_v34 = vpop.f32.mrf.mxu0 }
 0x161   : > { %v1495_v41 = vadd.f32 %v8669_v18, %v1494_v34 }
 0x162   : > { %v3154_v35 = vpop.f32.mrf.mxu2 }
 0x163   : > { %v8821_v37 = vadd.f32 %v3154_v35, %v2620_v47  ;;  %6555 = vmatmul.msk.bf16.gmra.mxu0 %vm1233_vm1, %v7951_v33  ;;  %v1781_v47 = vmax.f32 %v1495_v41, 0.0  ;;  %v8844_v1 = vpop.f32.mrf.mxu3 }
 0x164   : > { %11508 = vst [vmem:[#allocation18_spill] sm:$0xff] %v8844_v1 }
 0x168   : > { %v1496_v42 = vpop.f32.mrf.mxu0 }
 0x169   : > { %v1497_v44 = vadd.f32 %v8669_v18, %v1496_v42 }
 0x16a   : > { %v3156_v45 = vpop.f32.mrf.mxu2  ;;  %6871 = vmatmul.msk.bf16.gmra.mxu1 %vm2404_vm3, %v8013_v53 }
 0x16b   : > { %v1782_v50 = vmax.f32 %v1497_v44, 0.0  ;;  %v8833_v51 = vadd.f32 %v3156_v45, %v2622_v57  ;;  %v8847_v57 = vld [vmem:[%s8650_s0 + $0x120] sm:$0xff]  ;;  %v8855_v20 = vpop.f32.mrf.mxu3  ;;  %v2645_v44 = vpop.f32.mrf.mxu1 }
 0x16c   : > { %7068 = vmatmul.msk.bf16.gmra.mxu3 %vm2404_vm3, %v8847_v57  ;;  %11509 = vst [vmem:[#allocation19_spill] sm:$0xff] %v8855_v20 }
 0x16d   : > { %v1898_v54 = vpack.c.bf16 %v1782_v50, %v1781_v47 }
 0x16f   : > { %6939 = vmatmul.msk.bf16.gmra.mxu2 %vm2942_vm4, %v1898_v54 }
 0x170   : > { %v1499_v56 = vpop.f32.mrf.mxu0 }
 0x171   : > { %v1500_v3 = vadd.f32 %v8669_v18, %v1499_v56 }
 0x172   : > { %v3159_v62 = vpop.f32.mrf.mxu2 }
 0x173   : > { %v8841_v0 = vadd.f32 %v3159_v62, %v2625_v2  ;;  %6556 = vmatmul.msk.bf16.gmra.mxu0 %vm1233_vm1, %v7952_v55  ;;  %v1783_v2 = vmax.f32 %v1500_v3, 0.0  ;;  %v8864_v33 = vpop.f32.mrf.mxu3  ;;  %v7954_v55 = vld [vmem:[%s8628_s25 + $0xb0] sm:$0xff]  ;;  %v2647_v3 = vpop.f32.mrf.mxu1 }
 0x174   : > { %11510 = vst [vmem:[#allocation20_spill] sm:$0xff] %v8864_v33 }
 0x178   : > { %v1501_v4 = vpop.f32.mrf.mxu0 }
 0x179   : > { %v1502_v8 = vadd.f32 %v8669_v18, %v1501_v4 }
 0x17a   : > { %v3161_v9 = vpop.f32.mrf.mxu2 }
 0x17b   : > { %v1784_v11 = vmax.f32 %v1502_v8, 0.0  ;;  %v8853_v12 = vadd.f32 %v3161_v9, %v2627_v13  ;;  %v8867_v13 = vld [vmem:[%s8650_s0 + $0x128] sm:$0xff]  ;;  %v8875_v50 = vpop.f32.mrf.mxu3 }
 0x17c   : > { %7069 = vmatmul.msk.bf16.gmra.mxu3 %vm2404_vm3, %v8867_v13  ;;  %11511 = vst [vmem:[#allocation21_spill] sm:$0xff] %v8875_v50 }
 0x17d   : > { %v1899_v22 = vpack.c.bf16 %v1784_v11, %v1783_v2 }
 0x17f   : > { %6940 = vmatmul.msk.bf16.gmra.mxu2 %vm2942_vm4, %v1899_v22  ;;  %v2650_v22 = vpop.f32.mrf.mxu1 }
 0x180   : > { %v1504_v25 = vpop.f32.mrf.mxu0 }
 0x181   : > { %v1505_v34 = vadd.f32 %v8669_v18, %v1504_v25 }
 0x182   : > { %v3164_v26 = vpop.f32.mrf.mxu2 }
 0x183   : > { %v8861_v32 = vadd.f32 %v3164_v26, %v2630_v24  ;;  %6557 = vmatmul.msk.bf16.gmra.mxu0 %vm1233_vm1, %v7953_v23  ;;  %v1785_v24 = vmax.f32 %v1505_v34, 0.0  ;;  %v8884_v8 = vpop.f32.mrf.mxu3  ;;  %v8014_v34 = vld [vmem:[%s8650_s0 + $0x80] sm:$0xff] }
 0x184   : > { %11512 = vst [vmem:[#allocation22_spill] sm:$0xff] %v8884_v8  ;;  %6872 = vmatmul.msk.bf16.gmra.mxu1 %vm2404_vm3, %v8014_v34 }
 0x188   : > { %v1506_v35 = vpop.f32.mrf.mxu0 }
 0x189   : > { %v1507_v41 = vadd.f32 %v8669_v18, %v1506_v35 }
 0x18a   : > { %v3166_v42 = vpop.f32.mrf.mxu2 }
 0x18b   : > { %v1786_v45 = vmax.f32 %v1507_v41, 0.0  ;;  %v8873_v47 = vadd.f32 %v3166_v42, %v2632_v36  ;;  %v8887_v36 = vld [vmem:[%s8650_s0 + $0x130] sm:$0xff]  ;;  %v8895_v26 = vpop.f32.mrf.mxu3  ;;  %v7955_v41 = vld [vmem:[%s8628_s25 + $0xb8] sm:$0xff] }
 0x18c   : > { %7070 = vmatmul.msk.bf16.gmra.mxu3 %vm2404_vm3, %v8887_v36  ;;  %11513 = vst [vmem:[#allocation23_spill] sm:$0xff] %v8895_v26 }
 0x18d   : > { %v1900_v54 = vpack.c.bf16 %v1786_v45, %v1785_v24  ;;  %v2652_v45 = vpop.f32.mrf.mxu1 }
 0x18f   : > { %6941 = vmatmul.msk.bf16.gmra.mxu2 %vm2942_vm4, %v1900_v54 }
 0x190   : > { %v1509_v56 = vpop.f32.mrf.mxu0 }
 0x191   : > { %v1510_v9 = vadd.f32 %v8669_v18, %v1509_v56 }
 0x192   : > { %v3169_v62 = vpop.f32.mrf.mxu2 }
 0x193   : > { %v8881_v4 = vadd.f32 %v3169_v62, %v2635_v46  ;;  %6558 = vmatmul.msk.bf16.gmra.mxu0 %vm1233_vm1, %v7954_v55  ;;  %v1787_v46 = vmax.f32 %v1510_v9, 0.0  ;;  %v8904_v54 = vpop.f32.mrf.mxu3 }
 0x194   : > { %11514 = vst [vmem:[#allocation24_spill] sm:$0xff] %v8904_v54 }
 0x198   : > { %v1511_v2 = vpop.f32.mrf.mxu0 }
 0x199   : > { %v1512_v11 = vadd.f32 %v8669_v18, %v1511_v2  ;;  %v2655_v2 = vpop.f32.mrf.mxu1 }
 0x19a   : > { %v3171_v21 = vpop.f32.mrf.mxu2 }
 0x19b   : > { %v1788_v23 = vmax.f32 %v1512_v11, 0.0  ;;  %v8893_v25 = vadd.f32 %v3171_v21, %v2637_v63  ;;  %v8907_v63 = vld [vmem:[%s8650_s0 + $0x138] sm:$0xff] }
 0x19c   : > { %7071 = vmatmul.msk.bf16.gmra.mxu3 %vm2404_vm3, %v8907_v63 }
 0x19d   : > { %v1901_v35 = vpack.c.bf16 %v1788_v23, %v1787_v46  ;;  %v8915_v46 = vpop.f32.mrf.mxu3  ;;  %v8015_v23 = vld [vmem:[%s8650_s0 + $0x88] sm:$0xff] }
 0x19e   : > { %11515 = vst [vmem:[#allocation25_spill] sm:$0xff] %v8915_v46  ;;  %6873 = vmatmul.msk.bf16.gmra.mxu1 %vm2404_vm3, %v8015_v23 }
 0x19f   : > { %6942 = vmatmul.msk.bf16.gmra.mxu2 %vm2942_vm4, %v1901_v35  ;;  %v7956_v35 = vld [vmem:[%s8628_s25 + $0xc0] sm:$0xff] }
 0x1a0   : > { %v1514_v42 = vpop.f32.mrf.mxu0 }
 0x1a1   : > { %v1515_v55 = vadd.f32 %v8669_v18, %v1514_v42 }
 0x1a2   : > { %v3174_v24 = vpop.f32.mrf.mxu2 }
 0x1a3   : > { %v8901_v53 = vadd.f32 %v3174_v24, %v2640_v10  ;;  %6559 = vmatmul.msk.bf16.gmra.mxu0 %vm1233_vm1, %v7955_v41  ;;  %v1789_v11 = vmax.f32 %v1515_v55, 0.0  ;;  %v2657_v24 = vpop.f32.mrf.mxu1 }
 0x1a8   : > { %v1516_v56 = vpop.f32.mrf.mxu0 }
 0x1a9   : > { %v1517_v62 = vadd.f32 %v8669_v18, %v1516_v56  ;;  %v3933_v56 = vld [vmem:[%s11516_s1] sm:$0xf] }
 0x1aa   : > { %v3176_v9 = vpop.f32.mrf.mxu2 }
 0x1ab   : > { %v1790_v10 = vmax.f32 %v1517_v62, 0.0  ;;  %v8913_v21 = vadd.f32 %v3176_v9, %v2642_v31  ;;  %v8927_v31 = vpop.f32.mrf.mxu3  ;;  %v8930_v62 = vsel %vm2597_vm2, %v3933_v56, 0  ;;  %v2660_v23 = vpop.f32.mrf.mxu1  ;;  %v8016_v56 = vld [vmem:[%s8650_s0 + $0x90] sm:$0xff] }
 0x1ac   : > { %11517 = vst [vmem:[#allocation26_spill] sm:$0xff] %v8927_v31  ;;  %3944 = vmatpush.bf16.msrb.mxu3 %v8930_v62 }
 0x1ad   : > { %v1902_v34 = vpack.c.bf16 %v1790_v10, %v1789_v11 }
 0x1ae   : > { %6874 = vmatmul.msk.bf16.gmra.mxu1 %vm2404_vm3, %v8016_v56 }
 0x1af   : > { %6943 = vmatmul.msk.bf16.gmra.mxu2 %vm2942_vm4, %v1902_v34  ;;  %7072 = vmatmul.msk.bf16.vlgmr.msrb.gmra.mxu3 %vm2404_vm3, %v8673_v19 }
 0x1b0   : > { %v1519_v41 = vpop.f32.mrf.mxu0 }
 0x1b1   : > { %v1520_v9 = vadd.f32 %v8669_v18, %v1519_v41  ;;  %v7957_v41 = vld [vmem:[%s8628_s25 + $0xc8] sm:$0xff] }
 0x1b2   : > { %v3179_v42 = vpop.f32.mrf.mxu2 }
 0x1b3   : > { %v8924_v55 = vadd.f32 %v3179_v42, %v2645_v44  ;;  %6560 = vmatmul.msk.bf16.gmra.mxu0 %vm1233_vm1, %v7956_v35  ;;  %v1791_v34 = vmax.f32 %v1520_v9, 0.0  ;;  %v8939_v31 = vpop.f32.mrf.mxu3  ;;  %v2662_v26 = vpop.f32.mrf.mxu1 }
 0x1b4   : > { %11518 = vst [vmem:[#allocation27_spill] sm:$0xff] %v8939_v31 }
 0x1b8   : > { %v1521_v11 = vpop.f32.mrf.mxu0 }
 0x1b9   : > { %v1522_v10 = vadd.f32 %v8669_v18, %v1521_v11 }
 0x1ba   : > { %v3181_v44 = vpop.f32.mrf.mxu2 }
 0x1bb   : > { %v1792_v35 = vmax.f32 %v1522_v10, 0.0  ;;  %v8937_v42 = vadd.f32 %v3181_v44, %v2647_v3  ;;  %v8948_v9 = vpop.f32.mrf.mxu3 }
 0x1bc   : > { %11519 = vst [vmem:[#allocation28_spill] sm:$0xff] %v8948_v9  ;;  %v8017_v9 = vld [vmem:[%s8650_s0 + $0x98] sm:$0xff] }
 0x1bd   : > { %v1903_v46 = vpack.c.bf16 %v1792_v35, %v1791_v34  ;;  %v2665_v35 = vpop.f32.mrf.mxu1 }
 0x1be   : > { %6875 = vmatmul.msk.bf16.gmra.mxu1 %vm2404_vm3, %v8017_v9 }
 0x1bf   : > { %6944 = vmatmul.msk.bf16.gmra.mxu2 %vm2942_vm4, %v1903_v46  ;;  %7073 = vmatmul.msk.bf16.gmra.mxu3 %vm2404_vm3, %v8685_v29  ;;  %v7958_v29 = vld [vmem:[%s8628_s25 + $0xd0] sm:$0xff] }
 0x1c0   : > { %v1524_v54 = vpop.f32.mrf.mxu0 }
 0x1c1   : > { %v1525_v10 = vadd.f32 %v8669_v18, %v1524_v54 }
 0x1c2   : > { %v3184_v19 = vpop.f32.mrf.mxu2 }
 0x1c3   : > { %v8945_v11 = vadd.f32 %v3184_v19, %v2650_v22  ;;  %6561 = vmatmul.msk.bf16.gmra.mxu0 %vm1233_vm1, %v7957_v41  ;;  %v1793_v22 = vmax.f32 %v1525_v10, 0.0  ;;  %v8958_v41 = vpop.f32.mrf.mxu3 }
 0x1c4   : > { %11520 = vst [vmem:[#allocation29_spill] sm:$0xff] %v8958_v41 }
 0x1c5   : > { %v2667_v8 = vpop.f32.mrf.mxu1 }
 0x1c8   : > { %v1526_v46 = vpop.f32.mrf.mxu0 }
 0x1c9   : > { %v1527_v44 = vadd.f32 %v8669_v18, %v1526_v46 }
 0x1ca   : > { %v3186_v34 = vpop.f32.mrf.mxu2 }
 0x1cb   : > { %v1794_v56 = vmax.f32 %v1527_v44, 0.0  ;;  %v8956_v19 = vadd.f32 %v3186_v34, %v2652_v45  ;;  %v8969_v45 = vpop.f32.mrf.mxu3 }
 0x1cc   : > { %11521 = vst [vmem:[#allocation30_spill] sm:$0xff] %v8969_v45  ;;  %v8018_v45 = vld [vmem:[%s8650_s0 + $0xa0] sm:$0xff] }
 0x1cd   : > { %v1904_v31 = vpack.c.bf16 %v1794_v56, %v1793_v22  ;;  %v2670_v56 = vpop.f32.mrf.mxu1 }
 0x1ce   : > { %6876 = vmatmul.msk.bf16.gmra.mxu1 %vm2404_vm3, %v8018_v45 }
 0x1cf   : > { %6945 = vmatmul.msk.bf16.gmra.mxu2 %vm2942_vm4, %v1904_v31  ;;  %7074 = vmatmul.msk.bf16.gmra.mxu3 %vm2404_vm3, %v8697_v39  ;;  %v7959_v39 = vld [vmem:[%s8628_s25 + $0xd8] sm:$0xff] }
 0x1d0   : > { %v1529_v54 = vpop.f32.mrf.mxu0 }
 0x1d1   : > { %v1530_v34 = vadd.f32 %v8669_v18, %v1529_v54 }
 0x1d2   : > { %v3189_v46 = vpop.f32.mrf.mxu2 }
 0x1d3   : > { %v8966_v10 = vadd.f32 %v3189_v46, %v2655_v2  ;;  %6562 = vmatmul.msk.bf16.gmra.mxu0 %vm1233_vm1, %v7958_v29  ;;  %v1795_v2 = vmax.f32 %v1530_v34, 0.0  ;;  %v8979_v29 = vpop.f32.mrf.mxu3 }
 0x1d4   : > { %11522 = vst [vmem:[#allocation31_spill] sm:$0xff] %v8979_v29 }
 0x1d5   : > { %v2672_v50 = vpop.f32.mrf.mxu1 }
 0x1d8   : > { %v1531_v31 = vpop.f32.mrf.mxu0 }
 0x1d9   : > { %v1532_v9 = vadd.f32 %v8669_v18, %v1531_v31 }
 0x1da   : > { %v3191_v22 = vpop.f32.mrf.mxu2 }
 0x1db   : > { %v1796_v46 = vmax.f32 %v1532_v9, 0.0  ;;  %v8977_v3 = vadd.f32 %v3191_v22, %v2657_v24  ;;  %v8990_v24 = vpop.f32.mrf.mxu3 }
 0x1dc   : > { %11523 = vst [vmem:[#allocation32_spill] sm:$0xff] %v8990_v24  ;;  %v8019_v24 = vld [vmem:[%s8650_s0 + $0xa8] sm:$0xff] }
 0x1dd   : > { %v1905_v41 = vpack.c.bf16 %v1796_v46, %v1795_v2  ;;  %v8998_v46 = vpop.f32.mrf.mxu1 }
 0x1de   : > { %6877 = vmatmul.msk.bf16.gmra.mxu1 %vm2404_vm3, %v8019_v24 }
 0x1df   : > { %6946 = vmatmul.msk.bf16.gmra.mxu2 %vm2942_vm4, %v1905_v41  ;;  %7075 = vmatmul.msk.bf16.gmra.mxu3 %vm2404_vm3, %v8709_v49  ;;  %v7960_v49 = vld [vmem:[%s8628_s25 + $0xe0] sm:$0xff] }
 0x1e0   : > { %v1534_v54 = vpop.f32.mrf.mxu0 }
 0x1e1   : > { %v1535_v22 = vadd.f32 %v8669_v18, %v1534_v54 }
 0x1e2   : > { %v3194_v31 = vpop.f32.mrf.mxu2 }
 0x1e3   : > { %v8987_v34 = vadd.f32 %v3194_v31, %v2660_v23  ;;  %6563 = vmatmul.msk.bf16.gmra.mxu0 %vm1233_vm1, %v7959_v39  ;;  %v1797_v23 = vmax.f32 %v1535_v22, 0.0  ;;  %v9002_v44 = vpop.f32.mrf.mxu3 }
 0x1e4   : > { %11524 = vst [vmem:[#allocation33_spill] sm:$0xff] %v9002_v44 }
 0x1e5   : > { %v9010_v33 = vpop.f32.mrf.mxu1 }
 0x1e8   : > { %v1536_v41 = vpop.f32.mrf.mxu0 }
 0x1e9   : > { %v1537_v45 = vadd.f32 %v8669_v18, %v1536_v41 }
 0x1ea   : > { %v3196_v2 = vpop.f32.mrf.mxu2 }
 0x1eb   : > { %v1798_v31 = vmax.f32 %v1537_v45, 0.0  ;;  %v9000_v39 = vadd.f32 %v3196_v2, %v2662_v26  ;;  %v9015_v26 = vpop.f32.mrf.mxu3 }
 0x1ec   : > { %11525 = vst [vmem:[#allocation34_spill] sm:$0xff] %v9015_v26  ;;  %v8020_v26 = vld [vmem:[%s8650_s0 + $0xb0] sm:$0xff] }
 0x1ed   : > { %v1906_v9 = vpack.c.bf16 %v1798_v31, %v1797_v23  ;;  %v9023_v31 = vpop.f32.mrf.mxu1 }
 0x1ee   : > { %6878 = vmatmul.msk.bf16.gmra.mxu1 %vm2404_vm3, %v8020_v26 }
 0x1ef   : > { %6947 = vmatmul.msk.bf16.gmra.mxu2 %vm2942_vm4, %v1906_v9  ;;  %7076 = vmatmul.msk.bf16.gmra.mxu3 %vm2404_vm3, %v8721_v59  ;;  %v7961_v59 = vld [vmem:[%s8628_s25 + $0xe8] sm:$0xff] }
 0x1f0   : > { %v1539_v41 = vpop.f32.mrf.mxu0 }
 0x1f1   : > { %v1540_v24 = vadd.f32 %v8669_v18, %v1539_v41 }
 0x1f2   : > { %v3199_v29 = vpop.f32.mrf.mxu2 }
 0x1f3   : > { %v9012_v22 = vadd.f32 %v3199_v29, %v2665_v35  ;;  %6564 = vmatmul.msk.bf16.gmra.mxu0 %vm1233_vm1, %v7960_v49  ;;  %v1799_v35 = vmax.f32 %v1540_v24, 0.0  ;;  %v9027_v54 = vpop.f32.mrf.mxu3 }
 0x1f4   : > { %11526 = vst [vmem:[#allocation35_spill] sm:$0xff] %v9027_v54 }
 0x1f5   : > { %v9035_v20 = vpop.f32.mrf.mxu1 }
 0x1f8   : > { %v1541_v9 = vpop.f32.mrf.mxu0 }
 0x1f9   : > { %v1542_v2 = vadd.f32 %v8669_v18, %v1541_v9 }
 0x1fa   : > { %v3201_v23 = vpop.f32.mrf.mxu2 }
 0x1fb   : > { %v1800_v29 = vmax.f32 %v1542_v2, 0.0  ;;  %v9025_v49 = vadd.f32 %v3201_v23, %v2667_v8  ;;  %v9040_v8 = vpop.f32.mrf.mxu3 }
 0x1fc   : > { %11527 = vst [vmem:[#allocation36_spill] sm:$0xff] %v9040_v8  ;;  %v8021_v8 = vld [vmem:[%s8650_s0 + $0xb8] sm:$0xff] }
 0x1fd   : > { %v1907_v45 = vpack.c.bf16 %v1800_v29, %v1799_v35  ;;  %v9048_v29 = vpop.f32.mrf.mxu1 }
 0x1fe   : > { %6879 = vmatmul.msk.bf16.gmra.mxu1 %vm2404_vm3, %v8021_v8 }
 0x1ff   : > { %6948 = vmatmul.msk.bf16.gmra.mxu2 %vm2942_vm4, %v1907_v45  ;;  %7077 = vmatmul.msk.bf16.gmra.mxu3 %vm2404_vm3, %v8733_v5  ;;  %v8100_v5 = vld [vmem:[%s11529_s11 + $0x74] sm:$0xf] }
 0x200   : > { %v1544_v9 = vpop.f32.mrf.mxu0 }
 0x201   : > { %v1545_v23 = vadd.f32 %v8669_v18, %v1544_v9  ;;  %v8022_v9 = vld [vmem:[%s8650_s0 + $0xc0] sm:$0xff] }
 0x202   : > { %v3204_v44 = vpop.f32.mrf.mxu2 }
 0x203   : > { %v9037_v24 = vadd.f32 %v3204_v44, %v2670_v56  ;;  %6565 = vmatmul.msk.bf16.gmra.mxu0 %vm1233_vm1, %v7961_v59  ;;  %v1801_v44 = vmax.f32 %v1545_v23, 0.0  ;;  %v9052_v41 = vpop.f32.mrf.mxu3  ;;  %v7208_v23 = vld [vmem:[%s11529_s11 + $0x78] sm:$0xf0] }
 0x204   : > { %11528 = vst [vmem:[#allocation37_spill] sm:$0xff] %v9052_v41 }
 0x208   : > { %v1546_v26 = vpop.f32.mrf.mxu0 }
 0x209   : > { %v1547_v45 = vadd.f32 %v8669_v18, %v1546_v26  ;;  %v7211_v26 = vor.u32 %v8100_v5, %v7208_v23 }
 0x20a   : > { %v3206_v35 = vpop.f32.mrf.mxu2 }
 0x20b   : > { %v1802_v56 = vmax.f32 %v1547_v45, 0.0  ;;  %v9050_v59 = vadd.f32 %v3206_v35, %v2672_v50  ;;  %v7962_v50 = vld [vmem:[%s8628_s25 + $0xf0] sm:$0xff]  ;;  %4508 = vmatpush.bf16.msrb.mxu0 %v7211_v26 }
 0x20d   : > { %v1908_v2 = vpack.c.bf16 %v1802_v56, %v1801_v44  ;;  %v9066_v44 = vpop.f32.mrf.mxu1  ;;  %v9072_v56 = vpop.f32.mrf.mxu3 }
 0x20e   : > { %11530 = vst [vmem:[#allocation38_spill] sm:$0xff] %v9072_v56  ;;  %6880 = vmatmul.msk.bf16.gmra.mxu1 %vm2404_vm3, %v8022_v9 }
 0x20f   : > { %6949 = vmatmul.msk.bf16.gmra.mxu2 %vm2942_vm4, %v1908_v2  ;;  %7078 = vmatmul.msk.bf16.gmra.mxu3 %vm2404_vm3, %v8745_v15  ;;  %v7963_v15 = vld [vmem:[%s8628_s25 + $0xf8] sm:$0xff] }
 0x210   : > { %v1549_v45 = vpop.f32.mrf.mxu0 }
 0x211   : > { %v1550_v2 = vadd.f32 %v8669_v18, %v1549_v45 }
 0x212   : > { %v3209_v35 = vpop.f32.mrf.mxu2 }
 0x213   : > { %v9069_v8 = vadd.f32 %v3209_v35, %v8998_v46  ;;  %6566 = vmatmul.msk.bf16.gmra.mxu0 %vm1233_vm1, %v7962_v50  ;;  %v1803_v46 = vmax.f32 %v1550_v2, 0.0 }
 0x215   : > { %v9080_v41 = vpop.f32.mrf.mxu1  ;;  %v9085_v56 = vpop.f32.mrf.mxu3 }
 0x216   : > { %11531 = vst [vmem:[#allocation39_spill] sm:$0xff] %v9085_v56 }
 0x218   : > { %v1551_v5 = vpop.f32.mrf.mxu0 }
 0x219   : > { %v1552_v23 = vadd.f32 %v8669_v18, %v1551_v5 }
 0x21a   : > { %v3211_v26 = vpop.f32.mrf.mxu2 }
 0x21b   : > { %v1804_v35 = vmax.f32 %v1552_v23, 0.0  ;;  %v9083_v50 = vadd.f32 %v3211_v26, %v9010_v33  ;;  %v8023_v26 = vld [vmem:[%s8650_s0 + $0xc8] sm:$0xff] }
 0x21d   : > { %v1909_v54 = vpack.c.bf16 %v1804_v35, %v1803_v46  ;;  %v9093_v2 = vpop.f32.mrf.mxu1  ;;  %v9099_v23 = vpop.f32.mrf.mxu3 }
 0x21e   : > { %11532 = vst [vmem:[#allocation40_spill] sm:$0xff] %v9099_v23  ;;  %6881 = vmatmul.msk.bf16.gmra.mxu1 %vm2404_vm3, %v8023_v26 }
 0x21f   : > { %6950 = vmatmul.msk.bf16.gmra.mxu2 %vm2942_vm4, %v1909_v54  ;;  %7079 = vmatmul.msk.bf16.gmra.mxu3 %vm2404_vm3, %v8757_v30  ;;  %v7964_v30 = vld [vmem:[%s8628_s25 + $0x100] sm:$0xff] }
 0x220   : > { %v1554_v5 = vpop.f32.mrf.mxu0 }
 0x221   : > { %v1555_v9 = vadd.f32 %v8669_v18, %v1554_v5 }
 0x222   : > { %v3214_v1 = vpop.f32.mrf.mxu2 }
 0x223   : > { %v9096_v33 = vadd.f32 %v3214_v1, %v9023_v31  ;;  %6567 = vmatmul.msk.bf16.gmra.mxu0 %vm1233_vm1, %v7963_v15  ;;  %v1805_v1 = vmax.f32 %v1555_v9, 0.0 }
 0x225   : > { %v9107_v45 = vpop.f32.mrf.mxu1  ;;  %v9112_v23 = vpop.f32.mrf.mxu3 }
 0x226   : > { %11533 = vst [vmem:[#allocation41_spill] sm:$0xff] %v9112_v23 }
 0x228   : > { %v1556_v54 = vpop.f32.mrf.mxu0 }
 0x229   : > { %v1557_v46 = vadd.f32 %v8669_v18, %v1556_v54 }
 0x22a   : > { %v3216_v35 = vpop.f32.mrf.mxu2 }
 0x22b   : > { %v1806_v31 = vmax.f32 %v1557_v46, 0.0  ;;  %v9110_v15 = vadd.f32 %v3216_v35, %v9035_v20  ;;  %v4329_v20 = vld [vmem:[%s11534_s10] sm:$0xff] }
 0x22c   : > { %v4331_v26 = vunpack.c.l.b16 %v4329_v20 }
 0x22d   : > { %v1910_v56 = vpack.c.bf16 %v1806_v31, %v1805_v1  ;;  %v9120_v38 = vpop.f32.mrf.mxu1  ;;  %v9129_v46 = vpop.f32.mrf.mxu3 }
 0x22e   : > { %11535 = vst [vmem:[#allocation42_spill] sm:$0xff] %v9129_v46  ;;  %v4333_v35 = vpack.c.b16 %v4331_v26, %v4331_v26 }
 0x22f   : > { %6951 = vmatmul.msk.bf16.gmra.mxu2 %vm2942_vm4, %v1910_v56  ;;  %7080 = vmatmul.msk.bf16.gmra.mxu3 %vm2404_vm3, %v8769_v43  ;;  %v8024_v56 = vld [vmem:[%s8650_s0 + $0xd0] sm:$0xff] }
 0x230   : > { %v1559_v54 = vpop.f32.mrf.mxu0  ;;  %6882 = vmatmul.msk.bf16.gmra.mxu1 %vm2404_vm3, %v8024_v56 }
 0x231   : > { %v1560_v1 = vadd.f32 %v8669_v18, %v1559_v54 }
 0x232   : > { %v3219_v52 = vpop.f32.mrf.mxu2 }
 0x233   : > { %v9123_v9 = vadd.f32 %v3219_v52, %v9048_v29  ;;  %6568 = vmatmul.msk.bf16.gmra.mxu0 %vm1233_vm1, %v7964_v30  ;;  %v9137_v29 = vsel %vm2597_vm2, %v4333_v35, 0  ;;  %v1807_v5 = vmax.f32 %v1560_v1, 0.0  ;;  %v7965_v35 = vld [vmem:[%s8628_s25 + $0x108] sm:$0xff] }
 0x234   : > { %4566 = vmatpush.bf16.msrb.mxu1 %v9137_v29 }
 0x235   : > { %v2700_v20 = vpop.f32.mrf.mxu1  ;;  %v9144_v54 = vpop.f32.mrf.mxu3 }
 0x238   : > { %v1561_v52 = vpop.f32.mrf.mxu0 }
 0x239   : > { %v1562_v31 = vadd.f32 %v8669_v18, %v1561_v52 }
 0x23a   : > { %v3221_v30 = vpop.f32.mrf.mxu2 }
 0x23b   : > { %v1808_v46 = vmax.f32 %v1562_v31, 0.0  ;;  %v9142_v26 = vadd.f32 %v3221_v30, %v9066_v44 }
 0x23d   : > { %v1911_v43 = vpack.c.bf16 %v1808_v46, %v1807_v5  ;;  %v2702_v16 = vpop.f32.mrf.mxu1  ;;  %v9154_v44 = vpop.f32.mrf.mxu3  ;;  %v11537_v5 = vmax.f32 %v8781_v58, %v8945_v11 }
 0x23e   : > { %11536 = vst [vmem:[#allocation43_spill] sm:$0xff] %v9154_v44 }
 0x23f   : > { %6952 = vmatmul.msk.bf16.gmra.mxu2 %vm2942_vm4, %v1911_v43  ;;  %7081 = vmatmul.msk.bf16.gmra.mxu3 %vm2404_vm3, %v8787_v61  ;;  %v11538_v61 = vmax.f32 %v8793_v6, %v8956_v19  ;;  %v11540_v6 = vmax.f32 %v8801_v14, %v8966_v10  ;;  %v8026_v14 = vld [vmem:[%s8650_s0 + $0xe0] sm:$0xff] }
 0x240   : > { %v1564_v52 = vpop.f32.mrf.mxu0 }
 0x241   : > { %v1565_v56 = vadd.f32 %v8669_v18, %v1564_v52  ;;  %v8025_v18 = vld [vmem:[%s8650_s0 + $0xd8] sm:$0xff] }
 0x242   : > { %v3224_v28 = vpop.f32.mrf.mxu2  ;;  %6883 = vmatmul.msk.bf16.gmra.mxu1 %vm2404_vm3, %v8025_v18 }
 0x243   : > { %v3225_v1 = vadd.f32 %v3224_v28, %v9080_v41  ;;  %6569 = vmatmul.msk.bf16.gmra.mxu0 %vm1233_vm1, %v7965_v35  ;;  %v9167_v28 = vld [vmem:[%s11503_s7] ss:$0 sm:$0xff]  ;;  %v1809_v35 = vmax.f32 %v1565_v56, 0.0 }
 0x245   : > { %v9159_v46 = vmax.f32 %v11537_v5, %v3225_v1  ;;  %v2705_v43 = vpop.f32.mrf.mxu1  ;;  %v9171_v1 = vpop.f32.mrf.mxu3 }
 0x248   : > { %v1566_v31 = vpop.f32.mrf.mxu0 }
 0x249   : > { %v1567_v41 = vadd.f32 %v9167_v28, %v1566_v31  ;;  %v7966_v31 = vld [vmem:[%s8628_s25 + $0x110] sm:$0xff] }
 0x24a   : > { %v3226_v30 = vpop.f32.mrf.mxu2 }
 0x24b   : > { %v1810_v58 = vmax.f32 %v1567_v41, 0.0  ;;  %v3227_v11 = vadd.f32 %v3226_v30, %v9093_v2 }
 0x24d   : > { %v1912_v52 = vpack.c.bf16 %v1810_v58, %v1809_v35  ;;  %v9177_v5 = vmax.f32 %v11538_v61, %v3227_v11  ;;  %v2707_v56 = vpop.f32.mrf.mxu1  ;;  %v9184_v41 = vpop.f32.mrf.mxu3 }
 0x24e   : > { %11539 = vst [vmem:[#allocation44_spill] sm:$0xff] %v9184_v41 }
 0x24f   : > { %6953 = vmatmul.msk.bf16.gmra.mxu2 %vm2942_vm4, %v1912_v52  ;;  %7082 = vmatmul.msk.bf16.gmra.mxu3 %vm2404_vm3, %v8807_v17  ;;  %v7967_v17 = vld [vmem:[%s8628_s25 + $0x118] sm:$0xff] }
 0x250   : > { %v1569_v23 = vpop.f32.mrf.mxu0 }
 0x251   : > { %v1570_v30 = vadd.f32 %v9167_v28, %v1569_v23 }
 0x252   : > { %v3229_v44 = vpop.f32.mrf.mxu2  ;;  %6884 = vmatmul.msk.bf16.gmra.mxu1 %vm2404_vm3, %v8026_v14 }
 0x253   : > { %v3230_v2 = vadd.f32 %v3229_v44, %v9107_v45  ;;  %6570 = vmatmul.msk.bf16.gmra.mxu0 %vm1233_vm1, %v7966_v31  ;;  %v1811_v44 = vmax.f32 %v1570_v30, 0.0  ;;  %v11541_v31 = vmax.f32 %v8813_v27, %v8977_v3 }
 0x255   : > { %v9189_v19 = vmax.f32 %v11540_v6, %v3230_v2  ;;  %v2710_v45 = vpop.f32.mrf.mxu1  ;;  %v9196_v61 = vpop.f32.mrf.mxu3 }
 0x258   : > { %v1571_v35 = vpop.f32.mrf.mxu0 }
 0x259   : > { %v1572_v58 = vadd.f32 %v9167_v28, %v1571_v35 }
 0x25a   : > { %v3231_v11 = vpop.f32.mrf.mxu2 }
 0x25b   : > { %v1812_v18 = vmax.f32 %v1572_v58, 0.0  ;;  %v3232_v52 = vadd.f32 %v3231_v11, %v9120_v38  ;;  %v11543_v58 = vmax.f32 %v8821_v37, %v8987_v34  ;;  %v8027_v37 = vld [vmem:[%s8650_s0 + $0xe8] sm:$0xff] }
 0x25d   : > { %v1913_v10 = vpack.c.bf16 %v1812_v18, %v1811_v44  ;;  %v9202_v23 = vmax.f32 %v11541_v31, %v3232_v52  ;;  %v2712_v30 = vpop.f32.mrf.mxu1  ;;  %v9208_v38 = vpop.f32.mrf.mxu3 }
 0x25e   : > { %11542 = vst [vmem:[#allocation45_spill] sm:$0xff] %v9208_v38 }
 0x25f   : > { %6954 = vmatmul.msk.bf16.gmra.mxu2 %vm2942_vm4, %v1913_v10  ;;  %7083 = vmatmul.msk.bf16.gmra.mxu3 %vm2404_vm3, %v8827_v40  ;;  %v7968_v40 = vld [vmem:[%s8628_s25 + $0x120] sm:$0xff] }
 0x260   : > { %v1574_v2 = vpop.f32.mrf.mxu0 }
 0x261   : > { %v1575_v3 = vadd.f32 %v9167_v28, %v1574_v2 }
 0x262   : > { %v3234_v6 = vpop.f32.mrf.mxu2  ;;  %6885 = vmatmul.msk.bf16.gmra.mxu1 %vm2404_vm3, %v8027_v37 }
 0x263   : > { %v3235_v35 = vadd.f32 %v3234_v6, %v2700_v20  ;;  %6571 = vmatmul.msk.bf16.gmra.mxu0 %vm1233_vm1, %v7967_v17  ;;  %v1813_v52 = vmax.f32 %v1575_v3, 0.0  ;;  %v11544_v17 = vmax.f32 %v8833_v51, %v9000_v39  ;;  %v11546_v51 = vmax.f32 %v8841_v0, %v9012_v22  ;;  %v8028_v0 = vld [vmem:[%s8650_s0 + $0xf0] sm:$0xff] }
 0x265   : > { %v9213_v27 = vmax.f32 %v11543_v58, %v3235_v35  ;;  %v9219_v20 = vpop.f32.mrf.mxu1  ;;  %v9221_v31 = vpop.f32.mrf.mxu3 }
 0x268   : > { %v1576_v11 = vpop.f32.mrf.mxu0 }
 0x269   : > { %v1577_v44 = vadd.f32 %v9167_v28, %v1576_v11 }
 0x26a   : > { %v3236_v18 = vpop.f32.mrf.mxu2 }
 0x26b   : > { %v1814_v14 = vmax.f32 %v1577_v44, 0.0  ;;  %v3237_v10 = vadd.f32 %v3236_v18, %v2702_v16 }
 0x26d   : > { %v1914_v34 = vpack.c.bf16 %v1814_v14, %v1813_v52  ;;  %v9227_v2 = vmax.f32 %v11544_v17, %v3237_v10  ;;  %v9232_v58 = vpop.f32.mrf.mxu1  ;;  %v9235_v3 = vpop.f32.mrf.mxu3  ;;  %v11547_v17 = vmax.f32 %v8853_v12, %v9025_v49  ;;  %v11549_v12 = vmax.f32 %v8861_v32, %v9037_v24  ;;  %v8029_v32 = vld [vmem:[%s8650_s0 + $0xf8] sm:$0xff] }
 0x26e   : > { %11545 = vst [vmem:[#allocation46_spill] sm:$0xff] %v9235_v3 }
 0x26f   : > { %6955 = vmatmul.msk.bf16.gmra.mxu2 %vm2942_vm4, %v1914_v34  ;;  %7084 = vmatmul.msk.bf16.gmra.mxu3 %vm2404_vm3, %v8847_v57  ;;  %v7969_v57 = vld [vmem:[%s8628_s25 + $0x128] sm:$0xff] }
 0x270   : > { %v1579_v6 = vpop.f32.mrf.mxu0 }
 0x271   : > { %v1580_v11 = vadd.f32 %v9167_v28, %v1579_v6 }
 0x272   : > { %v3239_v35 = vpop.f32.mrf.mxu2  ;;  %6886 = vmatmul.msk.bf16.gmra.mxu1 %vm2404_vm3, %v8028_v0 }
 0x273   : > { %v3240_v16 = vadd.f32 %v3239_v35, %v2705_v43  ;;  %6572 = vmatmul.msk.bf16.gmra.mxu0 %vm1233_vm1, %v7968_v40  ;;  %v1815_v14 = vmax.f32 %v1580_v11, 0.0 }
 0x275   : > { %v9240_v39 = vmax.f32 %v11546_v51, %v3240_v16  ;;  %v9246_v43 = vpop.f32.mrf.mxu1  ;;  %v9248_v34 = vpop.f32.mrf.mxu3 }
 0x278   : > { %v1581_v44 = vpop.f32.mrf.mxu0 }
 0x279   : > { %v1582_v18 = vadd.f32 %v9167_v28, %v1581_v44 }
 0x27a   : > { %v3241_v52 = vpop.f32.mrf.mxu2 }
 0x27b   : > { %v1816_v10 = vmax.f32 %v1582_v18, 0.0  ;;  %v3242_v37 = vadd.f32 %v3241_v52, %v2707_v56 }
 0x27d   : > { %v1915_v22 = vpack.c.bf16 %v1816_v10, %v1815_v14  ;;  %v9254_v40 = vmax.f32 %v11547_v17, %v3242_v37  ;;  %v9259_v16 = vpop.f32.mrf.mxu1  ;;  %v9262_v51 = vpop.f32.mrf.mxu3 }
 0x27e   : > { %11548 = vst [vmem:[#allocation47_spill] sm:$0xff] %v9262_v51 }
 0x27f   : > { %6956 = vmatmul.msk.bf16.gmra.mxu2 %vm2942_vm4, %v1915_v22  ;;  %7085 = vmatmul.msk.bf16.gmra.mxu3 %vm2404_vm3, %v8867_v13  ;;  %v11550_v22 = vmax.f32 %v8873_v47, %v9050_v59  ;;  %v8098_v13 = vld [vmem:[%s11529_s11 + $0x64] sm:$0xf] }
 0x280   : > { %v1584_v6 = vpop.f32.mrf.mxu0 }
 0x281   : > { %v1585_v11 = vadd.f32 %v9167_v28, %v1584_v6  ;;  %v7970_v6 = vld [vmem:[%s8628_s25 + $0x130] sm:$0xff] }
 0x282   : > { %v3244_v35 = vpop.f32.mrf.mxu2  ;;  %6887 = vmatmul.msk.bf16.gmra.mxu1 %vm2404_vm3, %v8029_v32 }
 0x283   : > { %v3245_v56 = vadd.f32 %v3244_v35, %v2710_v45  ;;  %6573 = vmatmul.msk.bf16.gmra.mxu0 %vm1233_vm1, %v7969_v57  ;;  %v1817_v14 = vmax.f32 %v1585_v11, 0.0  ;;  %v7200_v57 = vld [vmem:[%s11529_s11 + $0x68] sm:$0xf0]  ;;  %v11552_v11 = vmax.f32 %v8881_v4, %v9069_v8  ;;  %v8030_v4 = vld [vmem:[%s8650_s0 + $0x100] sm:$0xff] }
 0x285   : > { %v9267_v49 = vmax.f32 %v11549_v12, %v3245_v56  ;;  %v9273_v45 = vpop.f32.mrf.mxu1  ;;  %v9275_v0 = vpop.f32.mrf.mxu3 }
 0x288   : > { %v1586_v44 = vpop.f32.mrf.mxu0 }
 0x289   : > { %v1587_v18 = vadd.f32 %v9167_v28, %v1586_v44 }
 0x28a   : > { %v3246_v52 = vpop.f32.mrf.mxu2 }
 0x28b   : > { %v1818_v10 = vmax.f32 %v1587_v18, 0.0  ;;  %v3247_v37 = vadd.f32 %v3246_v52, %v2712_v30  ;;  %v7203_v30 = vor.u32 %v8098_v13, %v7200_v57  ;;  %v11553_v13 = vmax.f32 %v8893_v25, %v9083_v50 }
 0x28c   : > { %v11555_v25 = vmax.f32 %v8901_v53, %v9096_v33  ;;  %v8080_v53 = vld [vmem:[%s11556_s4 + $0x10] sm:$0xff] }
 0x28d   : > { %v1916_v24 = vpack.c.bf16 %v1818_v10, %v1817_v14  ;;  %v9281_v17 = vmax.f32 %v11550_v22, %v3247_v37  ;;  %4509 = vmatpush.bf16.msrb.mxu0 %v7203_v30  ;;  %v9292_v47 = vpop.f32.mrf.mxu1  ;;  %v9296_v12 = vpop.f32.mrf.mxu3 }
 0x28e   : > { %11551 = vst [vmem:[#allocation48_spill] sm:$0xff] %v9296_v12 }
 0x28f   : > { %6957 = vmatmul.msk.bf16.gmra.mxu2 %vm2942_vm4, %v1916_v24  ;;  %7086 = vmatmul.msk.bf16.gmra.mxu3 %vm2404_vm3, %v8887_v36  ;;  %v7971_v36 = vld [vmem:[%s8628_s25 + $0x138] sm:$0xff] }
 0x290   : > { %v1589_v35 = vpop.f32.mrf.mxu0 }
 0x291   : > { %v1590_v18 = vadd.f32 %v9167_v28, %v1589_v35 }
 0x292   : > { %v3249_v56 = vpop.f32.mrf.mxu2  ;;  %6888 = vmatmul.msk.bf16.gmra.mxu1 %vm2404_vm3, %v8030_v4  ;;  %v11557_v4 = vmax.f32 %v8913_v21, %v9110_v15  ;;  %v8078_v21 = vld [vmem:[%s11556_s4] sm:$0xff] }
 0x293   : > { %v3250_v59 = vadd.f32 %v3249_v56, %v9219_v20  ;;  %6574 = vmatmul.msk.bf16.gmra.mxu0 %vm1233_vm1, %v7970_v6  ;;  %v1819_v37 = vmax.f32 %v1590_v18, 0.0 }
 0x295   : > { %v9301_v44 = vmax.f32 %v11552_v11, %v3250_v59  ;;  %v9307_v20 = vpop.f32.mrf.mxu1  ;;  %v9310_v22 = vpop.f32.mrf.mxu3  ;;  %v8081_v59 = vld [vmem:[%s11556_s4 + $0x18] sm:$0xff] }
 0x296   : > { %4103 = vmatpush.bf16.msra.mxu3 %v8081_v59 }
 0x298   : > { %v1591_v52 = vpop.f32.mrf.mxu0 }
 0x299   : > { %v1592_v14 = vadd.f32 %v9167_v28, %v1591_v52 }
 0x29a   : > { %v3251_v10 = vpop.f32.mrf.mxu2  ;;  %4104 = vmatpush.bf16.msra.mxu3 %v8080_v53 }
 0x29b   : > { %v1820_v32 = vmax.f32 %v1592_v14, 0.0  ;;  %v3252_v24 = vadd.f32 %v3251_v10, %v9232_v58 }
 0x29d   : > { %v1917_v8 = vpack.c.bf16 %v1820_v32, %v1819_v37  ;;  %v9316_v57 = vmax.f32 %v11553_v13, %v3252_v24  ;;  %v9321_v35 = vpop.f32.mrf.mxu1  ;;  %v9325_v56 = vpop.f32.mrf.mxu3  ;;  %v8031_v24 = vld [vmem:[%s8650_s0 + $0x108] sm:$0xff] }
 0x29e   : > { %11554 = vst [vmem:[#allocation49_spill] sm:$0xff] %v9325_v56  ;;  %v8079_v13 = vld [vmem:[%s11556_s4 + $0x8] sm:$0xff]  ;;  %s10689_s4 = sand.u32 1, %s8429_s26  }
 0x29f   : > { %6958 = vmatmul.msk.bf16.gmra.mxu2 %vm2942_vm4, %v1917_v8  ;;  %7087 = vmatmul.msk.bf16.gmra.mxu3 %vm2404_vm3, %v8907_v63  ;;  %s6124_s24 = scalar_lea.sflag [#allocation3], %s10689_s4 }
 0x2a0   : > { %v1594_v30 = vpop.f32.mrf.mxu0  ;;  %4105 = vmatpush.bf16.msra.mxu3 %v8079_v13 }
 0x2a1   : > { %v1595_v11 = vadd.f32 %v9167_v28, %v1594_v30 }
 0x2a2   : > { %v3254_v6 = vpop.f32.mrf.mxu2  ;;  %6889 = vmatmul.msk.bf16.gmra.mxu1 %vm2404_vm3, %v8031_v24  ;;  %v11560_v24 = vmax.f32 %v8937_v42, %v9142_v26  ;;  %v8118_v42 = vld [vmem:[%s11445_s13 + $0x74] sm:$0xf0] }
 0x2a3   : > { %v3255_v58 = vadd.f32 %v3254_v6, %v9246_v43  ;;  %6575 = vmatmul.msk.bf16.gmra.mxu0 %vm1233_vm1, %v7971_v36  ;;  %v1821_v33 = vmax.f32 %v1595_v11, 0.0  ;;  %v7972_v36 = vld [vmem:[%s8628_s25 + $0x140] sm:$0xff] }
 0x2a4   : > { %4106 = vmatpush.bf16.msra.mxu3 %v8078_v21 }
 0x2a5   : > { %v9330_v50 = vmax.f32 %v11555_v25, %v3255_v58  ;;  %v9339_v14 = vpop.f32.mrf.mxu1  ;;  %v9345_v32 = vpop.f32.mrf.mxu3  ;;  %v11559_v25 = vmax.f32 %v8924_v55, %v9123_v9  ;;  %v8032_v55 = vld [vmem:[%s8650_s0 + $0x110] sm:$0xff] }
 0x2a8   : > { %v1596_v43 = vpop.f32.mrf.mxu0  ;;  %4259 = vmatpush.bf16.msrb.mxu3 %v8930_v62 }
 0x2a9   : > { %v1597_v18 = vadd.f32 %v9167_v28, %v1596_v43 }
 0x2aa   : > { %v3256_v52 = vpop.f32.mrf.mxu2 }
 0x2ab   : > { %v1822_v10 = vmax.f32 %v1597_v18, 0.0  ;;  %v3257_v37 = vadd.f32 %v3256_v52, %v9259_v16 }
 0x2ad   : > { %v1918_v63 = vpack.c.bf16 %v1822_v10, %v1821_v33  ;;  %v9351_v8 = vmax.f32 %v11557_v4, %v3257_v37  ;;  %v9359_v6 = vpop.f32.mrf.mxu1  ;;  %v9366_v58 = vpop.f32.mrf.mxu3 }
 0x2ae   : > { %11558 = vst [vmem:[#allocation50_spill] sm:$0xff] %v9366_v58 }
 0x2af   : > { %6959 = vmatmul.msk.bf16.gmra.mxu2 %vm2942_vm4, %v1918_v63  ;;  %v7973_v63 = vld [vmem:[%s8628_s25 + $0x148] sm:$0xff] }
 0x2b0   : > { %v1599_v16 = vpop.f32.mrf.mxu0 }
 0x2b1   : > { %v1600_v11 = vadd.f32 %v9167_v28, %v1599_v16  ;;  %v7276_v16 = vld [vmem:[%s11445_s13 + $0x70] sm:$0xf] }
 0x2b2   : > { %v3259_v30 = vpop.f32.mrf.mxu2  ;;  %6890 = vmatmul.msk.bf16.gmra.mxu1 %vm2404_vm3, %v8032_v55  ;;  %v8033_v55 = vld [vmem:[%s8650_s0 + $0x118] sm:$0xff] }
 0x2b3   : > { %v3260_v15 = vadd.f32 %v3259_v30, %v9273_v45  ;;  %6576 = vmatmul.msk.bf16.gmra.mxu0 %vm1233_vm1, %v7972_v36  ;;  %v1823_v53 = vmax.f32 %v1600_v11, 0.0  ;;  %v7277_v30 = vor.u32 %v8118_v42, %v7276_v16 }
 0x2b5   : > { %v9371_v59 = vmax.f32 %v11559_v25, %v3260_v15  ;;  %v9376_v45 = vpop.f32.mrf.mxu1  ;;  %v9379_v37 = vpop.f32.mrf.mxu3  ;;  %4805 = vmatpush.bf16.msrb.mxu2 %v7277_v30 }
 0x2b8   : > { %v1601_v43 = vpop.f32.mrf.mxu0 }
 0x2b9   : > { %v1602_v18 = vadd.f32 %v9167_v28, %v1601_v43 }
 0x2ba   : > { %v3261_v52 = vpop.f32.mrf.mxu2 }
 0x2bb   : > { %v1824_v33 = vmax.f32 %v1602_v18, 0.0  ;;  %v3262_v10 = vadd.f32 %v3261_v52, %v9292_v47 }
 0x2bd   : > { %v1919_v9 = vpack.c.bf16 %v1824_v33, %v1823_v53  ;;  %v9385_v62 = vmax.f32 %v11560_v24, %v3262_v10  ;;  %v9390_v36 = vpop.f32.mrf.mxu1  ;;  %v9400_v26 = vpop.f32.mrf.mxu3  ;;  %v9411_v53 = vld [vmem:[%s11561_s28] ss:$0 sm:$0xff]  ;;  %s8280_s28 = sshll.u32 %s8589_s6, 5  ;;  %s8363_s6 = scalar_lea.hbm %s11455_s23, 64 }
 0x2be   : > { %s6141_s29 = scalar_lea.hbm %s11455_s23, %s8280_s28 }
 0x2bf   : > { %6960 = vmatmul.msk.bf16.gmra.mxu2 %vm2942_vm4, %v1919_v9 }
 0x2c0   : > { %v1604_v4 = vpop.f32.mrf.mxu0 }
 0x2c1   : > { %v1605_v21 = vadd.f32 %v9167_v28, %v1604_v4  ;;  %v7974_v4 = vld [vmem:[%s8628_s25 + $0x150] sm:$0xff] }
 0x2c2   : > { %v3264_v13 = vpop.f32.mrf.mxu2  ;;  %6891 = vmatmul.msk.bf16.gmra.mxu1 %vm2404_vm3, %v8033_v55 }
 0x2c3   : > { %v3265_v47 = vadd.f32 %v3264_v13, %v9307_v20  ;;  %6577 = vmatmul.msk.bf16.gmra.mxu0 %vm1233_vm1, %v7973_v63  ;;  %v1825_v18 = vmax.f32 %v1605_v21, 0.0 }
 0x2c5   : > { %v3528_v15 = vmax.f32 %v9159_v46, %v3265_v47  ;;  %v9405_v43 = vpop.f32.mrf.mxu1  ;;  %v9416_v24 = vpop.f32.mrf.mxu3 }
 0x2c7   : > { %v3809_v52 = vsub.f32 %v3528_v15, %v8775_v48 }
 0x2c8   : > { %v1606_v20 = vpop.f32.mrf.mxu0 }
 0x2c9   : > { %v1607_v25 = vadd.f32 %v9167_v28, %v1606_v20  ;;  %v3845_v63 = vadd.f32 %v9411_v53, %v3809_v52 }
 0x2ca   : > { %v3266_v11 = vpop.f32.mrf.mxu2 }
 0x2cb   : > { %v1826_v33 = vmax.f32 %v1607_v25, 0.0  ;;  %v3267_v10 = vadd.f32 %v3266_v11, %v9321_v35  ;;  %v3877_v42 = vmax.f32 %v3845_v63, 0.0 }
 0x2cd   : > { %v1920_v46 = vpack.c.bf16 %v1826_v33, %v1825_v18  ;;  %v3529_v9 = vmax.f32 %v9177_v5, %v3267_v10  ;;  %v9424_v35 = vpop.f32.mrf.mxu1  ;;  %v9431_v20 = vpop.f32.mrf.mxu3 }
 0x2cf   : > { %v3810_v48 = vsub.f32 %v3529_v9, %v8784_v60  ;;  %6961 = vmatmul.msk.bf16.gmra.mxu2 %vm2942_vm4, %v1920_v46 }
 0x2d0   : > { %v1609_v13 = vpop.f32.mrf.mxu0 }
 0x2d1   : > { %v3846_v47 = vadd.f32 %v9411_v53, %v3810_v48  ;;  %v1610_v60 = vadd.f32 %v9167_v28, %v1609_v13 }
 0x2d2   : > { %v3269_v16 = vpop.f32.mrf.mxu2 }
 0x2d3   : > { %v3878_v30 = vmax.f32 %v3846_v47, 0.0  ;;  %v3270_v5 = vadd.f32 %v3269_v16, %v9339_v14  ;;  %6578 = vmatmul.msk.bf16.gmra.mxu0 %vm1233_vm1, %v7974_v4  ;;  %v1827_v52 = vmax.f32 %v1610_v60, 0.0  ;;  %v7975_v4 = vld [vmem:[%s8628_s25 + $0x158] sm:$0xff] }
 0x2d5   : > { %v3909_v21 = vpack.c.bf16 %v3878_v30, %v3877_v42  ;;  %v3530_v15 = vmax.f32 %v9189_v19, %v3270_v5  ;;  %v9435_v18 = vpop.f32.mrf.mxu1  ;;  %v8034_v19 = vld [vmem:[%s8650_s0 + $0x120] sm:$0xff] }
 0x2d6   : > { %6892 = vmatmul.msk.bf16.gmra.mxu1 %vm2404_vm3, %v8034_v19 }
 0x2d7   : > { %7104 = vmatmul.msk.bf16.vlgmr.msra.gmra.mxu3 %vm4050_vm5, %v3909_v21  ;;  %v3811_v33 = vsub.f32 %v3530_v15, %v8795_v7  ;;  %v9447_v7 = vpop.f32.mrf.mxu3 }
 0x2d8   : > { %v1611_v25 = vpop.f32.mrf.mxu0  ;;  %4348 = vmatpush.bf16.msra.mxu3 %v9137_v29  ;;  %v11563_v29 = vld [vmem:[#allocation14_spill] sm:$0xff] }
 0x2d9   : > { %v1612_v11 = vadd.f32 %v9167_v28, %v1611_v25  ;;  %v3847_v63 = vadd.f32 %v9411_v53, %v3811_v33  ;;  %v11564_v33 = vld [vmem:[#allocation15_spill] sm:$0xff] }
 0x2da   : > { %v3271_v14 = vpop.f32.mrf.mxu2 }
 0x2db   : > { %v1828_v10 = vmax.f32 %v1612_v11, 0.0  ;;  %v3272_v55 = vadd.f32 %v3271_v14, %v9359_v6  ;;  %v3879_v42 = vmax.f32 %v3847_v63, 0.0 }
 0x2dd   : > { %v1921_v46 = vpack.c.bf16 %v1828_v10, %v1827_v52  ;;  %v3531_v9 = vmax.f32 %v9202_v23, %v3272_v55  ;;  %v9449_v6 = vpop.f32.mrf.mxu1 }
 0x2df   : > { %v3812_v48 = vsub.f32 %v3531_v9, %v11563_v29  ;;  %6962 = vmatmul.msk.bf16.gmra.mxu2 %vm2942_vm4, %v1921_v46  ;;  %v9461_v19 = vpop.f32.mrf.mxu3  ;;  %v8035_v46 = vld [vmem:[%s8650_s0 + $0x128] sm:$0xff]  ;;  %v11565_v29 = vld [vmem:[#allocation16_spill] sm:$0xff] }
 0x2e0   : > { %v1614_v13 = vpop.f32.mrf.mxu0 }
 0x2e1   : > { %v3848_v47 = vadd.f32 %v9411_v53, %v3812_v48  ;;  %v1615_v21 = vadd.f32 %v9167_v28, %v1614_v13 }
 0x2e2   : > { %v3274_v16 = vpop.f32.mrf.mxu2 }
 0x2e3   : > { %v3880_v30 = vmax.f32 %v3848_v47, 0.0  ;;  %v3275_v23 = vadd.f32 %v3274_v16, %v9376_v45  ;;  %6579 = vmatmul.msk.bf16.gmra.mxu0 %vm1233_vm1, %v7975_v4  ;;  %v1829_v52 = vmax.f32 %v1615_v21, 0.0  ;;  %v7976_v4 = vld [vmem:[%s8628_s25 + $0x160] sm:$0xff] }
 0x2e5   : > { %v3910_v5 = vpack.c.bf16 %v3880_v30, %v3879_v42  ;;  %v3532_v60 = vmax.f32 %v9213_v27, %v3275_v23  ;;  %v9457_v14 = vpop.f32.mrf.mxu1 }
 0x2e6   : > { %6893 = vmatmul.msk.bf16.gmra.mxu1 %vm2404_vm3, %v8035_v46  ;;  %v8036_v46 = vld [vmem:[%s8650_s0 + $0x130] sm:$0xff] }
 0x2e7   : > { %7105 = vmatmul.msk.bf16.gmra.mxu3 %vm4050_vm5, %v3910_v5  ;;  %v3813_v10 = vsub.f32 %v3532_v60, %v11564_v33  ;;  %v9475_v5 = vpop.f32.mrf.mxu3 }
 0x2e8   : > { %v1616_v15 = vpop.f32.mrf.mxu0 }
 0x2e9   : > { %v1617_v25 = vadd.f32 %v9167_v28, %v1616_v15  ;;  %v3849_v63 = vadd.f32 %v9411_v53, %v3813_v10 }
 0x2ea   : > { %v3276_v11 = vpop.f32.mrf.mxu2 }
 0x2eb   : > { %v1830_v45 = vmax.f32 %v1617_v25, 0.0  ;;  %v3277_v55 = vadd.f32 %v3276_v11, %v9390_v36  ;;  %v3881_v42 = vmax.f32 %v3849_v63, 0.0  ;;  %v11567_v63 = vld [vmem:[#allocation18_spill] sm:$0xff] }
 0x2ed   : > { %v1922_v9 = vpack.c.bf16 %v1830_v45, %v1829_v52  ;;  %v3533_v27 = vmax.f32 %v9227_v2, %v3277_v55  ;;  %v9471_v36 = vpop.f32.mrf.mxu1 }
 0x2ef   : > { %v3814_v48 = vsub.f32 %v3533_v27, %v11565_v29  ;;  %6963 = vmatmul.msk.bf16.gmra.mxu2 %vm2942_vm4, %v1922_v9 }
 0x2f0   : > { %v1619_v13 = vpop.f32.mrf.mxu0 }
 0x2f1   : > { %v3850_v47 = vadd.f32 %v9411_v53, %v3814_v48  ;;  %v1620_v21 = vadd.f32 %v9167_v28, %v1619_v13  ;;  %v7977_v48 = vld [vmem:[%s8628_s25 + $0x168] sm:$0xff] }
 0x2f2   : > { %v3279_v16 = vpop.f32.mrf.mxu2 }
 0x2f3   : > { %v3882_v30 = vmax.f32 %v3850_v47, 0.0  ;;  %v3280_v2 = vadd.f32 %v3279_v16, %v9405_v43  ;;  %6580 = vmatmul.msk.bf16.gmra.mxu0 %vm1233_vm1, %v7976_v4  ;;  %v1831_v33 = vmax.f32 %v1620_v21, 0.0  ;;  %v11566_v43 = vld [vmem:[#allocation17_spill] sm:$0xff]  ;;  %v9492_v4 = vpop.f32.mrf.mxu3 }
 0x2f5   : > { %v3911_v23 = vpack.c.bf16 %v3882_v30, %v3881_v42  ;;  %v3534_v60 = vmax.f32 %v9240_v39, %v3280_v2  ;;  %v9481_v52 = vpop.f32.mrf.mxu1 }
 0x2f6   : > { %6894 = vmatmul.msk.bf16.gmra.mxu1 %vm2404_vm3, %v8036_v46  ;;  %v8037_v46 = vld [vmem:[%s8650_s0 + $0x138] sm:$0xff] }
 0x2f7   : > { %7106 = vmatmul.msk.bf16.gmra.mxu3 %vm4050_vm5, %v3911_v23  ;;  %v3815_v10 = vsub.f32 %v3534_v60, %v11566_v43 }
 0x2f8   : > { %v1621_v15 = vpop.f32.mrf.mxu0 }
 0x2f9   : > { %v1622_v25 = vadd.f32 %v9167_v28, %v1621_v15  ;;  %v3851_v39 = vadd.f32 %v9411_v53, %v3815_v10 }
 0x2fa   : > { %v3281_v11 = vpop.f32.mrf.mxu2 }
 0x2fb   : > { %v1832_v45 = vmax.f32 %v1622_v25, 0.0  ;;  %v3282_v55 = vadd.f32 %v3281_v11, %v9424_v35  ;;  %v3883_v42 = vmax.f32 %v3851_v39, 0.0  ;;  %v9503_v25 = vpop.f32.mrf.mxu3  ;;  %v11569_v39 = vld [vmem:[#allocation20_spill] sm:$0xff] }
 0x2fd   : > { %v1923_v9 = vpack.c.bf16 %v1832_v45, %v1831_v33  ;;  %v3535_v27 = vmax.f32 %v9254_v40, %v3282_v55  ;;  %v9495_v35 = vpop.f32.mrf.mxu1 }
 0x2ff   : > { %v3816_v29 = vsub.f32 %v3535_v27, %v11567_v63  ;;  %6964 = vmatmul.msk.bf16.gmra.mxu2 %vm2942_vm4, %v1923_v9 }
 0x300   : > { %v1624_v13 = vpop.f32.mrf.mxu0 }
 0x301   : > { %v3852_v47 = vadd.f32 %v9411_v53, %v3816_v29  ;;  %v1625_v23 = vadd.f32 %v9167_v28, %v1624_v13  ;;  %v7978_v29 = vld [vmem:[%s8628_s25 + $0x170] sm:$0xff] }
 0x302   : > { %v3284_v16 = vpop.f32.mrf.mxu2 }
 0x303   : > { %v3884_v30 = vmax.f32 %v3852_v47, 0.0  ;;  %v3285_v40 = vadd.f32 %v3284_v16, %v9435_v18  ;;  %6581 = vmatmul.msk.bf16.gmra.mxu0 %vm1233_vm1, %v7977_v48  ;;  %v1833_v43 = vmax.f32 %v1625_v23, 0.0  ;;  %v11568_v18 = vld [vmem:[#allocation19_spill] sm:$0xff] }
 0x305   : > { %v3912_v2 = vpack.c.bf16 %v3884_v30, %v3883_v42  ;;  %v3536_v21 = vmax.f32 %v9267_v49, %v3285_v40  ;;  %v9505_v33 = vpop.f32.mrf.mxu1  ;;  %v8096_v40 = vld [vmem:[%s11529_s11 + $0x54] sm:$0xf] }
 0x306   : > { %6895 = vmatmul.msk.bf16.gmra.mxu1 %vm2404_vm3, %v8037_v46 }
 0x307   : > { %7107 = vmatmul.msk.bf16.gmra.mxu3 %vm4050_vm5, %v3912_v2  ;;  %v3817_v10 = vsub.f32 %v3536_v21, %v11568_v18  ;;  %v7192_v2 = vld [vmem:[%s11529_s11 + $0x58] sm:$0xf0] }
 0x308   : > { %v1626_v60 = vpop.f32.mrf.mxu0  ;;  %v7195_v23 = vor.u32 %v8096_v40, %v7192_v2 }
 0x309   : > { %v1627_v15 = vadd.f32 %v9167_v28, %v1626_v60  ;;  %v3853_v27 = vadd.f32 %v9411_v53, %v3817_v10 }
 0x30a   : > { %v3286_v11 = vpop.f32.mrf.mxu2  ;;  %4510 = vmatpush.bf16.msrb.mxu0 %v7195_v23 }
 0x30b   : > { %v1834_v45 = vmax.f32 %v1627_v15, 0.0  ;;  %v3287_v55 = vadd.f32 %v3286_v11, %v9449_v6  ;;  %v3885_v6 = vmax.f32 %v3853_v27, 0.0 }
 0x30d   : > { %v1924_v9 = vpack.c.bf16 %v1834_v45, %v1833_v43  ;;  %v3537_v49 = vmax.f32 %v9281_v17, %v3287_v55  ;;  %v9517_v16 = vpop.f32.mrf.mxu1  ;;  %v9521_v17 = vpop.f32.mrf.mxu3  ;;  %v11571_v45 = vld [vmem:[#allocation21_spill] sm:$0xff] }
 0x30e   : > { %11570 = vst [vmem:[#allocation14_spill] sm:$0xff] %v9521_v17 }
 0x30f   : > { %v3818_v63 = vsub.f32 %v3537_v49, %v11569_v39  ;;  %6965 = vmatmul.msk.bf16.gmra.mxu2 %vm2942_vm4, %v1924_v9  ;;  %v8038_v49 = vld [vmem:[%s8650_s0 + $0x140] sm:$0xff] }
 0x310   : > { %v1629_v48 = vpop.f32.mrf.mxu0 }
 0x311   : > { %v3854_v13 = vadd.f32 %v9411_v53, %v3818_v63  ;;  %v1630_v60 = vadd.f32 %v9167_v28, %v1629_v48 }
 0x312   : > { %v3289_v47 = vpop.f32.mrf.mxu2 }
 0x313   : > { %v3886_v42 = vmax.f32 %v3854_v13, 0.0  ;;  %v3290_v30 = vadd.f32 %v3289_v47, %v9457_v14  ;;  %6582 = vmatmul.msk.bf16.gmra.mxu0 %vm1233_vm1, %v7978_v29  ;;  %v1835_v10 = vmax.f32 %v1630_v60, 0.0  ;;  %v11573_v29 = vld [vmem:[#allocation22_spill] sm:$0xff]  ;;  %v7979_v13 = vld [vmem:[%s8628_s25 + $0x178] sm:$0xff] }
 0x315   : > { %v3913_v21 = vpack.c.bf16 %v3886_v42, %v3885_v6  ;;  %v3538_v14 = vmax.f32 %v9301_v44, %v3290_v30  ;;  %v9533_v18 = vpop.f32.mrf.mxu1  ;;  %v9539_v44 = vpop.f32.mrf.mxu3 }
 0x316   : > { %11572 = vst [vmem:[#allocation15_spill] sm:$0xff] %v9539_v44  ;;  %6896 = vmatmul.msk.bf16.gmra.mxu1 %vm2404_vm3, %v8038_v49 }
 0x317   : > { %7108 = vmatmul.msk.bf16.gmra.mxu3 %vm4050_vm5, %v3913_v21  ;;  %v3819_v55 = vsub.f32 %v3538_v14, %v11571_v45 }
 0x318   : > { %v1631_v15 = vpop.f32.mrf.mxu0 }
 0x319   : > { %v1632_v11 = vadd.f32 %v9167_v28, %v1631_v15  ;;  %v3855_v63 = vadd.f32 %v9411_v53, %v3819_v55 }
 0x31a   : > { %v3291_v43 = vpop.f32.mrf.mxu2 }
 0x31b   : > { %v1836_v46 = vmax.f32 %v1632_v11, 0.0  ;;  %v3292_v9 = vadd.f32 %v3291_v43, %v9471_v36  ;;  %v3887_v30 = vmax.f32 %v3855_v63, 0.0 }
 0x31d   : > { %v1925_v27 = vpack.c.bf16 %v1836_v46, %v1835_v10  ;;  %v3539_v39 = vmax.f32 %v9316_v57, %v3292_v9  ;;  %v9547_v36 = vpop.f32.mrf.mxu1  ;;  %v9554_v60 = vpop.f32.mrf.mxu3  ;;  %v8039_v9 = vld [vmem:[%s8650_s0 + $0x148] sm:$0xff] }
 0x31e   : > { %11574 = vst [vmem:[#allocation16_spill] sm:$0xff] %v9554_v60 }
 0x31f   : > { %v3820_v48 = vsub.f32 %v3539_v39, %v11573_v29  ;;  %6966 = vmatmul.msk.bf16.gmra.mxu2 %vm2942_vm4, %v1925_v27  ;;  %v11576_v39 = vld [vmem:[#allocation24_spill] sm:$0xff]  ;;  %v7980_v29 = vld [vmem:[%s8628_s25 + $0x180] sm:$0xff] }
 0x320   : > { %v1634_v47 = vpop.f32.mrf.mxu0 }
 0x321   : > { %v3856_v6 = vadd.f32 %v9411_v53, %v3820_v48  ;;  %v1635_v23 = vadd.f32 %v9167_v28, %v1634_v47 }
 0x322   : > { %v3294_v42 = vpop.f32.mrf.mxu2 }
 0x323   : > { %v3888_v40 = vmax.f32 %v3856_v6, 0.0  ;;  %v3295_v57 = vadd.f32 %v3294_v42, %v9481_v52  ;;  %6583 = vmatmul.msk.bf16.gmra.mxu0 %vm1233_vm1, %v7979_v13  ;;  %v1837_v10 = vmax.f32 %v1635_v23, 0.0  ;;  %v11575_v52 = vld [vmem:[#allocation23_spill] sm:$0xff] }
 0x325   : > { %v3914_v2 = vpack.c.bf16 %v3888_v40, %v3887_v30  ;;  %v3540_v21 = vmax.f32 %v9330_v50, %v3295_v57  ;;  %v9557_v43 = vpop.f32.mrf.mxu1  ;;  %v9569_v47 = vpop.f32.mrf.mxu3 }
 0x326   : > { %6897 = vmatmul.msk.bf16.gmra.mxu1 %vm2404_vm3, %v8039_v9  ;;  %11577 = vst [vmem:[#allocation17_spill] sm:$0xff] %v9569_v47 }
 0x327   : > { %7109 = vmatmul.msk.bf16.gmra.mxu3 %vm4050_vm5, %v3914_v2  ;;  %v3821_v45 = vsub.f32 %v3540_v21, %v11575_v52 }
 0x328   : > { %v1636_v14 = vpop.f32.mrf.mxu0 }
 0x329   : > { %v1637_v15 = vadd.f32 %v9167_v28, %v1636_v14  ;;  %v3857_v27 = vadd.f32 %v9411_v53, %v3821_v45 }
 0x32a   : > { %v3296_v11 = vpop.f32.mrf.mxu2 }
 0x32b   : > { %v1838_v55 = vmax.f32 %v1637_v15, 0.0  ;;  %v3297_v46 = vadd.f32 %v3296_v11, %v9495_v35  ;;  %v3889_v42 = vmax.f32 %v3857_v27, 0.0 }
 0x32d   : > { %v1926_v49 = vpack.c.bf16 %v1838_v55, %v1837_v10  ;;  %v3541_v50 = vmax.f32 %v9351_v8, %v3297_v46  ;;  %v9571_v35 = vpop.f32.mrf.mxu1  ;;  %v11578_v10 = vld [vmem:[#allocation25_spill] sm:$0xff]  ;;  %v8040_v55 = vld [vmem:[%s8650_s0 + $0x150] sm:$0xff]  ;;  %v9584_v46 = vpop.f32.mrf.mxu3 }
 0x32e   : > { %11579 = vst [vmem:[#allocation18_spill] sm:$0xff] %v9584_v46 }
 0x32f   : > { %v3822_v63 = vsub.f32 %v3541_v50, %v11576_v39  ;;  %6967 = vmatmul.msk.bf16.gmra.mxu2 %vm2942_vm4, %v1926_v49  ;;  %v11580_v50 = vld [vmem:[#allocation26_spill] sm:$0xff] }
 0x330   : > { %v1639_v48 = vpop.f32.mrf.mxu0  ;;  %v7981_v39 = vld [vmem:[%s8628_s25 + $0x188] sm:$0xff] }
 0x331   : > { %v3858_v13 = vadd.f32 %v9411_v53, %v3822_v63  ;;  %v1640_v57 = vadd.f32 %v9167_v28, %v1639_v48  ;;  %v7268_v63 = vld [vmem:[%s11445_s13 + $0x60] sm:$0xf] }
 0x332   : > { %v3299_v6 = vpop.f32.mrf.mxu2 }
 0x333   : > { %v3890_v8 = vmax.f32 %v3858_v13, 0.0  ;;  %v3300_v30 = vadd.f32 %v3299_v6, %v9505_v33  ;;  %6584 = vmatmul.msk.bf16.gmra.mxu0 %vm1233_vm1, %v7980_v29  ;;  %v1839_v11 = vmax.f32 %v1640_v57, 0.0 }
 0x335   : > { %v3915_v40 = vpack.c.bf16 %v3890_v8, %v3889_v42  ;;  %v3542_v2 = vmax.f32 %v9371_v59, %v3300_v30  ;;  %v9579_v15 = vpop.f32.mrf.mxu1  ;;  %v9603_v57 = vpop.f32.mrf.mxu3 }
 0x336   : > { %6898 = vmatmul.msk.bf16.gmra.mxu1 %vm2404_vm3, %v8040_v55  ;;  %11581 = vst [vmem:[#allocation19_spill] sm:$0xff] %v9603_v57 }
 0x337   : > { %7110 = vmatmul.msk.bf16.gmra.mxu3 %vm4050_vm5, %v3915_v40  ;;  %v3823_v52 = vsub.f32 %v3542_v2, %v11578_v10 }
 0x338   : > { %v1641_v23 = vpop.f32.mrf.mxu0 }
 0x339   : > { %v1642_v21 = vadd.f32 %v9167_v28, %v1641_v23  ;;  %v3859_v49 = vadd.f32 %v9411_v53, %v3823_v52  ;;  %v8041_v52 = vld [vmem:[%s8650_s0 + $0x158] sm:$0xff] }
 0x33a   : > { %v3301_v14 = vpop.f32.mrf.mxu2 }
 0x33b   : > { %v1840_v33 = vmax.f32 %v1642_v21, 0.0  ;;  %v3302_v45 = vadd.f32 %v3301_v14, %v9517_v16  ;;  %v8116_v16 = vld [vmem:[%s11445_s13 + $0x64] sm:$0xf0]  ;;  %v3891_v42 = vmax.f32 %v3859_v49, 0.0 }
 0x33c   : > { %v7269_v48 = vor.u32 %v8116_v16, %v7268_v63 }
 0x33d   : > { %v1927_v9 = vpack.c.bf16 %v1840_v33, %v1839_v11  ;;  %v3543_v59 = vmax.f32 %v9385_v62, %v3302_v45  ;;  %v2782_v6 = vpop.f32.mrf.mxu1  ;;  %v7982_v45 = vld [vmem:[%s8628_s25 + $0x190] sm:$0xff] }
 0x33e   : > { %4806 = vmatpush.bf16.msrb.mxu2 %v7269_v48 }
 0x33f   : > { %v3824_v27 = vsub.f32 %v3543_v59, %v11580_v50  ;;  %6968 = vmatmul.msk.bf16.gmra.mxu2 %vm2942_vm4, %v1927_v9  ;;  %v9615_v9 = vpop.f32.mrf.mxu3 }
 0x340   : > { %v1644_v29 = vpop.f32.mrf.mxu0  ;;  %11582 = vst [vmem:[#allocation20_spill] sm:$0xff] %v9615_v9 }
 0x341   : > { %v3860_v62 = vadd.f32 %v9411_v53, %v3824_v27  ;;  %v1645_v2 = vadd.f32 %v9167_v28, %v1644_v29 }
 0x342   : > { %v3304_v13 = vpop.f32.mrf.mxu2 }
 0x343   : > { %v3892_v8 = vmax.f32 %v3860_v62, 0.0  ;;  %v9600_v30 = vadd.f32 %v3304_v13, %v9533_v18  ;;  %6585 = vmatmul.msk.bf16.gmra.mxu0 %vm1233_vm1, %v7981_v39  ;;  %v1841_v11 = vmax.f32 %v1645_v2, 0.0 }
 0x345   : > { %v3916_v40 = vpack.c.bf16 %v3892_v8, %v3891_v42  ;;  %v2785_v14 = vpop.f32.mrf.mxu1  ;;  %v8042_v42 = vld [vmem:[%s8650_s0 + $0x160] sm:$0xff] }
 0x346   : > { %6899 = vmatmul.msk.bf16.gmra.mxu1 %vm2404_vm3, %v8041_v52 }
 0x347   : > { %7111 = vmatmul.msk.bf16.gmra.mxu3 %vm4050_vm5, %v3916_v40 }
 0x348   : > { %v1646_v53 = vpop.f32.mrf.mxu0 }
 0x349   : > { %v1647_v23 = vadd.f32 %v9167_v28, %v1646_v53 }
 0x34a   : > { %v3306_v21 = vpop.f32.mrf.mxu2 }
 0x34b   : > { %v1842_v10 = vmax.f32 %v1647_v23, 0.0  ;;  %v9609_v18 = vadd.f32 %v3306_v21, %v9547_v36 }
 0x34d   : > { %v1928_v33 = vpack.c.bf16 %v1842_v10, %v1841_v11  ;;  %v2787_v49 = vpop.f32.mrf.mxu1 }
 0x34f   : > { %6969 = vmatmul.msk.bf16.gmra.mxu2 %vm2942_vm4, %v1928_v33 }
 0x350   : > { %v1649_v55 = vpop.f32.mrf.mxu0 }
 0x351   : > { %v1650_v36 = vadd.f32 %v9167_v28, %v1649_v55 }
 0x352   : > { %v3309_v59 = vpop.f32.mrf.mxu2 }
 0x353   : > { %v9618_v50 = vadd.f32 %v3309_v59, %v9557_v43  ;;  %6586 = vmatmul.msk.bf16.gmra.mxu0 %vm1233_vm1, %v7982_v45  ;;  %v1843_v29 = vmax.f32 %v1650_v36, 0.0  ;;  %v7983_v43 = vld [vmem:[%s8628_s25 + $0x198] sm:$0xff] }
 0x355   : > { %v2790_v13 = vpop.f32.mrf.mxu1 }
 0x356   : > { %6900 = vmatmul.msk.bf16.gmra.mxu1 %vm2404_vm3, %v8042_v42 }
 0x358   : > { %v1651_v27 = vpop.f32.mrf.mxu0 }
 0x359   : > { %v1652_v39 = vadd.f32 %v9167_v28, %v1651_v27  ;;  %v8043_v27 = vld [vmem:[%s8650_s0 + $0x168] sm:$0xff] }
 0x35a   : > { %v3311_v63 = vpop.f32.mrf.mxu2  ;;  %v4108_v16 = vpop.f32.mrf.mxu3 }
 0x35b   : > { %v1844_v48 = vmax.f32 %v1652_v39, 0.0  ;;  %v9624_v62 = vadd.f32 %v3311_v63, %v9571_v35 }
 0x35d   : > { %v1929_v8 = vpack.c.bf16 %v1844_v48, %v1843_v29  ;;  %v2792_v35 = vpop.f32.mrf.mxu1 }
 0x35f   : > { %6970 = vmatmul.msk.bf16.gmra.mxu2 %vm2942_vm4, %v1929_v8 }
 0x360   : > { %v1654_v40 = vpop.f32.mrf.mxu0 }
 0x361   : > { %v1655_v21 = vadd.f32 %v9167_v28, %v1654_v40 }
 0x362   : > { %v3314_v2 = vpop.f32.mrf.mxu2  ;;  %v9630_v53 = vpop.f32.mrf.mxu3 }
 0x363   : > { %11583 = vst [vmem:[#allocation21_spill] sm:$0xff] %v9630_v53  ;;  %v9633_v23 = vadd.f32 %v3314_v2, %v9579_v15  ;;  %6587 = vmatmul.msk.bf16.gmra.mxu0 %vm1233_vm1, %v7983_v43  ;;  %v1845_v45 = vmax.f32 %v1655_v21, 0.0  ;;  %v7984_v15 = vld [vmem:[%s8628_s25 + $0x1a0] sm:$0xff]  ;;  %v4109_v2 = vadd.f32 %v4108_v16, %v9144_v54 }
 0x365   : > { %v2795_v36 = vpop.f32.mrf.mxu1 }
 0x366   : > { %6901 = vmatmul.msk.bf16.gmra.mxu1 %vm2404_vm3, %v8043_v27  ;;  %v8044_v27 = vld [vmem:[%s8650_s0 + $0x170] sm:$0xff] }
 0x368   : > { %v1656_v11 = vpop.f32.mrf.mxu0 }
 0x369   : > { %v1657_v10 = vadd.f32 %v9167_v28, %v1656_v11 }
 0x36a   : > { %v3316_v52 = vpop.f32.mrf.mxu2  ;;  %v4113_v33 = vpop.f32.mrf.mxu3 }
 0x36b   : > { %v1846_v55 = vmax.f32 %v1657_v10, 0.0  ;;  %v9638_v59 = vadd.f32 %v3316_v52, %v2782_v6 }
 0x36d   : > { %v1930_v39 = vpack.c.bf16 %v1846_v55, %v1845_v45  ;;  %v2797_v8 = vpop.f32.mrf.mxu1 }
 0x36f   : > { %6971 = vmatmul.msk.bf16.gmra.mxu2 %vm2942_vm4, %v1930_v39 }
 0x370   : > { %v1659_v63 = vpop.f32.mrf.mxu0 }
 0x371   : > { %v1660_v6 = vadd.f32 %v9167_v28, %v1659_v63  ;;  %v7985_v63 = vld [vmem:[%s8628_s25 + $0x1a8] sm:$0xff] }
 0x372   : > { %v3319_v29 = vpop.f32.mrf.mxu2  ;;  %v9644_v48 = vpop.f32.mrf.mxu3 }
 0x373   : > { %11584 = vst [vmem:[#allocation22_spill] sm:$0xff] %v9644_v48  ;;  %v9646_v42 = vadd.f32 %v3319_v29, %v2785_v14  ;;  %6588 = vmatmul.msk.bf16.gmra.mxu0 %vm1233_vm1, %v7984_v15  ;;  %v1847_v10 = vmax.f32 %v1660_v6, 0.0 }
 0x375   : > { %v2800_v55 = vpop.f32.mrf.mxu1 }
 0x376   : > { %6902 = vmatmul.msk.bf16.gmra.mxu1 %vm2404_vm3, %v8044_v27 }
 0x378   : > { %v1661_v43 = vpop.f32.mrf.mxu0 }
 0x379   : > { %v1662_v40 = vadd.f32 %v9167_v28, %v1661_v43 }
 0x37a   : > { %v3321_v21 = vpop.f32.mrf.mxu2  ;;  %v4118_v11 = vpop.f32.mrf.mxu3 }
 0x37b   : > { %v1848_v52 = vmax.f32 %v1662_v40, 0.0  ;;  %v9652_v45 = vadd.f32 %v3321_v21, %v2787_v49  ;;  %v4119_v14 = vadd.f32 %v4118_v11, %v9196_v61  ;;  %v9667_v61 = vld [vmem:[%s11503_s7] ss:$0 sm:$0xff] }
 0x37d   : > { %v1931_v39 = vpack.c.bf16 %v1848_v52, %v1847_v10  ;;  %v4188_v15 = vmax.f32 %v4109_v2, %v4119_v14  ;;  %v2802_v49 = vpop.f32.mrf.mxu1  ;;  %v4114_v2 = vadd.f32 %v4113_v33, %v9171_v1  ;;  %v7184_v1 = vld [vmem:[%s11529_s11 + $0x48] sm:$0xf0] }
 0x37f   : > { %6972 = vmatmul.msk.bf16.gmra.mxu2 %vm2942_vm4, %v1931_v39  ;;  %v8045_v39 = vld [vmem:[%s8650_s0 + $0x178] sm:$0xff] }
 0x380   : > { %v1664_v28 = vpop.f32.mrf.mxu0 }
 0x381   : > { %v1665_v6 = vadd.f32 %v9667_v61, %v1664_v28  ;;  %v8094_v28 = vld [vmem:[%s11529_s11 + $0x44] sm:$0xf] }
 0x382   : > { %v3324_v29 = vpop.f32.mrf.mxu2  ;;  %v9659_v54 = vpop.f32.mrf.mxu3  ;;  %v7187_v33 = vor.u32 %v8094_v28, %v7184_v1 }
 0x383   : > { %11585 = vst [vmem:[#allocation23_spill] sm:$0xff] %v9659_v54  ;;  %v9661_v16 = vadd.f32 %v3324_v29, %v2790_v13  ;;  %6589 = vmatmul.msk.bf16.gmra.mxu0 %vm1233_vm1, %v7985_v63  ;;  %v1849_v13 = vmax.f32 %v1665_v6, 0.0  ;;  %v8055_v54 = vld [vmem:[%s8650_s0 + $0x1c8] sm:$0xff] }
 0x384   : > { %4511 = vmatpush.bf16.msrb.mxu0 %v7187_v33 }
 0x385   : > { %v2805_v27 = vpop.f32.mrf.mxu1 }
 0x386   : > { %6903 = vmatmul.msk.bf16.gmra.mxu1 %vm2404_vm3, %v8045_v39 }
 0x388   : > { %v1666_v43 = vpop.f32.mrf.mxu0 }
 0x389   : > { %v1667_v40 = vadd.f32 %v9667_v61, %v1666_v43 }
 0x38a   : > { %v3326_v21 = vpop.f32.mrf.mxu2  ;;  %v4123_v11 = vpop.f32.mrf.mxu3 }
 0x38b   : > { %v1850_v10 = vmax.f32 %v1667_v40, 0.0  ;;  %v9672_v52 = vadd.f32 %v3326_v21, %v2792_v35  ;;  %v4124_v14 = vadd.f32 %v4123_v11, %v9221_v31  ;;  %v7986_v35 = vld [vmem:[%s8628_s25 + $0x1b0] sm:$0xff] }
 0x38d   : > { %v1932_v63 = vpack.c.bf16 %v1850_v10, %v1849_v13  ;;  %v4190_v29 = vmax.f32 %v4114_v2, %v4124_v14  ;;  %v2807_v2 = vpop.f32.mrf.mxu1 }
 0x38f   : > { %6973 = vmatmul.msk.bf16.gmra.mxu2 %vm2942_vm4, %v1932_v63 }
 0x390   : > { %v1669_v6 = vpop.f32.mrf.mxu0 }
 0x391   : > { %v1670_v21 = vadd.f32 %v9667_v61, %v1669_v6 }
 0x392   : > { %v3329_v31 = vpop.f32.mrf.mxu2  ;;  %v9685_v43 = vpop.f32.mrf.mxu3 }
 0x393   : > { %11586 = vst [vmem:[#allocation24_spill] sm:$0xff] %v9685_v43  ;;  %v9687_v40 = vadd.f32 %v3329_v31, %v2795_v36  ;;  %6590 = vmatmul.msk.bf16.gmra.mxu0 %vm1233_vm1, %v7986_v35  ;;  %v1851_v39 = vmax.f32 %v1670_v21, 0.0  ;;  %v8046_v36 = vld [vmem:[%s8650_s0 + $0x180] sm:$0xff]  ;;  %v7987_v35 = vld [vmem:[%s8628_s25 + $0x1b8] sm:$0xff] }
 0x395   : > { %v2810_v33 = vpop.f32.mrf.mxu1 }
 0x396   : > { %6904 = vmatmul.msk.bf16.gmra.mxu1 %vm2404_vm3, %v8046_v36 }
 0x398   : > { %v1671_v11 = vpop.f32.mrf.mxu0 }
 0x399   : > { %v1672_v13 = vadd.f32 %v9667_v61, %v1671_v11 }
 0x39a   : > { %v3331_v10 = vpop.f32.mrf.mxu2  ;;  %v4128_v14 = vpop.f32.mrf.mxu3 }
 0x39b   : > { %v1852_v63 = vmax.f32 %v1672_v13, 0.0  ;;  %v9692_v28 = vadd.f32 %v3331_v10, %v2797_v8  ;;  %v4129_v1 = vadd.f32 %v4128_v14, %v9248_v34 }
 0x39d   : > { %v1933_v31 = vpack.c.bf16 %v1852_v63, %v1851_v39  ;;  %v9696_v9 = vmax.f32 %v4188_v15, %v4129_v1  ;;  %v2812_v34 = vpop.f32.mrf.mxu1 }
 0x39f   : > { %11587 = vst [vmem:[#allocation25_spill] sm:$0xff] %v9696_v9  ;;  %6974 = vmatmul.msk.bf16.gmra.mxu2 %vm2942_vm4, %v1933_v31 }
 0x3a0   : > { %v1674_v6 = vpop.f32.mrf.mxu0 }
 0x3a1   : > { %v1675_v8 = vadd.f32 %v9667_v61, %v1674_v6 }
 0x3a2   : > { %v3334_v11 = vpop.f32.mrf.mxu2  ;;  %v9701_v46 = vpop.f32.mrf.mxu3 }
 0x3a3   : > { %11588 = vst [vmem:[#allocation26_spill] sm:$0xff] %v9701_v46  ;;  %v9703_v21 = vadd.f32 %v3334_v11, %v2800_v55  ;;  %6591 = vmatmul.msk.bf16.gmra.mxu0 %vm1233_vm1, %v7987_v35  ;;  %v1853_v39 = vmax.f32 %v1675_v8, 0.0  ;;  %v8047_v55 = vld [vmem:[%s8650_s0 + $0x188] sm:$0xff]  ;;  %v7988_v35 = vld [vmem:[%s8628_s25 + $0x1c0] sm:$0xff] }
 0x3a5   : > { %v2815_v31 = vpop.f32.mrf.mxu1 }
 0x3a6   : > { %6905 = vmatmul.msk.bf16.gmra.mxu1 %vm2404_vm3, %v8047_v55 }
 0x3a8   : > { %v1676_v15 = vpop.f32.mrf.mxu0 }
 0x3a9   : > { %v1677_v13 = vadd.f32 %v9667_v61, %v1676_v15 }
 0x3aa   : > { %v3336_v10 = vpop.f32.mrf.mxu2  ;;  %v4133_v14 = vpop.f32.mrf.mxu3 }
 0x3ab   : > { %v1854_v63 = vmax.f32 %v1677_v13, 0.0  ;;  %v9708_v1 = vadd.f32 %v3336_v10, %v2802_v49  ;;  %v4134_v36 = vadd.f32 %v4133_v14, %v9275_v0 }
 0x3ad   : > { %v1934_v11 = vpack.c.bf16 %v1854_v63, %v1853_v39  ;;  %v9712_v58 = vmax.f32 %v4190_v29, %v4134_v36  ;;  %v2817_v0 = vpop.f32.mrf.mxu1 }
 0x3af   : > { %11589 = vst [vmem:[#allocation51_spill] sm:$0xff] %v9712_v58  ;;  %6975 = vmatmul.msk.bf16.gmra.mxu2 %vm2942_vm4, %v1934_v11  ;;  %v8048_v11 = vld [vmem:[%s8650_s0 + $0x190] sm:$0xff] }
 0x3b0   : > { %v1679_v6 = vpop.f32.mrf.mxu0 }
 0x3b1   : > { %v1680_v49 = vadd.f32 %v9667_v61, %v1679_v6  ;;  %v7989_v6 = vld [vmem:[%s8628_s25 + $0x1c8] sm:$0xff] }
 0x3b2   : > { %v3339_v15 = vpop.f32.mrf.mxu2  ;;  %v9717_v12 = vpop.f32.mrf.mxu3 }
 0x3b3   : > { %11590 = vst [vmem:[#allocation52_spill] sm:$0xff] %v9717_v12  ;;  %v9719_v8 = vadd.f32 %v3339_v15, %v2805_v27  ;;  %6592 = vmatmul.msk.bf16.gmra.mxu0 %vm1233_vm1, %v7988_v35  ;;  %v1855_v39 = vmax.f32 %v1680_v49, 0.0  ;;  %v7260_v49 = vld [vmem:[%s11445_s13 + $0x50] sm:$0xf] }
 0x3b5   : > { %v2820_v27 = vpop.f32.mrf.mxu1 }
 0x3b6   : > { %6906 = vmatmul.msk.bf16.gmra.mxu1 %vm2404_vm3, %v8048_v11 }
 0x3b8   : > { %v1681_v29 = vpop.f32.mrf.mxu0 }
 0x3b9   : > { %v1682_v13 = vadd.f32 %v9667_v61, %v1681_v29 }
 0x3ba   : > { %v3341_v10 = vpop.f32.mrf.mxu2  ;;  %v4138_v14 = vpop.f32.mrf.mxu3 }
 0x3bb   : > { %v1856_v63 = vmax.f32 %v1682_v13, 0.0  ;;  %v9724_v36 = vadd.f32 %v3341_v10, %v2807_v2  ;;  %v9727_v55 = vadd.f32 %v4138_v14, %v9310_v22  ;;  %v8114_v22 = vld [vmem:[%s11445_s13 + $0x54] sm:$0xf0] }
 0x3bc   : > { %v7261_v29 = vor.u32 %v8114_v22, %v7260_v49 }
 0x3bd   : > { %11591 = vst [vmem:[#allocation53_spill] sm:$0xff] %v9727_v55  ;;  %v1935_v15 = vpack.c.bf16 %v1856_v63, %v1855_v39  ;;  %v2822_v39 = vpop.f32.mrf.mxu1 }
 0x3be   : > { %4807 = vmatpush.bf16.msrb.mxu2 %v7261_v29  ;;  %v8049_v29 = vld [vmem:[%s8650_s0 + $0x198] sm:$0xff] }
 0x3bf   : > { %6976 = vmatmul.msk.bf16.gmra.mxu2 %vm2942_vm4, %v1935_v15 }
 0x3c0   : > { %v1684_v2 = vpop.f32.mrf.mxu0 }
 0x3c1   : > { %v1685_v11 = vadd.f32 %v9667_v61, %v1684_v2 }
 0x3c2   : > { %v3344_v13 = vpop.f32.mrf.mxu2  ;;  %v9741_v10 = vpop.f32.mrf.mxu3 }
 0x3c3   : > { %11592 = vst [vmem:[#allocation54_spill] sm:$0xff] %v9741_v10  ;;  %v9743_v14 = vadd.f32 %v3344_v13, %v2810_v33  ;;  %6593 = vmatmul.msk.bf16.gmra.mxu0 %vm1233_vm1, %v7989_v6  ;;  %v1857_v12 = vmax.f32 %v1685_v11, 0.0 }
 0x3c5   : > { %v2825_v6 = vpop.f32.mrf.mxu1 }
 0x3c6   : > { %6907 = vmatmul.msk.bf16.gmra.mxu1 %vm2404_vm3, %v8049_v29 }
 0x3c8   : > { %v1686_v15 = vpop.f32.mrf.mxu0 }
 0x3c9   : > { %v1687_v35 = vadd.f32 %v9667_v61, %v1686_v15 }
 0x3ca   : > { %v3346_v49 = vpop.f32.mrf.mxu2  ;;  %v4143_v22 = vpop.f32.mrf.mxu3 }
 0x3cb   : > { %v1858_v48 = vmax.f32 %v1687_v35, 0.0  ;;  %v9750_v41 = vadd.f32 %v3346_v49, %v2812_v34  ;;  %v9753_v33 = vadd.f32 %v4143_v22, %v9345_v32  ;;  %v7990_v35 = vld [vmem:[%s8628_s25 + $0x1d0] sm:$0xff] }
 0x3cd   : > { %11593 = vst [vmem:[#allocation55_spill] sm:$0xff] %v9753_v33  ;;  %v1936_v13 = vpack.c.bf16 %v1858_v48, %v1857_v12  ;;  %v2827_v12 = vpop.f32.mrf.mxu1 }
 0x3cf   : > { %6977 = vmatmul.msk.bf16.gmra.mxu2 %vm2942_vm4, %v1936_v13 }
 0x3d0   : > { %v1689_v34 = vpop.f32.mrf.mxu0 }
 0x3d1   : > { %v1690_v48 = vadd.f32 %v9667_v61, %v1689_v34  ;;  %v7991_v34 = vld [vmem:[%s8628_s25 + $0x1d8] sm:$0xff] }
 0x3d2   : > { %v3349_v11 = vpop.f32.mrf.mxu2 }
 0x3d3   : > { %v9763_v15 = vadd.f32 %v3349_v11, %v2815_v31  ;;  %6594 = vmatmul.msk.bf16.gmra.mxu0 %vm1233_vm1, %v7990_v35  ;;  %v1859_v13 = vmax.f32 %v1690_v48, 0.0  ;;  %v8050_v31 = vld [vmem:[%s8650_s0 + $0x1a0] sm:$0xff] }
 0x3d5   : > { %v2830_v33 = vpop.f32.mrf.mxu1 }
 0x3d6   : > { %6908 = vmatmul.msk.bf16.gmra.mxu1 %vm2404_vm3, %v8050_v31 }
 0x3d8   : > { %v1691_v49 = vpop.f32.mrf.mxu0 }
 0x3d9   : > { %v1692_v22 = vadd.f32 %v9667_v61, %v1691_v49 }
 0x3da   : > { %v3351_v29 = vpop.f32.mrf.mxu2 }
 0x3db   : > { %v1860_v2 = vmax.f32 %v1692_v22, 0.0  ;;  %v9770_v63 = vadd.f32 %v3351_v29, %v2817_v0 }
 0x3dd   : > { %v1937_v11 = vpack.c.bf16 %v1860_v2, %v1859_v13  ;;  %v2832_v0 = vpop.f32.mrf.mxu1 }
 0x3df   : > { %6978 = vmatmul.msk.bf16.gmra.mxu2 %vm2942_vm4, %v1937_v11 }
 0x3e0   : > { %v1694_v32 = vpop.f32.mrf.mxu0 }
 0x3e1   : > { %v1695_v48 = vadd.f32 %v9667_v61, %v1694_v32  ;;  %v7992_v32 = vld [vmem:[%s8628_s25 + $0x1e0] sm:$0xff] }
 0x3e2   : > { %v3354_v58 = vpop.f32.mrf.mxu2 }
 0x3e3   : > { %v9778_v49 = vadd.f32 %v3354_v58, %v2820_v27  ;;  %6595 = vmatmul.msk.bf16.gmra.mxu0 %vm1233_vm1, %v7991_v34  ;;  %v1861_v31 = vmax.f32 %v1695_v48, 0.0  ;;  %v8051_v58 = vld [vmem:[%s8650_s0 + $0x1a8] sm:$0xff] }
 0x3e5   : > { %v2835_v43 = vpop.f32.mrf.mxu1 }
 0x3e6   : > { %6909 = vmatmul.msk.bf16.gmra.mxu1 %vm2404_vm3, %v8051_v58 }
 0x3e8   : > { %v1696_v22 = vpop.f32.mrf.mxu0 }
 0x3e9   : > { %v1697_v29 = vadd.f32 %v9667_v61, %v1696_v22 }
 0x3ea   : > { %v3356_v13 = vpop.f32.mrf.mxu2 }
 0x3eb   : > { %v1862_v11 = vmax.f32 %v1697_v29, 0.0  ;;  %v9785_v35 = vadd.f32 %v3356_v13, %v2822_v39 }
 0x3ed   : > { %v1938_v27 = vpack.c.bf16 %v1862_v11, %v1861_v31  ;;  %v2837_v39 = vpop.f32.mrf.mxu1 }
 0x3ef   : > { %6979 = vmatmul.msk.bf16.gmra.mxu2 %vm2942_vm4, %v1938_v27 }
 0x3f0   : > { %v1699_v2 = vpop.f32.mrf.mxu0 }
 0x3f1   : > { %v1700_v29 = vadd.f32 %v9667_v61, %v1699_v2  ;;  %v7993_v2 = vld [vmem:[%s8628_s25 + $0x1e8] sm:$0xff] }
 0x3f2   : > { %v3359_v3 = vpop.f32.mrf.mxu2 }
 0x3f3   : > { %v9793_v22 = vadd.f32 %v3359_v3, %v2825_v6  ;;  %6596 = vmatmul.msk.bf16.gmra.mxu0 %vm1233_vm1, %v7992_v32  ;;  %v1863_v58 = vmax.f32 %v1700_v29, 0.0  ;;  %v8052_v3 = vld [vmem:[%s8650_s0 + $0x1b0] sm:$0xff] }
 0x3f5   : > { %v2840_v55 = vpop.f32.mrf.mxu1 }
 0x3f6   : > { %6910 = vmatmul.msk.bf16.gmra.mxu1 %vm2404_vm3, %v8052_v3 }
 0x3f8   : > { %v1701_v13 = vpop.f32.mrf.mxu0 }
 0x3f9   : > { %v1702_v31 = vadd.f32 %v9667_v61, %v1701_v13 }
 0x3fa   : > { %v3361_v11 = vpop.f32.mrf.mxu2 }
 0x3fb   : > { %v1864_v27 = vmax.f32 %v1702_v31, 0.0  ;;  %v9800_v34 = vadd.f32 %v3361_v11, %v2827_v12 }
 0x3fd   : > { %v1939_v6 = vpack.c.bf16 %v1864_v27, %v1863_v58  ;;  %v2842_v12 = vpop.f32.mrf.mxu1 }
 0x3ff   : > { %6980 = vmatmul.msk.bf16.gmra.mxu2 %vm2942_vm4, %v1939_v6 }
 0x400   : > { %v1704_v48 = vpop.f32.mrf.mxu0 }
 0x401   : > { %v1705_v31 = vadd.f32 %v9667_v61, %v1704_v48  ;;  %v8092_v48 = vld [vmem:[%s11529_s11 + $0x34] sm:$0xf] }
 0x402   : > { %v3364_v9 = vpop.f32.mrf.mxu2 }
 0x403   : > { %v9808_v13 = vadd.f32 %v3364_v9, %v2830_v33  ;;  %6597 = vmatmul.msk.bf16.gmra.mxu0 %vm1233_vm1, %v7993_v2  ;;  %v1865_v3 = vmax.f32 %v1705_v31, 0.0  ;;  %v8053_v9 = vld [vmem:[%s8650_s0 + $0x1b8] sm:$0xff] }
 0x405   : > { %v2845_v10 = vpop.f32.mrf.mxu1 }
 0x406   : > { %6911 = vmatmul.msk.bf16.gmra.mxu1 %vm2404_vm3, %v8053_v9 }
 0x408   : > { %v1706_v11 = vpop.f32.mrf.mxu0 }
 0x409   : > { %v1707_v58 = vadd.f32 %v9667_v61, %v1706_v11  ;;  %v7176_v11 = vld [vmem:[%s11529_s11 + $0x38] sm:$0xf0] }
 0x40a   : > { %v3366_v27 = vpop.f32.mrf.mxu2  ;;  %v7179_v31 = vor.u32 %v8092_v48, %v7176_v11 }
 0x40b   : > { %v1866_v6 = vmax.f32 %v1707_v58, 0.0  ;;  %v9815_v32 = vadd.f32 %v3366_v27, %v2832_v0  ;;  %v7994_v0 = vld [vmem:[%s8628_s25 + $0x1f0] sm:$0xff] }
 0x40c   : > { %4512 = vmatpush.bf16.msrb.mxu0 %v7179_v31 }
 0x40d   : > { %v1940_v33 = vpack.c.bf16 %v1866_v6, %v1865_v3  ;;  %v2847_v6 = vpop.f32.mrf.mxu1 }
 0x40f   : > { %6981 = vmatmul.msk.bf16.gmra.mxu2 %vm2942_vm4, %v1940_v33 }
 0x410   : > { %v1709_v58 = vpop.f32.mrf.mxu0 }
 0x411   : > { %v1710_v2 = vadd.f32 %v9667_v61, %v1709_v58  ;;  %v7995_v58 = vld [vmem:[%s8628_s25 + $0x1f8] sm:$0xff] }
 0x412   : > { %v3369_v27 = vpop.f32.mrf.mxu2 }
 0x413   : > { %v9829_v3 = vadd.f32 %v3369_v27, %v2835_v43  ;;  %6598 = vmatmul.msk.bf16.gmra.mxu0 %vm1233_vm1, %v7994_v0  ;;  %v1867_v11 = vmax.f32 %v1710_v2, 0.0  ;;  %v8054_v43 = vld [vmem:[%s8650_s0 + $0x1c0] sm:$0xff] }
 0x415   : > { %v2850_v31 = vpop.f32.mrf.mxu1 }
 0x416   : > { %6912 = vmatmul.msk.bf16.gmra.mxu1 %vm2404_vm3, %v8054_v43 }
 0x418   : > { %v1711_v29 = vpop.f32.mrf.mxu0 }
 0x419   : > { %v1712_v48 = vadd.f32 %v9667_v61, %v1711_v29 }
 0x41a   : > { %v3371_v33 = vpop.f32.mrf.mxu2 }
 0x41b   : > { %v1868_v56 = vmax.f32 %v1712_v48, 0.0  ;;  %v9836_v46 = vadd.f32 %v3371_v33, %v2837_v39 }
 0x41d   : > { %v1941_v27 = vpack.c.bf16 %v1868_v56, %v1867_v11  ;;  %v2852_v39 = vpop.f32.mrf.mxu1 }
 0x41f   : > { %6982 = vmatmul.msk.bf16.gmra.mxu2 %vm2942_vm4, %v1941_v27 }
 0x420   : > { %v1714_v9 = vpop.f32.mrf.mxu0 }
 0x421   : > { %v1715_v56 = vadd.f32 %v9667_v61, %v1714_v9 }
 0x422   : > { %v3374_v51 = vpop.f32.mrf.mxu2 }
 0x423   : > { %v9844_v29 = vadd.f32 %v3374_v51, %v2840_v55  ;;  %6599 = vmatmul.msk.bf16.gmra.mxu0 %vm1233_vm1, %v7995_v58  ;;  %v1869_v43 = vmax.f32 %v1715_v56, 0.0 }
 0x425   : > { %v2855_v53 = vpop.f32.mrf.mxu1 }
 0x426   : > { %6913 = vmatmul.msk.bf16.gmra.mxu1 %vm2404_vm3, %v8055_v54 }
 0x428   : > { %v1716_v48 = vpop.f32.mrf.mxu0 }
 0x429   : > { %v1717_v33 = vadd.f32 %v9667_v61, %v1716_v48 }
 0x42a   : > { %v3376_v11 = vpop.f32.mrf.mxu2 }
 0x42b   : > { %v1870_v27 = vmax.f32 %v1717_v33, 0.0  ;;  %v9851_v0 = vadd.f32 %v3376_v11, %v2842_v12 }
 0x42d   : > { %v1942_v51 = vpack.c.bf16 %v1870_v27, %v1869_v43  ;;  %v2857_v48 = vpop.f32.mrf.mxu1 }
 0x42f   : > { %6983 = vmatmul.msk.bf16.gmra.mxu2 %vm2942_vm4, %v1942_v51  ;;  %v8056_v51 = vld [vmem:[%s8650_s0 + $0x1d0] sm:$0xff] }
 0x430   : > { %v1719_v9 = vpop.f32.mrf.mxu0 }
 0x431   : > { %v1720_v56 = vadd.f32 %v9667_v61, %v1719_v9  ;;  %v7252_v9 = vld [vmem:[%s11445_s13 + $0x40] sm:$0xf] }
 0x432   : > { %v3379_v58 = vpop.f32.mrf.mxu2 }
 0x433   : > { %v9858_v2 = vadd.f32 %v3379_v58, %v2845_v10  ;;  %v1871_v27 = vmax.f32 %v1720_v56, 0.0  ;;  %v8112_v58 = vld [vmem:[%s11445_s13 + $0x44] sm:$0xf0] }
 0x434   : > { %v7253_v56 = vor.u32 %v8112_v58, %v7252_v9  ;;  %v8057_v9 = vld [vmem:[%s8650_s0 + $0x1d8] sm:$0xff] }
 0x435   : > { %v2860_v54 = vpop.f32.mrf.mxu1 }
 0x436   : > { %6914 = vmatmul.msk.bf16.gmra.mxu1 %vm2404_vm3, %v8056_v51  ;;  %4808 = vmatpush.bf16.msrb.mxu2 %v7253_v56 }
 0x438   : > { %v1721_v33 = vpop.f32.mrf.mxu0 }
 0x439   : > { %v1722_v11 = vadd.f32 %v9667_v61, %v1721_v33 }
 0x43a   : > { %v3381_v43 = vpop.f32.mrf.mxu2 }
 0x43b   : > { %v1872_v55 = vmax.f32 %v1722_v11, 0.0  ;;  %v9864_v38 = vadd.f32 %v3381_v43, %v2847_v6  ;;  %v11594_v43 = vmax.f32 %v9600_v30, %v9743_v14 }
 0x43d   : > { %v1943_v57 = vpack.c.bf16 %v1872_v55, %v1871_v27  ;;  %v2862_v11 = vpop.f32.mrf.mxu1 }
 0x43f   : > { %6984 = vmatmul.msk.bf16.gmra.mxu2 %vm2942_vm4, %v1943_v57 }
 0x440   : > { %v1724_v6 = vpop.f32.mrf.mxu0 }
 0x441   : > { %v1725_v57 = vadd.f32 %v9667_v61, %v1724_v6 }
 0x442   : > { %v3384_v33 = vpop.f32.mrf.mxu2 }
 0x443   : > { %v3385_v55 = vadd.f32 %v3384_v33, %v2850_v31  ;;  %v1873_v47 = vmax.f32 %v1725_v57, 0.0  ;;  %v11595_v31 = vmax.f32 %v9609_v18, %v9750_v41  ;;  %v8058_v57 = vld [vmem:[%s8650_s0 + $0x1e0] sm:$0xff] }
 0x445   : > { %v9880_v27 = vmax.f32 %v11594_v43, %v3385_v55  ;;  %v2865_v17 = vpop.f32.mrf.mxu1 }
 0x446   : > { %6915 = vmatmul.msk.bf16.gmra.mxu1 %vm2404_vm3, %v8057_v9 }
 0x448   : > { %v1726_v51 = vpop.f32.mrf.mxu0 }
 0x449   : > { %v1727_v10 = vadd.f32 %v9667_v61, %v1726_v51 }
 0x44a   : > { %v3386_v12 = vpop.f32.mrf.mxu2 }
 0x44b   : > { %v1874_v60 = vmax.f32 %v1727_v10, 0.0  ;;  %v3387_v44 = vadd.f32 %v3386_v12, %v2852_v39  ;;  %v11596_v39 = vmax.f32 %v9618_v50, %v9763_v15 }
 0x44d   : > { %v1944_v58 = vpack.c.bf16 %v1874_v60, %v1873_v47  ;;  %v9888_v56 = vmax.f32 %v11595_v31, %v3387_v44  ;;  %v2867_v33 = vpop.f32.mrf.mxu1 }
 0x44f   : > { %6985 = vmatmul.msk.bf16.gmra.mxu2 %vm2942_vm4, %v1944_v58 }
 0x450   : > { %v1729_v30 = vpop.f32.mrf.mxu0 }
 0x451   : > { %v1730_v60 = vadd.f32 %v9667_v61, %v1729_v30 }
 0x452   : > { %v3389_v14 = vpop.f32.mrf.mxu2 }
 0x453   : > { %v3390_v6 = vadd.f32 %v3389_v14, %v2855_v53  ;;  %v1875_v18 = vmax.f32 %v1730_v60, 0.0  ;;  %v11597_v53 = vmax.f32 %v9624_v62, %v9770_v63 }
 0x455   : > { %v9895_v12 = vmax.f32 %v11596_v39, %v3390_v6  ;;  %v2870_v43 = vpop.f32.mrf.mxu1 }
 0x456   : > { %6916 = vmatmul.msk.bf16.gmra.mxu1 %vm2404_vm3, %v8058_v57 }
 0x458   : > { %v1731_v47 = vpop.f32.mrf.mxu0 }
 0x459   : > { %v1732_v41 = vadd.f32 %v9667_v61, %v1731_v47 }
 0x45a   : > { %v3391_v44 = vpop.f32.mrf.mxu2 }
 0x45b   : > { %v1876_v10 = vmax.f32 %v1732_v41, 0.0  ;;  %v3392_v55 = vadd.f32 %v3391_v44, %v2857_v48  ;;  %v11598_v48 = vmax.f32 %v9633_v23, %v9778_v49  ;;  %v8059_v44 = vld [vmem:[%s8650_s0 + $0x1e8] sm:$0xff] }
 0x45d   : > { %v1945_v51 = vpack.c.bf16 %v1876_v10, %v1875_v18  ;;  %v9903_v9 = vmax.f32 %v11597_v53, %v3392_v55  ;;  %v9907_v31 = vpop.f32.mrf.mxu1 }
 0x45f   : > { %6986 = vmatmul.msk.bf16.gmra.mxu2 %vm2942_vm4, %v1945_v51 }
 0x460   : > { %v1734_v50 = vpop.f32.mrf.mxu0 }
 0x461   : > { %v1735_v14 = vadd.f32 %v9667_v61, %v1734_v50 }
 0x462   : > { %v3394_v15 = vpop.f32.mrf.mxu2 }
 0x463   : > { %v3395_v58 = vadd.f32 %v3394_v15, %v2860_v54  ;;  %v1877_v39 = vmax.f32 %v1735_v14, 0.0  ;;  %v11599_v54 = vmax.f32 %v9638_v59, %v9785_v35  ;;  %v8060_v14 = vld [vmem:[%s8650_s0 + $0x1f0] sm:$0xff] }
 0x465   : > { %v9912_v30 = vmax.f32 %v11598_v48, %v3395_v58  ;;  %v2875_v41 = vpop.f32.mrf.mxu1 }
 0x466   : > { %6917 = vmatmul.msk.bf16.gmra.mxu1 %vm2404_vm3, %v8059_v44 }
 0x468   : > { %v1736_v62 = vpop.f32.mrf.mxu0 }
 0x469   : > { %v1737_v63 = vadd.f32 %v9667_v61, %v1736_v62 }
 0x46a   : > { %v3396_v6 = vpop.f32.mrf.mxu2 }
 0x46b   : > { %v1878_v60 = vmax.f32 %v1737_v63, 0.0  ;;  %v3397_v47 = vadd.f32 %v3396_v6, %v2862_v11  ;;  %v11600_v11 = vmax.f32 %v9646_v42, %v9793_v22  ;;  %v11601_v63 = vmax.f32 %v9652_v45, %v9800_v34 }
 0x46d   : > { %v1946_v18 = vpack.c.bf16 %v1878_v60, %v1877_v39  ;;  %v9920_v10 = vmax.f32 %v11599_v54, %v3397_v47  ;;  %v9924_v57 = vpop.f32.mrf.mxu1  ;;  %v11602_v60 = vmax.f32 %v9661_v16, %v9808_v13  ;;  %v8090_v16 = vld [vmem:[%s11529_s11 + $0x24] sm:$0xf]  ;;  %v7168_v13 = vld [vmem:[%s11529_s11 + $0x28] sm:$0xf0] }
 0x46f   : > { %6987 = vmatmul.msk.bf16.gmra.mxu2 %vm2942_vm4, %v1946_v18 }
 0x470   : > { %v1739_v23 = vpop.f32.mrf.mxu0 }
 0x471   : > { %v1740_v53 = vadd.f32 %v9667_v61, %v1739_v23 }
 0x472   : > { %v3399_v49 = vpop.f32.mrf.mxu2 }
 0x473   : > { %v3400_v55 = vadd.f32 %v3399_v49, %v2865_v17  ;;  %v1879_v15 = vmax.f32 %v1740_v53, 0.0  ;;  %v8061_v49 = vld [vmem:[%s8650_s0 + $0x1f8] sm:$0xff] }
 0x475   : > { %v9929_v51 = vmax.f32 %v11600_v11, %v3400_v55  ;;  %v2880_v62 = vpop.f32.mrf.mxu1 }
 0x476   : > { %6918 = vmatmul.msk.bf16.gmra.mxu1 %vm2404_vm3, %v8060_v14 }
 0x478   : > { %v1741_v59 = vpop.f32.mrf.mxu0 }
 0x479   : > { %v1742_v35 = vadd.f32 %v9667_v61, %v1741_v59 }
 0x47a   : > { %v3401_v50 = vpop.f32.mrf.mxu2 }
 0x47b   : > { %v1880_v58 = vmax.f32 %v1742_v35, 0.0  ;;  %v3402_v48 = vadd.f32 %v3401_v50, %v2867_v33  ;;  %v11603_v50 = vmax.f32 %v9687_v40, %v9829_v3  ;;  %v11604_v3 = vmax.f32 %v9703_v21, %v9844_v29 }
 0x47c   : > { %v11605_v21 = vmax.f32 %v9719_v8, %v9858_v2 }
 0x47d   : > { %v1947_v17 = vpack.c.bf16 %v1880_v58, %v1879_v15  ;;  %v9937_v6 = vmax.f32 %v11601_v63, %v3402_v48  ;;  %v9946_v47 = vpop.f32.mrf.mxu1 }
 0x47f   : > { %6988 = vmatmul.msk.bf16.gmra.mxu2 %vm2942_vm4, %v1947_v17 }
 0x480   : > { %v1744_v42 = vpop.f32.mrf.mxu0 }
 0x481   : > { %v1745_v44 = vadd.f32 %v9667_v61, %v1744_v42 }
 0x482   : > { %v3404_v22 = vpop.f32.mrf.mxu2 }
 0x483   : > { %v3405_v39 = vadd.f32 %v3404_v22, %v2870_v43  ;;  %v1881_v54 = vmax.f32 %v1745_v44, 0.0  ;;  %v7171_v43 = vor.u32 %v8090_v16, %v7168_v13 }
 0x485   : > { %v9944_v33 = vmax.f32 %v11602_v60, %v3405_v39  ;;  %v2885_v53 = vpop.f32.mrf.mxu1  ;;  %4513 = vmatpush.bf16.msrb.mxu0 %v7171_v43 }
 0x486   : > { %6919 = vmatmul.msk.bf16.gmra.mxu1 %vm2404_vm3, %v8061_v49 }
 0x488   : > { %v1746_v18 = vpop.f32.mrf.mxu0 }
 0x489   : > { %v1747_v45 = vadd.f32 %v9667_v61, %v1746_v18 }
 0x48a   : > { %v9950_v34 = vpop.f32.mrf.mxu2 }
 0x48b   : > { %v1882_v23 = vmax.f32 %v1747_v45, 0.0 }
 0x48d   : > { %v1948_v55 = vpack.c.bf16 %v1882_v23, %v1881_v54  ;;  %v9970_v63 = vpop.f32.mrf.mxu1 }
 0x48f   : > { %6989 = vmatmul.msk.bf16.gmra.mxu2 %vm2942_vm4, %v1948_v55 }
 0x490   : > { %v1749_v11 = vpop.f32.mrf.mxu0 }
 0x491   : > { %v1750_v58 = vadd.f32 %v9667_v61, %v1749_v11 }
 0x492   : > { %v3409_v59 = vpop.f32.mrf.mxu2 }
 0x493   : > { %v3410_v35 = vadd.f32 %v3409_v59, %v2875_v41  ;;  %v1883_v42 = vmax.f32 %v1750_v58, 0.0 }
 0x495   : > { %v9964_v15 = vmax.f32 %v11603_v50, %v3410_v35  ;;  %v2890_v40 = vpop.f32.mrf.mxu1 }
 0x498   : > { %v1751_v48 = vpop.f32.mrf.mxu0 }
 0x499   : > { %v1752_v14 = vadd.f32 %v9667_v61, %v1751_v48  ;;  %v7244_v48 = vld [vmem:[%s11445_s13 + $0x30] sm:$0xf] }
 0x49a   : > { %v9968_v17 = vpop.f32.mrf.mxu2 }
 0x49b   : > { %v1884_v22 = vmax.f32 %v1752_v14, 0.0  ;;  %v8110_v14 = vld [vmem:[%s11445_s13 + $0x34] sm:$0xf0] }
 0x49d   : > { %v1949_v39 = vpack.c.bf16 %v1884_v22, %v1883_v42  ;;  %v2892_v43 = vpop.f32.mrf.mxu1  ;;  %v11606_v42 = vld [vmem:[#allocation27_spill] sm:$0xff] }
 0x49f   : > { %6990 = vmatmul.msk.bf16.gmra.mxu2 %vm2942_vm4, %v1949_v39 }
 0x4a0   : > { %v1754_v41 = vpop.f32.mrf.mxu0 }
 0x4a1   : > { %v1755_v45 = vadd.f32 %v9667_v61, %v1754_v41 }
 0x4a2   : > { %v3414_v60 = vpop.f32.mrf.mxu2 }
 0x4a3   : > { %v3415_v44 = vadd.f32 %v3414_v60, %v2880_v62  ;;  %v1885_v55 = vmax.f32 %v1755_v45, 0.0 }
 0x4a5   : > { %v9976_v18 = vmax.f32 %v11604_v3, %v3415_v44  ;;  %v2895_v59 = vpop.f32.mrf.mxu1  ;;  %v10002_v44 = vld [vmem:[%s11562_s8] ss:$0 sm:$0xff]  ;;  %v11607_v3 = vld [vmem:[#allocation28_spill] sm:$0xff]  ;;  %s11656_s8 = sshll.u32 %s10689_s4, 5 }
 0x4a6   : > { %s10793_s25 = scalar_lea.vmem [#allocation2], %s11656_s8 }
 0x4a7   : > { %s6142_s7 = sshll.u32 %s10793_s25, 4  ;;  %s6143_s7 = int_to_ptr.vmem [resolvable:$true] %s6142_s7 }
 0x4a8   : > { %v1756_v54 = vpop.f32.mrf.mxu0 }
 0x4a9   : > { %v1757_v23 = vadd.f32 %v9667_v61, %v1756_v54 }
 0x4aa   : > { %v9980_v49 = vpop.f32.mrf.mxu2 }
 0x4ab   : > { %v1886_v16 = vmax.f32 %v1757_v23, 0.0 }
 0x4ad   : > { %v1950_v13 = vpack.c.bf16 %v1886_v16, %v1885_v55  ;;  %v2897_v61 = vpop.f32.mrf.mxu1 }
 0x4af   : > { %6991 = vmatmul.msk.bf16.gmra.mxu2 %vm2942_vm4, %v1950_v13 }
 0x4b2   : > { %v3419_v62 = vpop.f32.mrf.mxu2 }
 0x4b3   : > { %v3420_v11 = vadd.f32 %v3419_v62, %v2885_v53  ;;  %v7245_v53 = vor.u32 %v8110_v14, %v7244_v48  ;;  %v11609_v14 = vld [vmem:[#allocation30_spill] sm:$0xff] }
 0x4b5   : > { %v9986_v29 = vmax.f32 %v11605_v21, %v3420_v11  ;;  %4809 = vmatpush.bf16.msrb.mxu2 %v7245_v53  ;;  %v2900_v41 = vpop.f32.mrf.mxu1  ;;  %v11608_v11 = vld [vmem:[#allocation29_spill] sm:$0xff] }
 0x4ba   : > { %v9988_v35 = vpop.f32.mrf.mxu2 }
 0x4c2   : > { %v3424_v50 = vpop.f32.mrf.mxu2 }
 0x4c3   : > { %v3425_v58 = vadd.f32 %v3424_v50, %v2890_v40 }
 0x4c5   : > { %v3544_v8 = vmax.f32 %v9880_v27, %v3425_v58 }
 0x4c7   : > { %v3825_v22 = vsub.f32 %v3544_v8, %v11606_v42 }
 0x4c9   : > { %v3861_v40 = vadd.f32 %v10002_v44, %v3825_v22 }
 0x4ca   : > { %v3426_v2 = vpop.f32.mrf.mxu2 }
 0x4cb   : > { %v3427_v39 = vadd.f32 %v3426_v2, %v2892_v43  ;;  %v3893_v27 = vmax.f32 %v3861_v40, 0.0  ;;  %v2902_v43 = vpop.f32.mrf.mxu1 }
 0x4cd   : > { %v3545_v60 = vmax.f32 %v9888_v56, %v3427_v39 }
 0x4cf   : > { %v3826_v45 = vsub.f32 %v3545_v60, %v11607_v3  ;;  %v11610_v3 = vld [vmem:[#allocation31_spill] sm:$0xff] }
 0x4d1   : > { %v3862_v54 = vadd.f32 %v10002_v44, %v3826_v45 }
 0x4d2   : > { %v3429_v23 = vpop.f32.mrf.mxu2 }
 0x4d3   : > { %v3894_v55 = vmax.f32 %v3862_v54, 0.0  ;;  %v3430_v16 = vadd.f32 %v3429_v23, %v2895_v59  ;;  %v2905_v8 = vpop.f32.mrf.mxu1 }
 0x4d5   : > { %v3917_v13 = vpack.c.bf16 %v3894_v55, %v3893_v27  ;;  %v3546_v62 = vmax.f32 %v9895_v12, %v3430_v16  ;;  %v11611_v27 = vld [vmem:[#allocation32_spill] sm:$0xff] }
 0x4d7   : > { %7112 = vmatmul.msk.bf16.gmra.mxu3 %vm4050_vm5, %v3917_v13  ;;  %v3827_v21 = vsub.f32 %v3546_v62, %v11608_v11 }
 0x4d9   : > { %v3863_v48 = vadd.f32 %v10002_v44, %v3827_v21 }
 0x4da   : > { %v3431_v56 = vpop.f32.mrf.mxu2 }
 0x4db   : > { %v3432_v50 = vadd.f32 %v3431_v56, %v2897_v61  ;;  %v3895_v42 = vmax.f32 %v3863_v48, 0.0  ;;  %v2907_v61 = vpop.f32.mrf.mxu1 }
 0x4dd   : > { %v3547_v58 = vmax.f32 %v9903_v9, %v3432_v50 }
 0x4df   : > { %v3828_v53 = vsub.f32 %v3547_v58, %v11609_v14 }
 0x4e1   : > { %v3864_v2 = vadd.f32 %v10002_v44, %v3828_v53 }
 0x4e2   : > { %v3434_v59 = vpop.f32.mrf.mxu2 }
 0x4e3   : > { %v3896_v22 = vmax.f32 %v3864_v2, 0.0  ;;  %v3435_v39 = vadd.f32 %v3434_v59, %v2900_v41  ;;  %v11613_v2 = vld [vmem:[#allocation34_spill] sm:$0xff] }
 0x4e5   : > { %v3918_v12 = vpack.c.bf16 %v3896_v22, %v3895_v42  ;;  %v3548_v60 = vmax.f32 %v9912_v30, %v3435_v39  ;;  %v2910_v30 = vpop.f32.mrf.mxu1 }
 0x4e7   : > { %7113 = vmatmul.msk.bf16.gmra.mxu3 %vm4050_vm5, %v3918_v12  ;;  %v3829_v9 = vsub.f32 %v3548_v60, %v11610_v3  ;;  %v3407_v60 = vadd.f32 %v9950_v34, %v9907_v31  ;;  %v11614_v3 = vmax.f32 %v9672_v52, %v9815_v32  ;;  %v8088_v52 = vld [vmem:[%s11529_s11 + $0x14] sm:$0xf]  ;;  %v7160_v32 = vld [vmem:[%s11529_s11 + $0x18] sm:$0xf0] }
 0x4e9   : > { %v3865_v23 = vadd.f32 %v10002_v44, %v3829_v9  ;;  %v3521_v9 = vmax.f32 %v11614_v3, %v3407_v60  ;;  %v11621_v3 = vld [vmem:[#allocation39_spill] sm:$0xff] }
 0x4ea   : > { %v3436_v40 = vpop.f32.mrf.mxu2 }
 0x4eb   : > { %v3437_v45 = vadd.f32 %v3436_v40, %v2902_v43  ;;  %v3897_v41 = vmax.f32 %v3865_v23, 0.0  ;;  %v11612_v43 = vld [vmem:[#allocation33_spill] sm:$0xff] }
 0x4ed   : > { %v3549_v54 = vmax.f32 %v9920_v10, %v3437_v45  ;;  %v2912_v14 = vpop.f32.mrf.mxu1  ;;  %v11615_v45 = vld [vmem:[#allocation35_spill] sm:$0xff] }
 0x4ef   : > { %v3830_v55 = vsub.f32 %v3549_v54, %v11611_v27 }
 0x4f1   : > { %v3866_v16 = vadd.f32 %v10002_v44, %v3830_v55 }
 0x4f2   : > { %v3439_v13 = vpop.f32.mrf.mxu2 }
 0x4f3   : > { %v3898_v62 = vmax.f32 %v3866_v16, 0.0  ;;  %v3440_v56 = vadd.f32 %v3439_v13, %v2905_v8  ;;  %v11616_v16 = vld [vmem:[#allocation36_spill] sm:$0xff] }
 0x4f5   : > { %v3919_v11 = vpack.c.bf16 %v3898_v62, %v3897_v41  ;;  %v3550_v21 = vmax.f32 %v9929_v51, %v3440_v56 }
 0x4f7   : > { %7114 = vmatmul.msk.bf16.gmra.mxu3 %vm4050_vm5, %v3919_v11  ;;  %v3831_v58 = vsub.f32 %v3550_v21, %v11612_v43  ;;  %v3412_v21 = vadd.f32 %v9968_v17, %v9924_v57 }
 0x4f9   : > { %v3867_v53 = vadd.f32 %v10002_v44, %v3831_v58  ;;  %v11617_v58 = vmax.f32 %v9692_v28, %v9836_v46  ;;  %v3417_v46 = vadd.f32 %v9980_v49, %v9946_v47 }
 0x4fa   : > { %v3441_v50 = vpop.f32.mrf.mxu2 }
 0x4fb   : > { %v3442_v10 = vadd.f32 %v3441_v50, %v2907_v61  ;;  %v3899_v22 = vmax.f32 %v3867_v53, 0.0 }
 0x4fd   : > { %v3551_v48 = vmax.f32 %v9937_v6, %v3442_v10  ;;  %v2915_v6 = vpop.f32.mrf.mxu1  ;;  %v3523_v10 = vmax.f32 %v11617_v58, %v3412_v21 }
 0x4ff   : > { %v3832_v59 = vsub.f32 %v3551_v48, %v11613_v2  ;;  %v11618_v48 = vld [vmem:[#allocation37_spill] sm:$0xff] }
 0x501   : > { %v3868_v42 = vadd.f32 %v10002_v44, %v3832_v59 }
 0x502   : > { %v3444_v8 = vpop.f32.mrf.mxu2 }
 0x503   : > { %v3900_v39 = vmax.f32 %v3868_v42, 0.0  ;;  %v3445_v12 = vadd.f32 %v3444_v8, %v2910_v30  ;;  %v7163_v30 = vor.u32 %v8088_v52, %v7160_v32  ;;  %v11619_v8 = vld [vmem:[#allocation38_spill] sm:$0xff]  ;;  %v11624_v52 = vld [vmem:[#allocation41_spill] sm:$0xff] }
 0x505   : > { %v3920_v51 = vpack.c.bf16 %v3900_v39, %v3899_v22  ;;  %v3552_v40 = vmax.f32 %v9944_v33, %v3445_v12  ;;  %v2917_v34 = vpop.f32.mrf.mxu1  ;;  %4514 = vmatpush.bf16.msrb.mxu0 %v7163_v30 }
 0x507   : > { %7115 = vmatmul.msk.bf16.gmra.mxu3 %vm4050_vm5, %v3920_v51  ;;  %v3833_v54 = vsub.f32 %v3552_v40, %v11615_v45 }
 0x509   : > { %v3869_v55 = vadd.f32 %v10002_v44, %v3833_v54 }
 0x50a   : > { %v3446_v61 = vpop.f32.mrf.mxu2 }
 0x50b   : > { %v3447_v23 = vadd.f32 %v3446_v61, %v2912_v14  ;;  %v3901_v41 = vmax.f32 %v3869_v55, 0.0 }
 0x50d   : > { %v3553_v27 = vmax.f32 %v3521_v9, %v3447_v23  ;;  %v2920_v2 = vpop.f32.mrf.mxu1 }
 0x50f   : > { %v3834_v13 = vsub.f32 %v3553_v27, %v11616_v16  ;;  %v11622_v27 = vld [vmem:[#allocation40_spill] sm:$0xff] }
 0x511   : > { %v3870_v31 = vadd.f32 %v10002_v44, %v3834_v13 }
 0x512   : > { %v3449_v33 = vpop.f32.mrf.mxu2 }
 0x513   : > { %v3902_v62 = vmax.f32 %v3870_v31, 0.0  ;;  %v3450_v56 = vadd.f32 %v3449_v33, %v2915_v6  ;;  %v11620_v6 = vmax.f32 %v9708_v1, %v9851_v0  ;;  %v3422_v1 = vadd.f32 %v9988_v35, %v9970_v63  ;;  %v8108_v63 = vld [vmem:[%s11445_s13 + $0x24] sm:$0xf0] }
 0x515   : > { %v3921_v11 = vpack.c.bf16 %v3902_v62, %v3901_v41  ;;  %v3554_v50 = vmax.f32 %v9964_v15, %v3450_v56  ;;  %v2922_v60 = vpop.f32.mrf.mxu1  ;;  %v3525_v61 = vmax.f32 %v11620_v6, %v3417_v46  ;;  %v11623_v62 = vmax.f32 %v9724_v36, %v9864_v38  ;;  %v11625_v38 = vld [vmem:[#allocation42_spill] sm:$0xff] }
 0x516   : > { %v10114_v6 = vld [vmem:[%s8650_s0 + $0x108] sm:$0xff] }
 0x517   : > { %7116 = vmatmul.msk.bf16.gmra.mxu3 %vm4050_vm5, %v3921_v11  ;;  %v3835_v14 = vsub.f32 %v3554_v50, %v11618_v48  ;;  %v3527_v56 = vmax.f32 %v11623_v62, %v3422_v1  ;;  %v7236_v11 = vld [vmem:[%s11445_s13 + $0x20] sm:$0xf]  ;;  %v10085_v48 = vpop.f32.mrf.mxu3  ;;  %v8101_v62 = vld [vmem:[%s11529_s11 + $0x74] sm:$0xf0] }
 0x519   : > { %v3871_v42 = vadd.f32 %v10002_v44, %v3835_v14  ;;  %v10088_v14 = vld [vmem:[%s8650_s0] sm:$0xff] }
 0x51a   : > { %v3451_v43 = vpop.f32.mrf.mxu2 }
 0x51b   : > { %v3452_v53 = vadd.f32 %v3451_v43, %v2917_v34  ;;  %v3903_v15 = vmax.f32 %v3871_v42, 0.0 }
 0x51d   : > { %v3555_v59 = vmax.f32 %v3523_v10, %v3452_v53  ;;  %v2925_v16 = vpop.f32.mrf.mxu1 }
 0x51f   : > { %v3836_v22 = vsub.f32 %v3555_v59, %v11619_v8  ;;  %v10093_v59 = vld [vmem:[%s8650_s0 + $0x8] sm:$0xff]  ;;  %v8342_v8 = vld [vmem:[%s11534_s10] sm:$0xff] }
 0x521   : > { %v3872_v57 = vadd.f32 %v10002_v44, %v3836_v22  ;;  %v4332_v22 = vunpack.c.h.b16 %v8342_v8  ;;  %v7182_v8 = vld [vmem:[%s11529_s11 + $0x40] sm:$0xf] }
 0x522   : > { %v3454_v17 = vpop.f32.mrf.mxu2 }
 0x523   : > { %v3904_v39 = vmax.f32 %v3872_v57, 0.0  ;;  %v3455_v12 = vadd.f32 %v3454_v17, %v2920_v2  ;;  %v10101_v57 = vld [vmem:[%s8650_s0 + $0x100] sm:$0xff]  ;;  %v4334_v17 = vpack.c.b16 %v4332_v22, %v4332_v22  ;;  %v8095_v22 = vld [vmem:[%s11529_s11 + $0x44] sm:$0xf0] }
 0x525   : > { %v3922_v51 = vpack.c.bf16 %v3904_v39, %v3903_v15  ;;  %v3556_v28 = vmax.f32 %v9976_v18, %v3455_v12  ;;  %v2927_v33 = vpop.f32.mrf.mxu1  ;;  %v10106_v15 = vsel %vm2597_vm2, %v4334_v17, 0  ;;  %v7183_v17 = vor.u32 %v8095_v22, %v7182_v8  ;;  %v11649_v22 = vld [vmem:[#allocation50_spill] sm:$0xff] }
 0x527   : > { %7117 = vmatmul.msk.bf16.gmra.mxu3 %vm4050_vm5, %v3922_v51  ;;  %v3837_v9 = vsub.f32 %v3556_v28, %v11621_v3 }
 0x529   : > { %v3873_v23 = vadd.f32 %v10002_v44, %v3837_v9 }
 0x52a   : > { %v3456_v40 = vpop.f32.mrf.mxu2 }
 0x52b   : > { %v3457_v45 = vadd.f32 %v3456_v40, %v2922_v60  ;;  %v3905_v18 = vmax.f32 %v3873_v23, 0.0 }
 0x52d   : > { %v3557_v54 = vmax.f32 %v3525_v61, %v3457_v45 }
 0x52f   : > { %v3838_v55 = vsub.f32 %v3557_v54, %v11622_v27 }
 0x531   : > { %v3874_v47 = vadd.f32 %v10002_v44, %v3838_v55 }
 0x532   : > { %v3459_v49 = vpop.f32.mrf.mxu2 }
 0x533   : > { %v3906_v13 = vmax.f32 %v3874_v47, 0.0  ;;  %v3460_v31 = vadd.f32 %v3459_v49, %v2925_v16  ;;  %v11626_v49 = vld [vmem:[#allocation14_spill] sm:$0xff] }
 0x535   : > { %v3923_v34 = vpack.c.bf16 %v3906_v13, %v3905_v18  ;;  %v3558_v0 = vmax.f32 %v9986_v29, %v3460_v31  ;;  %v7237_v29 = vor.u32 %v8108_v63, %v7236_v11  ;;  %v11627_v31 = vld [vmem:[#allocation15_spill] sm:$0xff]  ;;  %v7198_v63 = vld [vmem:[%s11529_s11 + $0x60] sm:$0xf] }
 0x537   : > { %7118 = vmatmul.msk.bf16.gmra.mxu3 %vm4050_vm5, %v3923_v34  ;;  %v3839_v32 = vsub.f32 %v3558_v0, %v11624_v52  ;;  %4810 = vmatpush.bf16.msrb.mxu2 %v7237_v29  ;;  %v11628_v0 = vld [vmem:[#allocation16_spill] sm:$0xff]  ;;  %v8099_v29 = vld [vmem:[%s11529_s11 + $0x64] sm:$0xf0] }
 0x539   : > { %v3875_v21 = vadd.f32 %v10002_v44, %v3839_v32  ;;  %v11629_v32 = vld [vmem:[#allocation17_spill] sm:$0xff] }
 0x53a   : > { %v3461_v41 = vpop.f32.mrf.mxu2 }
 0x53b   : > { %v3462_v30 = vadd.f32 %v3461_v41, %v2927_v33  ;;  %v3907_v43 = vmax.f32 %v3875_v21, 0.0  ;;  %v7199_v21 = vor.u32 %v8099_v29, %v7198_v63  ;;  %v11643_v29 = vld [vmem:[#allocation46_spill] sm:$0xff] }
 0x53d   : > { %v3559_v35 = vmax.f32 %v3527_v56, %v3462_v30 }
 0x53f   : > { %v3840_v36 = vsub.f32 %v3559_v35, %v11625_v38  ;;  %v7228_v35 = vld [vmem:[%s11445_s13 + $0x10] sm:$0xf]  ;;  %v8106_v38 = vld [vmem:[%s11445_s13 + $0x14] sm:$0xf0] }
 0x541   : > { %v3876_v50 = vadd.f32 %v10002_v44, %v3840_v36  ;;  %v7229_v36 = vor.u32 %v8106_v38, %v7228_v35  ;;  %v11644_v35 = vld [vmem:[#allocation24_spill] sm:$0xff] }
 0x543   : > { %v3908_v58 = vmax.f32 %v3876_v50, 0.0  ;;  %4811 = vmatpush.bf16.msrb.mxu2 %v7229_v36 }
 0x545   : > { %v3924_v10 = vpack.c.bf16 %v3908_v58, %v3907_v43  ;;  %v7190_v43 = vld [vmem:[%s11529_s11 + $0x50] sm:$0xf]  ;;  %v8097_v58 = vld [vmem:[%s11529_s11 + $0x54] sm:$0xf0] }
 0x547   : > { %7119 = vmatmul.msk.bf16.gmra.mxu3 %vm4050_vm5, %v3924_v10 }
 0x557   : > { %7136 = vmatmul.msk.bf16.vlgmr.msrb.gmra.mxu3 %vm2404_vm3, %v10088_v14 }
 0x558   : > { %4377 = vmatpush.bf16.msrb.mxu3 %v10106_v15 }
 0x55a   : > { %v4148_v53 = vpop.f32.mrf.mxu3 }
 0x55b   : > { %v4149_v12 = vadd.f32 %v4148_v53, %v9379_v37  ;;  %v7191_v53 = vor.u32 %v8097_v58, %v7190_v43  ;;  %v11645_v43 = vld [vmem:[#allocation44_spill] sm:$0xff]  ;;  %v11646_v58 = vld [vmem:[#allocation22_spill] sm:$0xff] }
 0x562   : > { %v4150_v2 = vpop.f32.mrf.mxu3 }
 0x563   : > { %v4151_v28 = vadd.f32 %v4150_v2, %v9400_v26  ;;  %v7152_v26 = vld [vmem:[%s11529_s11 + $0x8] sm:$0xf0] }
 0x564   : > { %v11630_v2 = vld [vmem:[#allocation19_spill] sm:$0xff] }
 0x567   : > { %7137 = vmatmul.msk.bf16.gmra.mxu3 %vm2404_vm3, %v10093_v59 }
 0x56a   : > { %v4153_v44 = vpop.f32.mrf.mxu3 }
 0x56b   : > { %v4154_v9 = vadd.f32 %v4153_v44, %v9416_v24 }
 0x572   : > { %v4155_v42 = vpop.f32.mrf.mxu3 }
 0x573   : > { %v4156_v23 = vadd.f32 %v4155_v42, %v9431_v20 }
 0x577   : > { %7138 = vmatmul.msk.bf16.gmra.mxu3 %vm2404_vm3, %v10101_v57 }
 0x57a   : > { %v4158_v39 = vpop.f32.mrf.mxu3 }
 0x57b   : > { %v4159_v51 = vadd.f32 %v4158_v39, %v9447_v7  ;;  %v8086_v7 = vld [vmem:[%s11529_s11 + $0x4] sm:$0xf] }
 0x57d   : > { %v4192_v60 = vmax.f32 %v4149_v12, %v4159_v51  ;;  %v7174_v12 = vld [vmem:[%s11529_s11 + $0x30] sm:$0xf]  ;;  %v8093_v51 = vld [vmem:[%s11529_s11 + $0x34] sm:$0xf0] }
 0x582   : > { %v4160_v46 = vpop.f32.mrf.mxu3 }
 0x583   : > { %v4161_v40 = vadd.f32 %v4160_v46, %v9461_v19  ;;  %v7155_v19 = vor.u32 %v8086_v7, %v7152_v26  ;;  %v11631_v46 = vld [vmem:[#allocation45_spill] sm:$0xff]  ;;  %v11636_v7 = vld [vmem:[#allocation26_spill] sm:$0xff] }
 0x585   : > { %v4193_v61 = vmax.f32 %v4151_v28, %v4161_v40  ;;  %4515 = vmatpush.bf16.msrb.mxu0 %v7155_v19  ;;  %v11632_v28 = vld [vmem:[#allocation23_spill] sm:$0xff]  ;;  %v11637_v19 = vld [vmem:[#allocation49_spill] sm:$0xff] }
 0x586   : > { %v4121_v40 = vadd.f32 %v11632_v28, %v11631_v46 }
 0x587   : > { %7139 = vmatmul.msk.bf16.gmra.mxu3 %vm2404_vm3, %v10114_v6 }
 0x58a   : > { %v4163_v3 = vpop.f32.mrf.mxu3 }
 0x58b   : > { %v4164_v45 = vadd.f32 %v4163_v3, %v9475_v5  ;;  %v11633_v3 = vld [vmem:[#allocation43_spill] sm:$0xff] }
 0x58d   : > { %v4194_v37 = vmax.f32 %v4154_v9, %v4164_v45  ;;  %v11634_v9 = vld [vmem:[#allocation21_spill] sm:$0xff] }
 0x58e   : > { %v4111_v45 = vadd.f32 %v11634_v9, %v11633_v3 }
 0x590   : > { %v4189_v26 = vmax.f32 %v4111_v45, %v4121_v40  ;;  %v7150_v40 = vld [vmem:[%s11529_s11] sm:$0xf] }
 0x592   : > { %v4165_v54 = vpop.f32.mrf.mxu3 }
 0x593   : > { %v4166_v27 = vadd.f32 %v4165_v54, %v9492_v4  ;;  %v11638_v54 = vld [vmem:[#allocation54_spill] sm:$0xff] }
 0x595   : > { %v4195_v55 = vmax.f32 %v4156_v23, %v4166_v27  ;;  %v4141_v23 = vadd.f32 %v11638_v54, %v11637_v19 }
 0x597   : > { %7140 = vmatmul.msk.bf16.vlgmr.msra.gmra.mxu3 %vm2404_vm3, %v10088_v14 }
 0x59a   : > { %v4168_v24 = vpop.f32.mrf.mxu3 }
 0x59b   : > { %v4169_v5 = vadd.f32 %v4168_v24, %v9503_v25  ;;  %v7206_v25 = vld [vmem:[%s11529_s11 + $0x70] sm:$0xf]  ;;  %v11640_v24 = vld [vmem:[#allocation53_spill] sm:$0xff] }
 0x59c   : > { %v7207_v56 = vor.u32 %v8101_v62, %v7206_v25 }
 0x59d   : > { %v10131_v16 = vmax.f32 %v4192_v60, %v4169_v5  ;;  %v7175_v60 = vor.u32 %v8093_v51, %v7174_v12  ;;  %v11650_v51 = vld [vmem:[#allocation51_spill] sm:$0xff] }
 0x59e   : > { %4479 = vmatpush.bf16.msra.mxu3 %v7207_v56 }
 0x5a2   : > { %v4170_v47 = vpop.f32.mrf.mxu3  ;;  %4480 = vmatpush.bf16.msra.mxu3 %v7199_v21  ;;  %v4126_v21 = vadd.f32 %v11644_v35, %v11643_v29 }
 0x5a3   : > { %v4171_v18 = vadd.f32 %v4170_v47, %v11626_v49  ;;  %v8331_v49 = vld [vmem:[%s11642_s9] ss:$0 sm:$0xff] }
 0x5a5   : > { %v10134_v13 = vmax.f32 %v4193_v61, %v4171_v18  ;;  %v7166_v18 = vld [vmem:[%s11529_s11 + $0x20] sm:$0xf] }
 0x5a6   : > { %4481 = vmatpush.bf16.msra.mxu3 %v7191_v53  ;;  %v11647_v53 = vld [vmem:[#allocation48_spill] sm:$0xff] }
 0x5a7   : > { %7141 = vmatmul.msk.bf16.gmra.mxu3 %vm2404_vm3, %v10093_v59 }
 0x5aa   : > { %v4173_v20 = vpop.f32.mrf.mxu3  ;;  %4482 = vmatpush.bf16.msra.mxu3 %v7183_v17  ;;  %v4146_v17 = vadd.f32 %v10085_v48, %v11649_v22 }
 0x5ab   : > { %v4174_v4 = vadd.f32 %v4173_v20, %v11627_v31  ;;  %v8091_v20 = vld [vmem:[%s11529_s11 + $0x24] sm:$0xf0] }
 0x5ac   : > { %v7167_v31 = vor.u32 %v8091_v20, %v7166_v18 }
 0x5ad   : > { %v10139_v34 = vmax.f32 %v4194_v37, %v4174_v4  ;;  %v11635_v37 = vld [vmem:[#allocation47_spill] sm:$0xff] }
 0x5ae   : > { %4483 = vmatpush.bf16.msra.mxu3 %v7175_v60  ;;  %v11651_v60 = vld [vmem:[#allocation55_spill] sm:$0xff] }
 0x5af   : > { %v11652_v46 = vmax.f32 %v11650_v51, %v11651_v60 }
 0x5b2   : > { %v4175_v1 = vpop.f32.mrf.mxu3  ;;  %4484 = vmatpush.bf16.msra.mxu3 %v7167_v31 }
 0x5b3   : > { %v4176_v33 = vadd.f32 %v4175_v1, %v11628_v0 }
 0x5b5   : > { %v10142_v41 = vmax.f32 %v4195_v55, %v4176_v33  ;;  %v11639_v55 = vld [vmem:[#allocation25_spill] sm:$0xff] }
 0x5b6   : > { %v11641_v5 = vmax.f32 %v11639_v55, %v11640_v24 }
 0x5b7   : > { %7142 = vmatmul.msk.bf16.gmra.mxu3 %vm2404_vm3, %v10101_v57 }
 0x5ba   : > { %v4178_v52 = vpop.f32.mrf.mxu3 }
 0x5bb   : > { %v10153_v30 = vadd.f32 %v4178_v52, %v11629_v32  ;;  %v7158_v52 = vld [vmem:[%s11529_s11 + $0x10] sm:$0xf]  ;;  %v8089_v32 = vld [vmem:[%s11529_s11 + $0x14] sm:$0xf0] }
 0x5bc   : > { %v7159_v63 = vor.u32 %v8089_v32, %v7158_v52 }
 0x5bd   : > { %v4208_v11 = vmax.f32 %v10131_v16, %v10153_v30 }
 0x5be   : > { %4485 = vmatpush.bf16.msra.mxu3 %v7159_v63  ;;  %v8104_v63 = vld [vmem:[%s11445_s13 + $0x4] sm:$0xf0] }
 0x5c2   : > { %v10169_v50 = vpop.f32.mrf.mxu3 }
 0x5c7   : > { %7143 = vmatmul.msk.bf16.gmra.mxu3 %vm2404_vm3, %v10114_v6 }
 0x5ca   : > { %v4183_v10 = vpop.f32.mrf.mxu3 }
 0x5cb   : > { %v10180_v44 = vadd.f32 %v4183_v10, %v11630_v2  ;;  %v4116_v10 = vadd.f32 %v11646_v58, %v11645_v43 }
 0x5cd   : > { %v4210_v42 = vmax.f32 %v10139_v34, %v10180_v44  ;;  %v4191_v8 = vmax.f32 %v4116_v10, %v4126_v21 }
 0x5d2   : > { %v10190_v39 = vpop.f32.mrf.mxu3 }
 0x5d7   : > { %7144 = vmatmul.msk.bf16.vlgmr.msrb.gmra.mxu3 %vm2404_vm3, %v10088_v14  ;;  %v4131_v14 = vadd.f32 %v11636_v7, %v11635_v37 }
 0x5d9   : > { %v4197_v27 = vmax.f32 %v4189_v26, %v4131_v14 }
 0x5da   : > { %v4261_v61 = vpop.f32.mrf.mxu3 }
 0x5db   : > { %v4281_v47 = vsub.f32 %v11641_v5, %v4261_v61  ;;  %v4205_v4 = vmax.f32 %v4197_v27, %v4141_v23  ;;  %v8087_v61 = vld [vmem:[%s11529_s11 + $0x4] sm:$0xf0] }
 0x5dc   : > { %v7151_v3 = vor.u32 %v8087_v61, %v7150_v40  ;;  %v11653_v23 = vld [vmem:[#allocation18_spill] sm:$0xff] }
 0x5dd   : > { %v4293_v0 = vadd.f32 %v8331_v49, %v4281_v47  ;;  %v4181_v27 = vadd.f32 %v10169_v50, %v11653_v23  ;;  %v11654_v50 = vld [vmem:[#allocation20_spill] sm:$0xff]  ;;  %v7278_v23 = vld [vmem:[%s11445_s13 + $0x78] sm:$0xf0] }
 0x5de   : > { %4486 = vmatpush.bf16.msra.mxu3 %v7151_v3  ;;  %v4186_v16 = vadd.f32 %v10190_v39, %v11654_v50  ;;  %v7340_v50 = vld [vmem:[%s11445_s13 + $0xf0] sm:$0xf] }
 0x5df   : > { %v4301_v62 = vmax.f32 %v4293_v0, 0.0  ;;  %v4209_v24 = vmax.f32 %v10134_v13, %v4181_v27 }
 0x5e0   : > { %v4211_v30 = vmax.f32 %v10142_v41, %v4186_v16  ;;  %v8134_v16 = vld [vmem:[%s11445_s13 + $0xf4] sm:$0xf0] }
 0x5e2   : > { %v4263_v1 = vpop.f32.mrf.mxu3  ;;  %4580 = vmatpush.bf16.msrb.mxu3 %v10106_v15 }
 0x5e3   : > { %v4282_v33 = vsub.f32 %v4205_v4, %v4263_v1 }
 0x5e5   : > { %v4294_v25 = vadd.f32 %v8331_v49, %v4282_v33 }
 0x5e7   : > { %v4302_v56 = vmax.f32 %v4294_v25, 0.0  ;;  %7145 = vmatmul.msk.bf16.gmra.mxu3 %vm2404_vm3, %v10093_v59  ;;  %v11648_v59 = vld [vmem:[#allocation52_spill] sm:$0xff]  ;;  %v7214_v25 = vld [vmem:[%s8650_s0] sm:$0xf] }
 0x5e8   : > { %v4136_v2 = vadd.f32 %v11648_v59, %v11647_v53 }
 0x5e9   : > { %v4309_v38 = vpack.c.bf16 %v4302_v56, %v4301_v62  ;;  %v8102_v62 = vld [vmem:[%s8650_s0 + $0xfc] sm:$0xf0]  ;;  %s6144_s0 = sshll.u32 %s6141_s29, 4  ;;  %s6145_s0 = int_to_ptr.hbm [resolvable:$true] %s6144_s0 }
 0x5ea   : > { %v4266_v36 = vpop.f32.mrf.mxu3  ;;  %v4199_v12 = vmax.f32 %v4191_v8, %v4136_v2  ;;  %v7215_v52 = vor.u32 %v8102_v62, %v7214_v25  ;;  %v8132_v25 = vld [vmem:[%s11445_s13 + $0xe4] sm:$0xf0]  ;;  %v8109_v62 = vld [vmem:[%s11445_s13 + $0x34] sm:$0xf]  ;;  %s8357_s10 = sshra.s32 %s6145_s0, 4  ;;  %s8358_s10 = int_to_ptr.hbm [resolvable:$true] %s8357_s10 }
 0x5eb   : > { %4516 = vmatmul.bf16.vlgmr.msrb.gmra.mxu0 %v4309_v38  ;;  %v4283_v28 = vsub.f32 %v11652_v46, %v4266_v36  ;;  %s8359_s8 = scalar_lea.hbm %s8358_s10, 32  ;;  %p8364_p0 = scmp.lt.s32.totalorder %s8358_s10, %s11455_s23 }
 0x5ec   : > { %v4207_v9 = vmax.f32 %v4199_v12, %v4146_v17  ;;  %7216 = vmatmul.msk.bf16.vlgmr.msrb.gmra.mxu1 %vm2404_vm3, %v7215_v52  ;;  %p8360_p11 = scmp.ne.s32.totalorder %s8358_s10, %s8359_s8  ;;  %p8365_p1 = scmp.lt.s32.totalorder %s8363_s6, %s8359_s8 }
 0x5ed   : > { %v4295_v37 = vadd.f32 %v8331_v49, %v4283_v28 }
 0x5ee   : > { %p8361_p12 = pnand %p8360_p11, %p8606_p5  ;;  %p8366_p2 = por %p8365_p1, %p8364_p0 }
 0x5ef   : > { %v4303_v14 = vmax.f32 %v4295_v37, 0.0 }
 0x5f0   : > { %p8362_p13 = pneg %p8361_p12 }
 0x5f2   : > { %v4268_v45 = vpop.f32.mrf.mxu3  ;;  %p8367_p3 = pnand %p8366_p2, %p8362_p13 }
 0x5f3   : > { %v4284_v7 = vsub.f32 %v4207_v9, %v4268_v45 }
 0x5f5   : > { %v4296_v48 = vadd.f32 %v8331_v49, %v4284_v7 }
 0x5f7   : > { %v4304_v26 = vmax.f32 %v4296_v48, 0.0  ;;  %7146 = vmatmul.msk.bf16.gmra.mxu3 %vm2404_vm3, %v10101_v57 }
 0x5f9   : > { %v4310_v19 = vpack.c.bf16 %v4304_v26, %v4303_v14 }
 0x5fa   : > { %v4271_v54 = vpop.f32.mrf.mxu3 }
 0x5fb   : > { %4521 = vmatmul.bf16.gmra.mxu0 %v4310_v19  ;;  %v4285_v55 = vsub.f32 %v4208_v11, %v4271_v54  ;;  %v8117_v54 = vld [vmem:[%s11445_s13 + $0x74] sm:$0xf] }
 0x5fc   : > { %v7281_v27 = vor.u32 %v8117_v54, %v7278_v23 }
 0x5fd   : > { %v4297_v15 = vadd.f32 %v8331_v49, %v4285_v55 }
 0x5ff   : > { %v4305_v20 = vmax.f32 %v4297_v15, 0.0  ;;  %v7270_v15 = vld [vmem:[%s11445_s13 + $0x68] sm:$0xf0] }
 0x602   : > { %v4273_v5 = vpop.f32.mrf.mxu3 }
 0x603   : > { %v4286_v47 = vsub.f32 %v4209_v24, %v4273_v5  ;;  %v8115_v5 = vld [vmem:[%s11445_s13 + $0x64] sm:$0xf] }
 0x605   : > { %v4298_v18 = vadd.f32 %v8331_v49, %v4286_v47 }
 0x607   : > { %v4306_v57 = vmax.f32 %v4298_v18, 0.0  ;;  %7147 = vmatmul.msk.bf16.gmra.mxu3 %vm2404_vm3, %v10114_v6  ;;  %v7273_v18 = vor.u32 %v8115_v5, %v7270_v15  ;;  %v7318_v5 = vld [vmem:[%s11445_s13 + $0xc8] sm:$0xf0] }
 0x609   : > { %v4311_v31 = vpack.c.bf16 %v4306_v57, %v4305_v20  ;;  %v8113_v57 = vld [vmem:[%s11445_s13 + $0x54] sm:$0xf] }
 0x60a   : > { %v4276_v4 = vpop.f32.mrf.mxu3 }
 0x60b   : > { %4526 = vmatmul.bf16.gmra.mxu0 %v4311_v31  ;;  %v4287_v13 = vsub.f32 %v4210_v42, %v4276_v4 }
 0x60d   : > { %v4299_v1 = vadd.f32 %v8331_v49, %v4287_v13  ;;  %v8111_v13 = vld [vmem:[%s11445_s13 + $0x44] sm:$0xf] }
 0x60f   : > { %v4307_v56 = vmax.f32 %v4299_v1, 0.0  ;;  %v7254_v1 = vld [vmem:[%s11445_s13 + $0x48] sm:$0xf0] }
 0x612   : > { %v4278_v11 = vpop.f32.mrf.mxu3 }
 0x613   : > { %v4288_v0 = vsub.f32 %v4211_v30, %v4278_v11  ;;  %v7341_v11 = vor.u32 %v8134_v16, %v7340_v50  ;;  %v7310_v16 = vld [vmem:[%s11445_s13 + $0xb8] sm:$0xf0] }
 0x615   : > { %v4300_v33 = vadd.f32 %v8331_v49, %v4288_v0  ;;  %v7220_v49 = vld [vmem:[%s11445_s13] sm:$0xf]  ;;  %v7257_v0 = vor.u32 %v8111_v13, %v7254_v1  ;;  %4819 = vmatpush.bf16.msra.mxu1 %v7341_v11  ;;  %v7292_v11 = vld [vmem:[%s11445_s13 + $0x90] sm:$0xf]  ;;  %v8122_v1 = vld [vmem:[%s11445_s13 + $0x94] sm:$0xf0] }
 0x616   : > { %v7221_v29 = vor.u32 %v8104_v63, %v7220_v49 }
 0x617   : > { %v4308_v6 = vmax.f32 %v4300_v33, 0.0  ;;  %4487 = vmatmul.bf16.vlgmr.msra.gmra.mxu3 %v4309_v38  ;;  %v7332_v33 = vld [vmem:[%s11445_s13 + $0xe0] sm:$0xf] }
 0x618   : > { %4812 = vmatpush.bf16.msrb.mxu2 %v7221_v29  ;;  %4833 = vmatpush.bf16.msra.mxu3 %v7281_v27  ;;  %v7324_v29 = vld [vmem:[%s11445_s13 + $0xd0] sm:$0xf]  ;;  %v7222_v27 = vld [vmem:[%s11445_s13 + $0x8] sm:$0xf0] }
 0x619   : > { %v4312_v32 = vpack.c.bf16 %v4308_v6, %v4307_v56  ;;  %v7333_v56 = vor.u32 %v8132_v25, %v7332_v33  ;;  %v7246_v6 = vld [vmem:[%s11445_s13 + $0x38] sm:$0xf0]  ;;  %v7293_v25 = vor.u32 %v8122_v1, %v7292_v11  ;;  %v7446_v1 = vld [vmem:[%s11449_s17 + $0xd0] sm:$0xf0] }
 0x61a   : > { %v10265_v39 = vpop.f32.mrf.mxu3  ;;  %v7249_v49 = vor.u32 %v8109_v62, %v7246_v6  ;;  %v7302_v62 = vld [vmem:[%s11445_s13 + $0xa8] sm:$0xf0]  ;;  %v7284_v6 = vld [vmem:[%s11445_s13 + $0x80] sm:$0xf] }
 0x61b   : > { %4531 = vmatmul.bf16.gmra.mxu0 %v4312_v32  ;;  %4820 = vmatpush.bf16.msra.mxu1 %v7333_v56 }
 0x61c   : > { %4834 = vmatpush.bf16.msra.mxu3 %v7273_v18 }
 0x622   : > { %v10267_v34 = vpop.f32.mrf.mxu3 }
 0x627   : > { %4492 = vmatmul.bf16.gmra.mxu3 %v4310_v19 }
 0x62a   : > { %v10269_v41 = vpop.f32.mrf.mxu3 }
 0x632   : > { %v10271_v44 = vpop.f32.mrf.mxu3 }
 0x637   : > { %4497 = vmatmul.bf16.gmra.mxu3 %v4311_v31  ;;  %v7262_v31 = vld [vmem:[%s11445_s13 + $0x58] sm:$0xf0] }
 0x638   : > { %v7265_v4 = vor.u32 %v8113_v57, %v7262_v31  ;;  %v7300_v57 = vld [vmem:[%s11445_s13 + $0xa0] sm:$0xf]  ;;  %v8124_v31 = vld [vmem:[%s11445_s13 + $0xa4] sm:$0xf0] }
 0x639   : > { %v7301_v50 = vor.u32 %v8124_v31, %v7300_v57 }
 0x63a   : > { %v10273_v42 = vpop.f32.mrf.mxu3  ;;  %4835 = vmatpush.bf16.msra.mxu3 %v7265_v4  ;;  %v8125_v4 = vld [vmem:[%s11445_s13 + $0xb4] sm:$0xf] }
 0x63b   : > { %v7313_v13 = vor.u32 %v8125_v4, %v7310_v16  ;;  %v7462_v16 = vld [vmem:[%s11449_s17 + $0xf0] sm:$0xf0] }
 0x63e   : > { %4836 = vmatpush.bf16.msra.mxu3 %v7257_v0  ;;  %v8123_v0 = vld [vmem:[%s11445_s13 + $0xa4] sm:$0xf] }
 0x63f   : > { %v7305_v56 = vor.u32 %v8123_v0, %v7302_v62  ;;  %v8155_v62 = vld [vmem:[%s11449_s17 + $0xa4] sm:$0xf] }
 0x642   : > { %v10281_v35 = vpop.f32.mrf.mxu3  ;;  %4837 = vmatpush.bf16.msra.mxu3 %v7249_v49 }
 0x647   : > { %4502 = vmatmul.bf16.gmra.mxu3 %v4312_v32  ;;  %v7342_v32 = vld [vmem:[%s11445_s13 + $0xf8] sm:$0xf0] }
 0x64a   : > { %v10283_v21 = vpop.f32.mrf.mxu3 }
 0x652   : > { %v10285_v38 = vpop.f32.mrf.mxu3 }
 0x657   : > { %7217 = vmatmul.msk.bf16.vlgmr.msrb.gmra.mxu3 %vm2404_vm3, %v7215_v52  ;;  %v8133_v52 = vld [vmem:[%s11445_s13 + $0xf4] sm:$0xf] }
 0x658   : > { %v7345_v63 = vor.u32 %v8133_v52, %v7342_v32  ;;  %v8120_v52 = vld [vmem:[%s11445_s13 + $0x84] sm:$0xf0]  ;;  %v8121_v32 = vld [vmem:[%s11445_s13 + $0x94] sm:$0xf] }
 0x659   : > { %v7285_v49 = vor.u32 %v8120_v52, %v7284_v6  ;;  %v7430_v6 = vld [vmem:[%s11449_s17 + $0xb0] sm:$0xf0] }
 0x65a   : > { %v4379_v36 = vpop.f32.mrf.mxu3  ;;  %4847 = vmatpush.bf16.msra.mxu2 %v7345_v63  ;;  %v7294_v63 = vld [vmem:[%s11445_s13 + $0x98] sm:$0xf0]  ;;  %v7433_v52 = vor.u32 %v8155_v62, %v7430_v6  ;;  %v8166_v62 = vld [vmem:[%s11449_s17 + $0xf4] sm:$0xf0] }
 0x662   : > { %v4381_v43 = vpop.f32.mrf.mxu3 }
 0x668   : > { %v4517_v58 = vpop.f32.mrf.mxu0 }
 0x669   : > { %v4518_v8 = vadd.f32 %v4517_v58, %v4379_v36  ;;  %v8130_v36 = vld [vmem:[%s11445_s13 + $0xd4] sm:$0xf0] }
 0x66a   : > { %v4384_v10 = vpop.f32.mrf.mxu3 }
 0x670   : > { %v4519_v53 = vpop.f32.mrf.mxu0 }
 0x671   : > { %v4520_v2 = vadd.f32 %v4519_v53, %v4381_v43  ;;  %v8107_v43 = vld [vmem:[%s11445_s13 + $0x24] sm:$0xf]  ;;  %v7238_v53 = vld [vmem:[%s11445_s13 + $0x28] sm:$0xf0] }
 0x672   : > { %v10288_v59 = vpop.f32.mrf.mxu3 }
 0x673   : > { %v4538_v17 = vmax.f32 %v4518_v8, %v4520_v2  ;;  %v8131_v2 = vld [vmem:[%s11445_s13 + $0xe4] sm:$0xf]  ;;  %v7334_v8 = vld [vmem:[%s11445_s13 + $0xe8] sm:$0xf0] }
 0x678   : > { %v4522_v22 = vpop.f32.mrf.mxu0 }
 0x679   : > { %v4523_v12 = vadd.f32 %v4522_v22, %v4384_v10  ;;  %v7325_v10 = vor.u32 %v8130_v36, %v7324_v29  ;;  %v7241_v22 = vor.u32 %v8107_v43, %v7238_v53  ;;  %v7297_v36 = vor.u32 %v8121_v32, %v7294_v63  ;;  %v8119_v53 = vld [vmem:[%s11445_s13 + $0x84] sm:$0xf]  ;;  %v7588_v32 = vld [vmem:[%s11449_s17 + $0x1e0] sm:$0xf] }
 0x67a   : > { %v4389_v51 = vpop.f32.mrf.mxu3 }
 0x67b   : > { %v10290_v60 = vmax.f32 %v4538_v17, %v4523_v12  ;;  %v7337_v17 = vor.u32 %v8131_v2, %v7334_v8  ;;  %4821 = vmatpush.bf16.msra.mxu1 %v7325_v10  ;;  %4838 = vmatpush.bf16.msra.mxu3 %v7241_v22  ;;  %v7316_v12 = vld [vmem:[%s11445_s13 + $0xc0] sm:$0xf]  ;;  %v7286_v2 = vld [vmem:[%s11445_s13 + $0x88] sm:$0xf0] }
 0x67c   : > { %v7289_v22 = vor.u32 %v8119_v53, %v7286_v2  ;;  %v8153_v53 = vld [vmem:[%s11449_s17 + $0x8c] sm:$0xf0]  ;;  %v8151_v2 = vld [vmem:[%s11449_s17 + $0x84] sm:$0xf] }
 0x67d   : > { %4848 = vmatpush.bf16.msra.mxu2 %v7337_v17 }
 0x680   : > { %v10292_v46 = vpop.f32.mrf.mxu0 }
 0x682   : > { %v4391_v28 = vpop.f32.mrf.mxu3 }
 0x688   : > { %v4527_v40 = vpop.f32.mrf.mxu0 }
 0x689   : > { %v4528_v9 = vadd.f32 %v4527_v40, %v4389_v51  ;;  %v8128_v51 = vld [vmem:[%s11445_s13 + $0xc4] sm:$0xf0] }
 0x68a   : > { %v4394_v61 = vpop.f32.mrf.mxu3  ;;  %v7317_v40 = vor.u32 %v8128_v51, %v7316_v12  ;;  %v7460_v51 = vld [vmem:[%s11449_s17 + $0xe0] sm:$0xf] }
 0x68c   : > { %4822 = vmatpush.bf16.msra.mxu1 %v7317_v40 }
 0x690   : > { %v4529_v3 = vpop.f32.mrf.mxu0 }
 0x691   : > { %v4530_v45 = vadd.f32 %v4529_v3, %v4391_v28  ;;  %v8105_v28 = vld [vmem:[%s11445_s13 + $0x14] sm:$0xf] }
 0x692   : > { %v4396_v37 = vpop.f32.mrf.mxu3  ;;  %v8129_v3 = vld [vmem:[%s11445_s13 + $0xd4] sm:$0xf] }
 0x693   : > { %v4540_v7 = vmax.f32 %v4528_v9, %v4530_v45  ;;  %v7326_v9 = vld [vmem:[%s11445_s13 + $0xd8] sm:$0xf0] }
 0x698   : > { %v4532_v48 = vpop.f32.mrf.mxu0 }
 0x699   : > { %v4533_v14 = vadd.f32 %v4532_v48, %v4394_v61  ;;  %v7230_v61 = vld [vmem:[%s11445_s13 + $0x18] sm:$0xf0]  ;;  %v8126_v48 = vld [vmem:[%s11445_s13 + $0xb4] sm:$0xf0] }
 0x69a   : > { %v10294_v26 = vpop.f32.mrf.mxu3  ;;  %v7233_v45 = vor.u32 %v8105_v28, %v7230_v61  ;;  %v8165_v28 = vld [vmem:[%s11449_s17 + $0xec] sm:$0xf0] }
 0x69b   : > { %v10296_v19 = vmax.f32 %v4540_v7, %v4533_v14  ;;  %v7308_v7 = vld [vmem:[%s11445_s13 + $0xb0] sm:$0xf]  ;;  %v8103_v14 = vld [vmem:[%s11445_s13 + $0x4] sm:$0xf]  ;;  %v4489_v43 = vadd.f32 %v10294_v26, %v10265_v39  ;;  %v4568_v26 = vpop.f32.mrf.mxu1 }
 0x69c   : > { %4839 = vmatpush.bf16.msra.mxu3 %v7233_v45  ;;  %v7309_v23 = vor.u32 %v8126_v48, %v7308_v7  ;;  %v7225_v15 = vor.u32 %v8103_v14, %v7222_v27  ;;  %v4525_v48 = vadd.f32 %v10292_v46, %v10288_v59 }
 0x69e   : > { %4823 = vmatpush.bf16.msra.mxu1 %v7309_v23 }
 0x6a0   : > { %v4534_v55 = vpop.f32.mrf.mxu0  ;;  %4840 = vmatpush.bf16.msra.mxu3 %v7225_v15 }
 0x6a1   : > { %v10304_v24 = vadd.f32 %v4534_v55, %v4396_v37  ;;  %v7329_v37 = vor.u32 %v8129_v3, %v7326_v9  ;;  %v8127_v55 = vld [vmem:[%s11445_s13 + $0xc4] sm:$0xf] }
 0x6a2   : > { %v10312_v47 = vpop.f32.mrf.mxu3  ;;  %v7321_v18 = vor.u32 %v8127_v55, %v7318_v5  ;;  %4824 = vmatpush.bf16.msra.mxu1 %v7301_v50  ;;  %v4546_v55 = vmax.f32 %v10290_v60, %v4525_v48  ;;  %v8163_v60 = vld [vmem:[%s11449_s17 + $0xe4] sm:$0xf] }
 0x6a3   : > { %v4548_v20 = vmax.f32 %v10296_v19, %v10304_v24  ;;  %4849 = vmatpush.bf16.msra.mxu2 %v7329_v37  ;;  %v4491_v29 = vadd.f32 %v10312_v47, %v10267_v34  ;;  %v4570_v45 = vpop.f32.mrf.mxu1  ;;  %v7444_v19 = vld [vmem:[%s11449_s17 + $0xc0] sm:$0xf]  ;;  %v8161_v24 = vld [vmem:[%s11449_s17 + $0xcc] sm:$0xf0]  ;;  %v8143_v48 = vld [vmem:[%s11449_s17 + $0x44] sm:$0xf] }
 0x6a4   : > { %v7445_v11 = vor.u32 %v8161_v24, %v7444_v19  ;;  %v7526_v19 = vld [vmem:[%s11449_s17 + $0x170] sm:$0xf0] }
 0x6a5   : > { %v4537_v34 = vmax.f32 %v4489_v43, %v4491_v29  ;;  %v8195_v29 = vld [vmem:[%s11449_s17 + $0x1e4] sm:$0xf]  ;;  %v7412_v43 = vld [vmem:[%s11449_s17 + $0x80] sm:$0xf] }
 0x6a6   : > { %4825 = vmatpush.bf16.msra.mxu1 %v7293_v25  ;;  %v8157_v25 = vld [vmem:[%s11449_s17 + $0xac] sm:$0xf0] }
 0x6a7   : > { %4850 = vmatpush.bf16.msra.mxu2 %v7321_v18 }
 0x6aa   : > { %v10331_v30 = vpop.f32.mrf.mxu3  ;;  %4826 = vmatpush.bf16.msra.mxu1 %v7285_v49  ;;  %v8197_v49 = vld [vmem:[%s11449_s17 + $0x1ec] sm:$0xf0] }
 0x6ab   : > { %4851 = vmatpush.bf16.msra.mxu2 %v7313_v13  ;;  %v4494_v10 = vadd.f32 %v10331_v30, %v10269_v41  ;;  %v7465_v13 = vor.u32 %v8163_v60, %v7462_v16  ;;  %v7589_v63 = vor.u32 %v8197_v49, %v7588_v32  ;;  %v8181_v60 = vld [vmem:[%s11449_s17 + $0x16c] sm:$0xf0]  ;;  %v8179_v16 = vld [vmem:[%s11449_s17 + $0x164] sm:$0xf]  ;;  %v7470_v32 = vld [vmem:[%s11449_s17 + $0xf8] sm:$0xf0] }
 0x6ac   : > { %v7529_v24 = vor.u32 %v8179_v16, %v7526_v19  ;;  %v7508_v49 = vld [vmem:[%s11449_s17 + $0x140] sm:$0xf]  ;;  %v8152_v16 = vld [vmem:[%s11449_s17 + $0x8c] sm:$0xf] }
 0x6ad   : > { %v4541_v17 = vmax.f32 %v4537_v34, %v4494_v10  ;;  %5363 = vmatpush.bf16.msrb.mxu3 %v7465_v13 }
 0x6ae   : > { %5350 = vmatpush.bf16.msrb.mxu1 %v7589_v63 }
 0x6af   : > { %4852 = vmatpush.bf16.msra.mxu2 %v7305_v56 }
 0x6b2   : > { %v10363_v58 = vpop.f32.mrf.mxu3 }
 0x6b3   : > { %4853 = vmatpush.bf16.msra.mxu2 %v7297_v36  ;;  %v4496_v47 = vadd.f32 %v10363_v58, %v10271_v44  ;;  %v4591_v44 = vld [vmem:[%s11655_s12] sm:$0x3]  ;;  %v7590_v36 = vld [vmem:[%s11449_s17 + $0x1f0] sm:$0xf0] }
 0x6b4   : > { %v4594_v18 = vperm.slane %v4591_v44, 1  ;;  %v7593_v10 = vor.u32 %v8195_v29, %v7590_v36  ;;  %v8177_v29 = vld [vmem:[%s11449_s17 + $0x14c] sm:$0xf0]  ;;  %v8175_v36 = vld [vmem:[%s11449_s17 + $0x144] sm:$0xf] }
 0x6b5   : > { %v4545_v41 = vmax.f32 %v4541_v17, %v4496_v47  ;;  %v7572_v47 = vld [vmem:[%s11449_s17 + $0x1c0] sm:$0xf]  ;;  %v8193_v17 = vld [vmem:[%s11449_s17 + $0x1cc] sm:$0xf0] }
 0x6b7   : > { %4854 = vmatpush.bf16.msra.mxu2 %v7289_v22  ;;  %v4587_v61 = vsub.f32 %v4545_v41, %v4568_v26  ;;  %v7413_v22 = vor.u32 %v8153_v53, %v7412_v43  ;;  %v7573_v26 = vor.u32 %v8193_v17, %v7572_v47  ;;  %v7574_v41 = vld [vmem:[%s11449_s17 + $0x1d0] sm:$0xf0]  ;;  %v10661_v53 = vld [vmem:[%s11447_s15] sm:$0x3]  ;;  %v8162_v47 = vld [vmem:[%s11449_s17 + $0xd4] sm:$0xf0] }
 0x6b8   : > { %v7510_v43 = vld [vmem:[%s11449_s17 + $0x150] sm:$0xf0]  ;;  %v8160_v17 = vld [vmem:[%s11449_s17 + $0xcc] sm:$0xf] }
 0x6b9   : > { %5351 = vmatpush.bf16.msrb.mxu1 %v7573_v26  ;;  %v7454_v26 = vld [vmem:[%s11449_s17 + $0xd8] sm:$0xf0] }
 0x6ba   : > { %v4498_v54 = vpop.f32.mrf.mxu3 }
 0x6bb   : > { %v4499_v30 = vadd.f32 %v4498_v54, %v10273_v42  ;;  %v4593_v42 = vperm.slane %v4591_v44, 0 }
 0x6bd   : > { %v4597_v37 = vadd.f32 %v4593_v42, %v4587_v61  ;;  %v8189_v61 = vld [vmem:[%s11449_s17 + $0x1ac] sm:$0xf0] }
 0x6bf   : > { %v4601_v23 = vmax.f32 %v4597_v37, 0.0  ;;  %v8145_v37 = vld [vmem:[%s11449_s17 + $0x4c] sm:$0xf0] }
 0x6c2   : > { %v4500_v33 = vpop.f32.mrf.mxu3 }
 0x6c3   : > { %v4501_v39 = vadd.f32 %v4500_v33, %v10281_v35  ;;  %v7461_v35 = vor.u32 %v8165_v28, %v7460_v51  ;;  %v7428_v33 = vld [vmem:[%s11449_s17 + $0xa0] sm:$0xf]  ;;  %v8149_v51 = vld [vmem:[%s11449_s17 + $0x6c] sm:$0xf0]  ;;  %v8147_v28 = vld [vmem:[%s11449_s17 + $0x64] sm:$0xf] }
 0x6c4   : > { %v7429_v56 = vor.u32 %v8157_v25, %v7428_v33  ;;  %v7350_v33 = vld [vmem:[%s11449_s17 + $0x10] sm:$0xf0]  ;;  %v7468_v25 = vld [vmem:[%s11449_s17 + $0xe8] sm:$0xf] }
 0x6c5   : > { %v4539_v58 = vmax.f32 %v4499_v30, %v4501_v39  ;;  %5337 = vmatpush.bf16.msra.mxu0 %v7461_v35  ;;  %v8191_v39 = vld [vmem:[%s11449_s17 + $0x1c4] sm:$0xf]  ;;  %v7398_v35 = vld [vmem:[%s11449_s17 + $0x70] sm:$0xf0]  ;;  %v7469_v6 = vor.u32 %v8166_v62, %v7468_v25  ;;  %v8194_v25 = vld [vmem:[%s11449_s17 + $0x1d4] sm:$0xf0] }
 0x6c6   : > { %v7577_v30 = vor.u32 %v8191_v39, %v7574_v41  ;;  %v7492_v41 = vld [vmem:[%s11449_s17 + $0x120] sm:$0xf]  ;;  %v8192_v62 = vld [vmem:[%s11449_s17 + $0x1cc] sm:$0xf] }
 0x6c9   : > { %5338 = vmatpush.bf16.msra.mxu0 %v7445_v11  ;;  %v8137_v11 = vld [vmem:[%s11449_s17 + $0xc] sm:$0xf0] }
 0x6ca   : > { %v4503_v8 = vpop.f32.mrf.mxu3 }
 0x6cb   : > { %v4504_v12 = vadd.f32 %v4503_v8, %v10283_v21  ;;  %v7414_v8 = vld [vmem:[%s11449_s17 + $0x90] sm:$0xf0] }
 0x6cc   : > { %v7417_v34 = vor.u32 %v8151_v2, %v7414_v8  ;;  %v7509_v2 = vor.u32 %v8177_v29, %v7508_v49  ;;  %v7513_v8 = vor.u32 %v8175_v36, %v7510_v43  ;;  %v7404_v29 = vld [vmem:[%s11449_s17 + $0x68] sm:$0xf]  ;;  %v8150_v36 = vld [vmem:[%s11449_s17 + $0x74] sm:$0xf0] }
 0x6cd   : > { %v4543_v3 = vmax.f32 %v4539_v58, %v4504_v12  ;;  %5339 = vmatpush.bf16.msra.mxu0 %v7429_v56  ;;  %v7396_v12 = vld [vmem:[%s11449_s17 + $0x60] sm:$0xf]  ;;  %v7401_v58 = vor.u32 %v8147_v28, %v7398_v35  ;;  %v7494_v35 = vld [vmem:[%s11449_s17 + $0x130] sm:$0xf0] }
 0x6ce   : > { %v7397_v44 = vor.u32 %v8149_v51, %v7396_v12  ;;  %v7457_v51 = vor.u32 %v8160_v17, %v7454_v26  ;;  %v8190_v26 = vld [vmem:[%s11449_s17 + $0x1b4] sm:$0xf0] }
 0x6d1   : > { %5340 = vmatpush.bf16.msra.mxu0 %v7413_v22  ;;  %v8439_v22 = vmov 8.0  }
 0x6d2   : > { %v4505_v40 = vpop.f32.mrf.mxu3  ;;  %8333 = vrcp.f32 %v8439_v22  ;;  %v7405_v22 = vor.u32 %v8150_v36, %v7404_v29  ;;  %v7356_v36 = vld [vmem:[%s11449_s17 + $0x8] sm:$0xf] }
 0x6d3   : > { %v4506_v21 = vadd.f32 %v4505_v40, %v10285_v38  ;;  %v7556_v40 = vld [vmem:[%s11449_s17 + $0x1a0] sm:$0xf] }
 0x6d5   : > { %v4547_v9 = vmax.f32 %v4543_v3, %v4506_v21  ;;  %v7557_v3 = vor.u32 %v8189_v61, %v7556_v40  ;;  %v7558_v21 = vld [vmem:[%s11449_s17 + $0x1b0] sm:$0xf0]  ;;  %5341 = vmatpush.bf16.msra.mxu0 %v7397_v44  ;;  %v8171_v44 = vld [vmem:[%s11449_s17 + $0x124] sm:$0xf]  ;;  %v4863_v40 = vperm.slane %v10661_v53, 0 }
 0x6d6   : > { %v7497_v61 = vor.u32 %v8171_v44, %v7494_v35  ;;  %v7566_v44 = vld [vmem:[%s11449_s17 + $0x1b8] sm:$0xf0] }
 0x6d7   : > { %v4589_v7 = vsub.f32 %v4547_v9, %v4570_v45  ;;  %v7380_v45 = vld [vmem:[%s11449_s17 + $0x40] sm:$0xf]  ;;  %5352 = vmatpush.bf16.msrb.mxu1 %v7557_v3  ;;  %v7436_v3 = vld [vmem:[%s11449_s17 + $0xa8] sm:$0xf] }
 0x6d9   : > { %v4599_v14 = vadd.f32 %v4593_v42, %v4589_v7  ;;  %v8187_v42 = vld [vmem:[%s11449_s17 + $0x1a4] sm:$0xf]  ;;  %v7381_v7 = vor.u32 %v8145_v37, %v7380_v45  ;;  %v7438_v37 = vld [vmem:[%s11449_s17 + $0xb8] sm:$0xf0] }
 0x6da   : > { %v4582_v54 = vpop.f32.mrf.mxu3  ;;  %v7561_v9 = vor.u32 %v8187_v42, %v7558_v21  ;;  %v10695_v42 = vld [vmem:[%s11448_s16] sm:$0x3]  ;;  %v8158_v21 = vld [vmem:[%s11449_s17 + $0xb4] sm:$0xf0] }
 0x6db   : > { %v4603_v27 = vmax.f32 %v4599_v14, 0.0  ;;  %v4588_v15 = vsub.f32 %v4546_v55, %v4582_v54  ;;  %v7382_v14 = vld [vmem:[%s11449_s17 + $0x50] sm:$0xf0]  ;;  %5342 = vmatpush.bf16.msra.mxu0 %v7381_v7  ;;  %v7437_v45 = vor.u32 %v8158_v21, %v7436_v3  ;;  %v7476_v7 = vld [vmem:[%s11449_s17 + $0x100] sm:$0xf]  ;;  %v4873_v19 = vperm.slane %v10695_v42, 0 }
 0x6dc   : > { %v7385_v54 = vor.u32 %v8143_v48, %v7382_v14  ;;  %v8169_v48 = vld [vmem:[%s11449_s17 + $0x10c] sm:$0xf0]  ;;  %v10715_v14 = vpop.eup %8333  ;;  %v7388_v3 = vld [vmem:[%s11449_s17 + $0x48] sm:$0xf]  ;;  %v8144_v21 = vld [vmem:[%s11449_s17 + $0x4c] sm:$0xf] }
 0x6dd   : > { %v4605_v5 = vpack.c.bf16 %v4603_v27, %v4601_v23  ;;  %v4598_v38 = vadd.f32 %v4594_v18, %v4588_v15  ;;  %v7540_v23 = vld [vmem:[%s11449_s17 + $0x180] sm:$0xf]  ;;  %v8185_v27 = vld [vmem:[%s11449_s17 + $0x18c] sm:$0xf0]  ;;  %v7542_v15 = vld [vmem:[%s11449_s17 + $0x190] sm:$0xf0]  ;;  %vm4914_vm6 = vweird.f32 %v10715_v14 }
 0x6de   : > { %v7541_v55 = vor.u32 %v8185_v27, %v7540_v23  ;;  %v7477_v23 = vor.u32 %v8169_v48, %v7476_v7  ;;  %v8167_v27 = vld [vmem:[%s11449_s17 + $0x104] sm:$0xf]  ;;  %v7390_v48 = vld [vmem:[%s11449_s17 + $0x58] sm:$0xf0] }
 0x6df   : > { %4813 = vmatmul.bf16.vlgmr.msrb.gmra.mxu2 %v4605_v5  ;;  %4841 = vmatmul.bf16.vlgmr.msra.gmra.mxu3 %v4605_v5  ;;  %v4602_v50 = vmax.f32 %v4598_v38, 0.0  ;;  %v8183_v5 = vld [vmem:[%s11449_s17 + $0x184] sm:$0xf]  ;;  %v8141_v38 = vld [vmem:[%s11449_s17 + $0x2c] sm:$0xf0] }
 0x6e0   : > { %5376 = vmatpush.bf16.msrb.mxu2 %v7593_v10  ;;  %5353 = vmatpush.bf16.msrb.mxu1 %v7541_v55  ;;  %v10656_v10 = vld [vmem:[%s11446_s14] sm:$0x3]  ;;  %v7478_v55 = vld [vmem:[%s11449_s17 + $0x110] sm:$0xf0] }
 0x6e1   : > { %v4642_v49 = vperm.slane %v10656_v10, 1 }
 0x6e2   : > { %v4584_v57 = vpop.f32.mrf.mxu3 }
 0x6e3   : > { %v4590_v31 = vsub.f32 %v4548_v20, %v4584_v57  ;;  %v8159_v20 = vld [vmem:[%s11449_s17 + $0xc4] sm:$0xf]  ;;  %v7364_v57 = vld [vmem:[%s11449_s17 + $0x20] sm:$0xf] }
 0x6e4   : > { %v7449_v0 = vor.u32 %v8159_v20, %v7446_v1  ;;  %5377 = vmatpush.bf16.msrb.mxu2 %v7577_v30  ;;  %v7348_v20 = vld [vmem:[%s11449_s17] sm:$0xf]  ;;  %v8135_v1 = vld [vmem:[%s11449_s17 + $0x4] sm:$0xf]  ;;  %v8173_v30 = vld [vmem:[%s11449_s17 + $0x12c] sm:$0xf0] }
 0x6e5   : > { %v4600_v4 = vadd.f32 %v4594_v18, %v4590_v31  ;;  %v7545_v18 = vor.u32 %v8183_v5, %v7542_v15  ;;  %v8139_v31 = vld [vmem:[%s11449_s17 + $0x24] sm:$0xf]  ;;  %v7353_v56 = vor.u32 %v8135_v1, %v7350_v33  ;;  %v7493_v28 = vor.u32 %v8173_v30, %v7492_v41  ;;  %v7596_v5 = vld [vmem:[%s11449_s17 + $0x1e8] sm:$0xf]  ;;  %v8188_v41 = vld [vmem:[%s11449_s17 + $0x1ac] sm:$0xf] }
 0x6e6   : > { %5364 = vmatpush.bf16.msrb.mxu3 %v7449_v0  ;;  %v7349_v0 = vor.u32 %v8137_v11, %v7348_v20  ;;  %v7422_v11 = vld [vmem:[%s11449_s17 + $0x98] sm:$0xf0]  ;;  %v7580_v33 = vld [vmem:[%s11449_s17 + $0x1c8] sm:$0xf] }
 0x6e7   : > { %v4604_v59 = vmax.f32 %v4600_v4, 0.0  ;;  %v7365_v4 = vor.u32 %v8141_v38, %v7364_v57  ;;  %v8198_v57 = vld [vmem:[%s11449_s17 + $0x1f4] sm:$0xf0]  ;;  %v8196_v38 = vld [vmem:[%s11449_s17 + $0x1ec] sm:$0xf] }
 0x6e8   : > { %5378 = vmatpush.bf16.msrb.mxu2 %v7561_v9  ;;  %v8156_v9 = vld [vmem:[%s11449_s17 + $0xac] sm:$0xf] }
 0x6e9   : > { %v4606_v46 = vpack.c.bf16 %v4604_v59, %v4602_v50  ;;  %v7366_v50 = vld [vmem:[%s11449_s17 + $0x30] sm:$0xf0]  ;;  %5343 = vmatpush.bf16.msra.mxu0 %v7365_v4 }
 0x6ea   : > { %5365 = vmatpush.bf16.msrb.mxu3 %v7433_v52  ;;  %v7369_v59 = vor.u32 %v8139_v31, %v7366_v50  ;;  %v8164_v52 = vld [vmem:[%s11449_s17 + $0xec] sm:$0xf]  ;;  %v7598_v31 = vld [vmem:[%s11449_s17 + $0x1f8] sm:$0xf0]  ;;  %v7597_v50 = vor.u32 %v8198_v57, %v7596_v5  ;;  %v8186_v5 = vld [vmem:[%s11449_s17 + $0x194] sm:$0xf0] }
 0x6eb   : > { %4827 = vmatmul.bf16.vlgmr.msra.gmra.mxu1 %v4606_v46  ;;  %v7473_v63 = vor.u32 %v8164_v52, %v7470_v32  ;;  %v7581_v52 = vor.u32 %v8194_v25, %v7580_v33  ;;  %v7582_v32 = vld [vmem:[%s11449_s17 + $0x1d8] sm:$0xf0]  ;;  %v7532_v33 = vld [vmem:[%s11449_s17 + $0x168] sm:$0xf]  ;;  %v8182_v25 = vld [vmem:[%s11449_s17 + $0x174] sm:$0xf0] }
 0x6ec   : > { %5379 = vmatpush.bf16.msrb.mxu2 %v7545_v18  ;;  %v7481_v18 = vor.u32 %v8167_v27, %v7478_v55  ;;  %v7393_v27 = vor.u32 %v8144_v21, %v7390_v48  ;;  %v7548_v55 = vld [vmem:[%s11449_s17 + $0x188] sm:$0xf]  ;;  %v8172_v48 = vld [vmem:[%s11449_s17 + $0x12c] sm:$0xf] }
 0x6ed   : > { %5344 = vmatpush.bf16.msra.mxu0 %v7349_v0  ;;  %v7425_v0 = vor.u32 %v8152_v16, %v7422_v11 }
 0x6ee   : > { %5366 = vmatpush.bf16.msrb.mxu3 %v7417_v34  ;;  %v7452_v34 = vld [vmem:[%s11449_s17 + $0xc8] sm:$0xf] }
 0x6ef   : > { %4855 = vmatmul.bf16.vlgmr.msra.gmra.mxu2 %v4606_v46  ;;  %v7524_v46 = vld [vmem:[%s11449_s17 + $0x160] sm:$0xf]  ;;  %v7453_v39 = vor.u32 %v8162_v47, %v7452_v34  ;;  %v8148_v34 = vld [vmem:[%s11449_s17 + $0x6c] sm:$0xf]  ;;  %v7406_v47 = vld [vmem:[%s11449_s17 + $0x78] sm:$0xf0] }
 0x6f0   : > { %v7525_v13 = vor.u32 %v8181_v60, %v7524_v46  ;;  %5380 = vmatpush.bf16.msrb.mxu2 %v7529_v24  ;;  %v7420_v46 = vld [vmem:[%s11449_s17 + $0x88] sm:$0xf]  ;;  %v8154_v60 = vld [vmem:[%s11449_s17 + $0x94] sm:$0xf0]  ;;  %v4910_v24 = vmul.f32 8.0, %v10715_v14  ;;  %v7409_v17 = vor.u32 %v8148_v34, %v7406_v47 }
 0x6f1   : > { %5389 = vmatpush.bf16.msrb.mxu0 %v7469_v6  ;;  %v7421_v20 = vor.u32 %v8154_v60, %v7420_v46  ;;  %v8142_v46 = vld [vmem:[%s11449_s17 + $0x34] sm:$0xf0]  ;;  %v7374_v60 = vld [vmem:[%s11449_s17 + $0x38] sm:$0xf0] }
 0x6f2   : > { %5367 = vmatpush.bf16.msrb.mxu3 %v7401_v58  ;;  %5354 = vmatpush.bf16.msrb.mxu1 %v7525_v13  ;;  %v4641_v58 = vperm.slane %v10656_v10, 0  ;;  %v7358_v47 = vld [vmem:[%s11449_s17 + $0x18] sm:$0xf0] }
 0x6f4   : > { %5381 = vmatpush.bf16.msrb.mxu2 %v7513_v8  ;;  %v4864_v8 = vperm.slane %v10661_v53, 1 }
 0x6f5   : > { %5390 = vmatpush.bf16.msrb.mxu0 %v7453_v39  ;;  %v7564_v39 = vld [vmem:[%s11449_s17 + $0x1a8] sm:$0xf] }
 0x6f6   : > { %5368 = vmatpush.bf16.msrb.mxu3 %v7385_v54  ;;  %5355 = vmatpush.bf16.msrb.mxu1 %v7509_v2  ;;  %v7441_v54 = vor.u32 %v8156_v9, %v7438_v37  ;;  %v4911_v2 = vsub.f32 1.0, %v4910_v24 }
 0x6f8   : > { %5382 = vmatpush.bf16.msrb.mxu2 %v7497_v61  ;;  %v7569_v61 = vor.u32 %v8188_v41, %v7566_v44 }
 0x6f9   : > { %5391 = vmatpush.bf16.msrb.mxu0 %v7437_v45 }
 0x6fa   : > { %5369 = vmatpush.bf16.msrb.mxu3 %v7369_v59  ;;  %5356 = vmatpush.bf16.msrb.mxu1 %v7493_v28  ;;  %v7601_v59 = vor.u32 %v8196_v38, %v7598_v31  ;;  %v7565_v28 = vor.u32 %v8190_v26, %v7564_v39  ;;  %v7549_v31 = vor.u32 %v8186_v5, %v7548_v55 }
 0x6fc   : > { %5383 = vmatpush.bf16.msrb.mxu2 %v7481_v18 }
 0x6fd   : > { %5392 = vmatpush.bf16.msrb.mxu0 %v7421_v20 }
 0x6fe   : > { %5370 = vmatpush.bf16.msrb.mxu3 %v7353_v56  ;;  %5357 = vmatpush.bf16.msrb.mxu1 %v7477_v23 }
 0x700   : > { %5428 = vmatpush.bf16.msra.mxu2 %v7601_v59 }
 0x701   : > { %5393 = vmatpush.bf16.msrb.mxu0 %v7405_v22 }
 0x702   : > { %5415 = vmatpush.bf16.msra.mxu3 %v7473_v63  ;;  %5402 = vmatpush.bf16.msra.mxu1 %v7597_v50  ;;  %v7585_v63 = vor.u32 %v8192_v62, %v7582_v32  ;;  %v7372_v50 = vld [vmem:[%s11449_s17 + $0x28] sm:$0xf]  ;;  %v7534_v32 = vld [vmem:[%s11449_s17 + $0x178] sm:$0xf0] }
 0x703   : > { %v7373_v11 = vor.u32 %v8142_v46, %v7372_v50 }
 0x704   : > { %5429 = vmatpush.bf16.msra.mxu2 %v7585_v63 }
 0x706   : > { %5416 = vmatpush.bf16.msra.mxu3 %v7457_v51  ;;  %5403 = vmatpush.bf16.msra.mxu1 %v7581_v52  ;;  %v4874_v51 = vperm.slane %v10695_v42, 1  ;;  %v7533_v52 = vor.u32 %v8182_v25, %v7532_v33  ;;  %v8168_v42 = vld [vmem:[%s11449_s17 + $0x10c] sm:$0xf] }
 0x708   : > { %5430 = vmatpush.bf16.msra.mxu2 %v7569_v61 }
 0x70a   : > { %5417 = vmatpush.bf16.msra.mxu3 %v7441_v54  ;;  %v4912_v54 = vmul.f32 %v10715_v14, %v4911_v2  ;;  %5404 = vmatpush.bf16.msra.mxu1 %v7565_v28  ;;  %v8136_v2 = vld [vmem:[%s11449_s17 + $0xc] sm:$0xf]  ;;  %v7518_v28 = vld [vmem:[%s11449_s17 + $0x158] sm:$0xf0] }
 0x70b   : > { %v7361_v41 = vor.u32 %v8136_v2, %v7358_v47  ;;  %v8246_v2 = vld [vmem:[%s11451_s19 + $0x174] sm:$0xf0] }
 0x70e   : > { %5418 = vmatpush.bf16.msra.mxu3 %v7425_v0  ;;  %5405 = vmatpush.bf16.msra.mxu1 %v7549_v31 }
 0x712   : > { %5419 = vmatpush.bf16.msra.mxu3 %v7409_v17  ;;  %v7516_v17 = vld [vmem:[%s11449_s17 + $0x148] sm:$0xf]  ;;  %5406 = vmatpush.bf16.msra.mxu1 %v7533_v52 }
 0x716   : > { %5420 = vmatpush.bf16.msra.mxu3 %v7393_v27  ;;  %v7484_v27 = vld [vmem:[%s11449_s17 + $0x108] sm:$0xf] }
 0x762   : > { %v4814_v12 = vpop.f32.mrf.mxu2  ;;  %v4842_v56 = vpop.f32.mrf.mxu3 }
 0x763   : > { %v4815_v15 = vadd.f32 %v4814_v12, %v4641_v58  ;;  %v4843_v9 = vadd.f32 %v4842_v56, %v4642_v49 }
 0x768   : > { %v4828_v4 = vpop.f32.mrf.mxu1 }
 0x769   : > { %v4829_v13 = vadd.f32 %v4828_v4, %v4815_v15  ;;  %v8184_v15 = vld [vmem:[%s11449_s17 + $0x18c] sm:$0xf]  ;;  %v7550_v4 = vld [vmem:[%s11449_s17 + $0x198] sm:$0xf0] }
 0x76a   : > { %v4816_v1 = vpop.f32.mrf.mxu2  ;;  %v7553_v59 = vor.u32 %v8184_v15, %v7550_v4  ;;  %v8170_v15 = vld [vmem:[%s11449_s17 + $0x114] sm:$0xf0] }
 0x76b   : > { %v4867_v6 = vmul.f32 %v4863_v40, %v4829_v13  ;;  %v4817_v12 = vadd.f32 %v4816_v1, %v4641_v58  ;;  %v8146_v58 = vld [vmem:[%s11449_s17 + $0x54] sm:$0xf0]  ;;  %v4844_v13 = vpop.f32.mrf.mxu3  ;;  %v4913_v1 = vadd.f32 %v10715_v14, %v4912_v54  ;;  %v7485_v4 = vor.u32 %v8170_v15, %v7484_v27  ;;  %v7844_v27 = vld [vmem:[%s11451_s19 + $0x1e0] sm:$0xf]  ;;  %v7628_v15 = vld [vmem:[%s11451_s19 + $0x30] sm:$0xf] }
 0x76c   : > { %v7389_v7 = vor.u32 %v8146_v58, %v7388_v3  ;;  %5431 = vmatpush.bf16.msra.mxu2 %v7553_v59  ;;  %v4845_v63 = vadd.f32 %v4844_v13, %v4642_v49 }
 0x76d   : > { %v4877_v43 = vadd.f32 %v4873_v19, %v4867_v6  ;;  %v10885_v39 = vsel %vm4914_vm6, %v10715_v14, %v4913_v1  ;;  %v7660_v1 = vld [vmem:[%s11451_s19 + $0x70] sm:$0xf] }
 0x76e   : > { %5394 = vmatpush.bf16.msrb.mxu0 %v7389_v7  ;;  %v8174_v7 = vld [vmem:[%s11449_s17 + $0x134] sm:$0xf0] }
 0x76f   : > { %4881 = vst [vmem:[%s10793_s25] sm:$0xff] %v4877_v43  ;;  %v4885_v30 = vrot.slane %v4877_v43, 4 }
 0x770   : > { %v4830_v35 = vpop.f32.mrf.mxu1 }
 0x771   : > { %v4886_v45 = vadd.f32 %v4885_v30, %v4877_v43  ;;  %v4831_v37 = vadd.f32 %v4830_v35, %v4817_v12  ;;  %v8138_v43 = vld [vmem:[%s11449_s17 + $0x14] sm:$0xf0]  ;;  %v8176_v12 = vld [vmem:[%s11449_s17 + $0x14c] sm:$0xf] }
 0x772   : > { %v4856_v23 = vpop.f32.mrf.mxu2  ;;  %5395 = vmatpush.bf16.msrb.mxu0 %v7373_v11  ;;  %v7357_v49 = vor.u32 %v8138_v43, %v7356_v36  ;;  %v8178_v30 = vld [vmem:[%s11449_s17 + $0x154] sm:$0xf0]  ;;  %v7521_v3 = vor.u32 %v8176_v12, %v7518_v28  ;;  %v7788_v43 = vld [vmem:[%s11451_s19 + $0x170] sm:$0xf] }
 0x773   : > { %v4887_v18 = vrot.slane %v4886_v45, 2  ;;  %v4869_v57 = vmul.f32 %v4863_v40, %v4831_v37  ;;  %v4857_v38 = vadd.f32 %v4856_v23, %v4843_v9  ;;  %v8140_v40 = vld [vmem:[%s11449_s17 + $0x2c] sm:$0xf]  ;;  %v7517_v14 = vor.u32 %v8178_v30, %v7516_v17  ;;  %v7500_v37 = vld [vmem:[%s11449_s17 + $0x128] sm:$0xf] }
 0x774   : > { %v7377_v0 = vor.u32 %v8140_v40, %v7374_v60  ;;  %v7501_v55 = vor.u32 %v8174_v7, %v7500_v37  ;;  %v7789_v47 = vor.u32 %v8246_v2, %v7788_v43  ;;  %v8210_v17 = vld [vmem:[%s11451_s19 + $0x54] sm:$0xf0]  ;;  %v7724_v30 = vld [vmem:[%s11451_s19 + $0xf0] sm:$0xf] }
 0x775   : > { %v4888_v16 = vadd.f32 %v4887_v18, %v4886_v45  ;;  %v4879_v24 = vadd.f32 %v4873_v19, %v4869_v57  ;;  %v4868_v20 = vmul.f32 %v4864_v8, %v4857_v38  ;;  %v8180_v19 = vld [vmem:[%s11449_s17 + $0x16c] sm:$0xf]  ;;  %5407 = vmatpush.bf16.msra.mxu1 %v7517_v14  ;;  %v8230_v28 = vld [vmem:[%s11451_s19 + $0xf4] sm:$0xf0]  ;;  %v7676_v2 = vld [vmem:[%s11451_s19 + $0x90] sm:$0xf] }
 0x776   : > { %5421 = vmatpush.bf16.msra.mxu3 %v7377_v0  ;;  %v7537_v29 = vor.u32 %v8180_v19, %v7534_v32  ;;  %5396 = vmatpush.bf16.msrb.mxu0 %v7357_v49  ;;  %v8214_v0 = vld [vmem:[%s11451_s19 + $0x74] sm:$0xf0]  ;;  %v7644_v49 = vld [vmem:[%s11451_s19 + $0x50] sm:$0xf]  ;;  %v7725_v7 = vor.u32 %v8230_v28, %v7724_v30  ;;  %v7654_v30 = vld [vmem:[%s11451_s19 + $0x68] sm:$0xf0] }
 0x777   : > { %v4889_v62 = vrot.slane %v4888_v16, 1  ;;  %4883 = vst [vmem:[%s10793_s25 + $0x10] sm:$0xff] %v4879_v24  ;;  %v4897_v56 = vrot.slane %v4879_v24, 4  ;;  %v4878_v6 = vadd.f32 %v4874_v51, %v4868_v20  ;;  %v7661_v52 = vor.u32 %v8214_v0, %v7660_v1  ;;  %v7668_v28 = vld [vmem:[%s11451_s19 + $0x80] sm:$0xf] }
 0x778   : > { %5432 = vmatpush.bf16.msra.mxu2 %v7537_v29  ;;  %v8212_v29 = vld [vmem:[%s11451_s19 + $0x64] sm:$0xf0] }
 0x779   : > { %v4890_v22 = vadd.f32 %v4889_v62, %v4888_v16  ;;  %v4898_v34 = vadd.f32 %v4897_v56, %v4879_v24  ;;  %4882 = vst [vmem:[%s10793_s25 + $0x8] sm:$0xff] %v4878_v6  ;;  %v4891_v10 = vrot.slane %v4878_v6, 4  ;;  %5408 = vmatpush.bf16.msra.mxu1 %v7501_v55  ;;  %v8260_v55 = vld [vmem:[%s11451_s19 + $0x1e4] sm:$0xf0] }
 0x77a   : > { %v4858_v26 = vpop.f32.mrf.mxu2  ;;  %5422 = vmatpush.bf16.msra.mxu3 %v7361_v41 }
 0x77b   : > { %v4899_v44 = vrot.slane %v4898_v34, 2  ;;  %v4892_v35 = vadd.f32 %v4891_v10, %v4878_v6  ;;  %v4859_v61 = vadd.f32 %v4858_v26, %v4845_v63  ;;  %v4916_v58 = vmul.f32 %v10885_v39, %v4890_v22  ;;  %v7652_v63 = vld [vmem:[%s11451_s19 + $0x60] sm:$0xf]  ;;  %v8244_v26 = vld [vmem:[%s11451_s19 + $0x164] sm:$0xf0] }
 0x77c   : > { %5433 = vmatpush.bf16.msra.mxu2 %v7521_v3  ;;  %v7653_v10 = vor.u32 %v8212_v29, %v7652_v63  ;;  %v7645_v3 = vor.u32 %v8210_v17, %v7644_v49  ;;  %v8213_v63 = vld [vmem:[%s11451_s19 + $0x74] sm:$0xf]  ;;  %v7662_v29 = vld [vmem:[%s11451_s19 + $0x78] sm:$0xf0]  ;;  %v8258_v49 = vld [vmem:[%s11451_s19 + $0x1d4] sm:$0xf0] }
 0x77d   : > { %v4900_v21 = vadd.f32 %v4899_v44, %v4898_v34  ;;  %v4893_v9 = vrot.slane %v4892_v35, 2  ;;  %v4870_v45 = vmul.f32 %v4864_v8, %v4859_v61  ;;  %v7502_v8 = vld [vmem:[%s11449_s17 + $0x138] sm:$0xf0]  ;;  %v4920_v18 = vmax.f32 %v4916_v58, 0.0  ;;  %5409 = vmatpush.bf16.msra.mxu1 %v7485_v4  ;;  %v7852_v44 = vld [vmem:[%s11451_s19 + $0x1f0] sm:$0xf] }
 0x77e   : > { %v7505_v5 = vor.u32 %v8172_v48, %v7502_v8  ;;  %v7772_v58 = vld [vmem:[%s11451_s19 + $0x150] sm:$0xf]  ;;  %v7716_v48 = vld [vmem:[%s11451_s19 + $0xe0] sm:$0xf]  ;;  %v7665_v43 = vor.u32 %v8213_v63, %v7662_v29  ;;  %v8238_v17 = vld [vmem:[%s11451_s19 + $0x134] sm:$0xf0] }
 0x77f   : > { %v4901_v54 = vrot.slane %v4900_v21, 1  ;;  %v4894_v23 = vadd.f32 %v4893_v9, %v4892_v35  ;;  %v4880_v53 = vadd.f32 %v4874_v51, %v4870_v45  ;;  %v7486_v51 = vld [vmem:[%s11449_s17 + $0x118] sm:$0xf0]  ;;  %v4924_v60 = vpack.c.bf16 %v4920_v18, %v4920_v18  ;;  %v8262_v35 = vld [vmem:[%s11451_s19 + $0x1f4] sm:$0xf0] }
 0x780   : > { %5434 = vmatpush.bf16.msra.mxu2 %v7505_v5  ;;  %v7489_v40 = vor.u32 %v8168_v42, %v7486_v51  ;;  %v7636_v9 = vld [vmem:[%s11451_s19 + $0x40] sm:$0xf]  ;;  %v8208_v45 = vld [vmem:[%s11451_s19 + $0x44] sm:$0xf0]  ;;  %v8206_v42 = vld [vmem:[%s11451_s19 + $0x34] sm:$0xf0]  ;;  %v7845_v18 = vor.u32 %v8260_v55, %v7844_v27 }
 0x781   : > { %v4902_v57 = vadd.f32 %v4901_v54, %v4900_v21  ;;  %v4895_v38 = vrot.slane %v4894_v23, 1  ;;  %4884 = vst [vmem:[%s10793_s25 + $0x18] sm:$0xff] %v4880_v53  ;;  %v4903_v31 = vrot.slane %v4880_v53, 4  ;;  %v5006_v33 = vunpack.c.l.b16 %v4924_v60  ;;  %v8242_v21 = vld [vmem:[%s11451_s19 + $0x154] sm:$0xf0] }
 0x782   : > { %v7853_v54 = vor.u32 %v8262_v35, %v7852_v44  ;;  %v7773_v8 = vor.u32 %v8242_v21, %v7772_v58  ;;  %v7637_v5 = vor.u32 %v8208_v45, %v7636_v9  ;;  %v7620_v4 = vld [vmem:[%s11451_s19 + $0x20] sm:$0xf]  ;;  %v8216_v44 = vld [vmem:[%s11451_s19 + $0x84] sm:$0xf0]  ;;  %v7726_v58 = vld [vmem:[%s11451_s19 + $0xf8] sm:$0xf0] }
 0x783   : > { %v4918_v50 = vmul.f32 %v10885_v39, %v4902_v57  ;;  %v4896_v59 = vadd.f32 %v4895_v38, %v4894_v23  ;;  %v4904_v46 = vadd.f32 %v4903_v31, %v4880_v53  ;;  %v8228_v53 = vld [vmem:[%s11451_s19 + $0xe4] sm:$0xf0]  ;;  %v7708_v57 = vld [vmem:[%s11451_s19 + $0xd0] sm:$0xf]  ;;  %v8226_v38 = vld [vmem:[%s11451_s19 + $0xd4] sm:$0xf0]  ;;  %v7629_v31 = vor.u32 %v8206_v42, %v7628_v15 }
 0x784   : > { %5435 = vmatpush.bf16.msra.mxu2 %v7489_v40  ;;  %v7717_v51 = vor.u32 %v8228_v53, %v7716_v48  ;;  %v8224_v40 = vld [vmem:[%s11451_s19 + $0xc4] sm:$0xf0]  ;;  %v7828_v35 = vld [vmem:[%s11451_s19 + $0x1c0] sm:$0xf]  ;;  %v8209_v48 = vld [vmem:[%s11451_s19 + $0x54] sm:$0xf] }
 0x785   : > { %v4922_v16 = vmax.f32 %v4918_v50, 0.0  ;;  %v4905_v13 = vrot.slane %v4904_v46, 2  ;;  %v4917_v20 = vmul.f32 %v10885_v39, %v4896_v59  ;;  %v8204_v50 = vld [vmem:[%s11451_s19 + $0x24] sm:$0xf0]  ;;  %v7709_v59 = vor.u32 %v8226_v38, %v7708_v57  ;;  %v7748_v45 = vld [vmem:[%s11451_s19 + $0x120] sm:$0xf] }
 0x786   : > { %v7621_v60 = vor.u32 %v8204_v50, %v7620_v4  ;;  %v7820_v53 = vld [vmem:[%s11451_s19 + $0x1b0] sm:$0xf]  ;;  %v8227_v55 = vld [vmem:[%s11451_s19 + $0xe4] sm:$0xf]  ;;  %v7638_v38 = vld [vmem:[%s11451_s19 + $0x48] sm:$0xf0] }
 0x787   : > { %v4926_v24 = vpack.c.bf16 %v4922_v16, %v4922_v16  ;;  %v4906_v11 = vadd.f32 %v4905_v13, %v4904_v46  ;;  %v4921_v62 = vmax.f32 %v4917_v20, 0.0  ;;  %v7700_v46 = vld [vmem:[%s11451_s19 + $0xc0] sm:$0xf]  ;;  %v7612_v16 = vld [vmem:[%s11451_s19 + $0x10] sm:$0xf] }
 0x788   : > { %v8202_v13 = vld [vmem:[%s11451_s19 + $0x14] sm:$0xf0]  ;;  %v7692_v20 = vld [vmem:[%s11451_s19 + $0xb0] sm:$0xf]  ;;  %v8207_v57 = vld [vmem:[%s11451_s19 + $0x44] sm:$0xf] }
 0x789   : > { %v5008_v25 = vunpack.c.l.b16 %v4926_v24  ;;  %v4907_v19 = vrot.slane %v4906_v11, 1  ;;  %v4925_v22 = vpack.c.bf16 %v4921_v62, %v4921_v62  ;;  %v7701_v24 = vor.u32 %v8224_v40, %v7700_v46  ;;  %v7604_v62 = vld [vmem:[%s11451_s19] sm:$0xf]  ;;  %v7740_v42 = vld [vmem:[%s11451_s19 + $0x110] sm:$0xf] }
 0x78a   : > { %v7613_v1 = vor.u32 %v8202_v13, %v7612_v16  ;;  %v7812_v4 = vld [vmem:[%s11451_s19 + $0x1a0] sm:$0xf]  ;;  %v8252_v50 = vld [vmem:[%s11451_s19 + $0x1a4] sm:$0xf0]  ;;  %v8225_v46 = vld [vmem:[%s11451_s19 + $0xd4] sm:$0xf] }
 0x78b   : > { %v4908_v56 = vadd.f32 %v4907_v19, %v4906_v11  ;;  %v5011_v6 = vsel %vm5010_vm7, %v5008_v25, %v5006_v33  ;;  %v5007_v61 = vunpack.c.l.b16 %v4925_v22  ;;  %v8222_v11 = vld [vmem:[%s11451_s19 + $0xb4] sm:$0xf0]  ;;  %v7684_v33 = vld [vmem:[%s11451_s19 + $0xa0] sm:$0xf]  ;;  %v8220_v25 = vld [vmem:[%s11451_s19 + $0xa4] sm:$0xf0] }
 0x78c   : > { %v5013_v32 = vpack.c.b16 %v5011_v6, %v5011_v6  ;;  %v7693_v0 = vor.u32 %v8222_v11, %v7692_v20  ;;  %v7685_v19 = vor.u32 %v8220_v25, %v7684_v33  ;;  %v7764_v6 = vld [vmem:[%s11451_s19 + $0x140] sm:$0xf]  ;;  %v8218_v22 = vld [vmem:[%s11451_s19 + $0x94] sm:$0xf0]  ;;  %v7710_v40 = vld [vmem:[%s11451_s19 + $0xd8] sm:$0xf0] }
 0x78d   : > { %v4919_v36 = vmul.f32 %v10885_v39, %v4908_v56  ;;  %v7780_v39 = vld [vmem:[%s11451_s19 + $0x160] sm:$0xf]  ;;  %v8200_v56 = vld [vmem:[%s11451_s19 + $0x4] sm:$0xf0]  ;;  %v8205_v20 = vld [vmem:[%s11451_s19 + $0x34] sm:$0xf] }
 0x78e   : > { %5345 = vmatmul.bf16.vlgmr.msra.gmra.mxu0 %v5013_v32  ;;  %5371 = vmatmul.bf16.vlgmr.msrb.gmra.mxu3 %v5013_v32  ;;  %v7781_v12 = vor.u32 %v8244_v26, %v7780_v39  ;;  %v7732_v16 = vld [vmem:[%s11451_s19 + $0x100] sm:$0xf]  ;;  %v8232_v13 = vld [vmem:[%s11451_s19 + $0x104] sm:$0xf0]  ;;  %v7630_v11 = vld [vmem:[%s11451_s19 + $0x38] sm:$0xf0] }
 0x78f   : > { %v4923_v34 = vmax.f32 %v4919_v36, 0.0  ;;  %5839 = vmatpush.bf16.msra.mxu0 %v7661_v52  ;;  %5865 = vmatpush.bf16.msrb.mxu3 %v7789_v47  ;;  %v7605_v52 = vor.u32 %v8200_v56, %v7604_v62  ;;  %v7756_v47 = vld [vmem:[%s11451_s19 + $0x130] sm:$0xf]  ;;  %v7790_v33 = vld [vmem:[%s11451_s19 + $0x178] sm:$0xf0] }
 0x790   : > { %v7757_v26 = vor.u32 %v8238_v17, %v7756_v47  ;;  %v7804_v25 = vld [vmem:[%s11451_s19 + $0x190] sm:$0xf]  ;;  %v8250_v62 = vld [vmem:[%s11451_s19 + $0x194] sm:$0xf0]  ;;  %v8223_v56 = vld [vmem:[%s11451_s19 + $0xc4] sm:$0xf] }
 0x791   : > { %v4927_v41 = vpack.c.bf16 %v4923_v34, %v4923_v34  ;;  %v7836_v34 = vld [vmem:[%s11451_s19 + $0x1d0] sm:$0xf]  ;;  %v8203_v63 = vld [vmem:[%s11451_s19 + $0x24] sm:$0xf]  ;;  %v7622_v29 = vld [vmem:[%s11451_s19 + $0x28] sm:$0xf0] }
 0x792   : > { %v7837_v39 = vor.u32 %v8258_v49, %v7836_v34  ;;  %v8248_v34 = vld [vmem:[%s11451_s19 + $0x184] sm:$0xf0]  ;;  %v8221_v47 = vld [vmem:[%s11451_s19 + $0xb4] sm:$0xf]  ;;  %v7694_v17 = vld [vmem:[%s11451_s19 + $0xb8] sm:$0xf0] }
 0x793   : > { %v5009_v14 = vunpack.c.l.b16 %v4927_v41  ;;  %5840 = vmatpush.bf16.msra.mxu0 %v7653_v10  ;;  %5866 = vmatpush.bf16.msrb.mxu3 %v7781_v12  ;;  %v7677_v10 = vor.u32 %v8218_v22, %v7676_v2  ;;  %v8211_v41 = vld [vmem:[%s11451_s19 + $0x64] sm:$0xf]  ;;  %v7782_v2 = vld [vmem:[%s11451_s19 + $0x168] sm:$0xf0]  ;;  %v7796_v22 = vld [vmem:[%s11451_s19 + $0x180] sm:$0xf] }
 0x794   : > { %v7657_v12 = vor.u32 %v8211_v41, %v7654_v30  ;;  %v7797_v49 = vor.u32 %v8248_v34, %v7796_v22  ;;  %v7854_v41 = vld [vmem:[%s11451_s19 + $0x1f8] sm:$0xf0]  ;;  %v8249_v22 = vld [vmem:[%s11451_s19 + $0x194] sm:$0xf] }
 0x795   : > { %v5012_v37 = vsel %vm5010_vm7, %v5009_v14, %v5007_v61  ;;  %v7669_v61 = vor.u32 %v8216_v44, %v7668_v28  ;;  %v8256_v14 = vld [vmem:[%s11451_s19 + $0x1c4] sm:$0xf0]  ;;  %v7614_v28 = vld [vmem:[%s11451_s19 + $0x18] sm:$0xf0]  ;;  %v8241_v44 = vld [vmem:[%s11451_s19 + $0x154] sm:$0xf] }
 0x796   : > { %v5014_v23 = vpack.c.b16 %v5012_v37, %v5012_v37  ;;  %v7829_v21 = vor.u32 %v8256_v14, %v7828_v35  ;;  %v8236_v37 = vld [vmem:[%s11451_s19 + $0x124] sm:$0xf0]  ;;  %v7806_v34 = vld [vmem:[%s11451_s19 + $0x198] sm:$0xf0] }
 0x797   : > { %5841 = vmatpush.bf16.msra.mxu0 %v7645_v3  ;;  %5867 = vmatpush.bf16.msrb.mxu3 %v7773_v8  ;;  %v8229_v3 = vld [vmem:[%s11451_s19 + $0xf4] sm:$0xf]  ;;  %v8254_v8 = vld [vmem:[%s11451_s19 + $0x1b4] sm:$0xf0] }
 0x798   : > { %5358 = vmatmul.bf16.vlgmr.msrb.gmra.mxu1 %v5014_v23  ;;  %5384 = vmatmul.bf16.vlgmr.msrb.gmra.mxu2 %v5014_v23  ;;  %v7729_v9 = vor.u32 %v8229_v3, %v7726_v58  ;;  %v7821_v27 = vor.u32 %v8254_v8, %v7820_v53  ;;  %v8219_v3 = vld [vmem:[%s11451_s19 + $0xa4] sm:$0xf]  ;;  %v7686_v58 = vld [vmem:[%s11451_s19 + $0xa8] sm:$0xf0] }
 0x799   : > { %5852 = vmatpush.bf16.msrb.mxu1 %v7725_v7  ;;  %5878 = vmatpush.bf16.msrb.mxu2 %v7853_v54  ;;  %v7749_v7 = vor.u32 %v8236_v37, %v7748_v45  ;;  %v7646_v54 = vld [vmem:[%s11451_s19 + $0x58] sm:$0xf0]  ;;  %v7846_v45 = vld [vmem:[%s11451_s19 + $0x1e8] sm:$0xf0] }
 0x79a   : > { %v7766_v53 = vld [vmem:[%s11451_s19 + $0x148] sm:$0xf0] }
 0x79b   : > { %5842 = vmatpush.bf16.msra.mxu0 %v7637_v5  ;;  %v7718_v5 = vld [vmem:[%s11451_s19 + $0xe8] sm:$0xf0] }
 0x79c   : > { %v7721_v15 = vor.u32 %v8227_v55, %v7718_v5  ;;  %v7678_v55 = vld [vmem:[%s11451_s19 + $0x98] sm:$0xf0]  ;;  %v8257_v5 = vld [vmem:[%s11451_s19 + $0x1d4] sm:$0xf] }
 0x79d   : > { %5853 = vmatpush.bf16.msrb.mxu1 %v7717_v51  ;;  %5879 = vmatpush.bf16.msrb.mxu2 %v7845_v18  ;;  %v8234_v51 = vld [vmem:[%s11451_s19 + $0x114] sm:$0xf0] }
 0x79e   : > { %5397 = vmatmul.bf16.vlgmr.msrb.gmra.mxu0 %v5013_v32  ;;  %5423 = vmatmul.bf16.vlgmr.msra.gmra.mxu3 %v5013_v32  ;;  %v8240_v32 = vld [vmem:[%s11451_s19 + $0x144] sm:$0xf0]  ;;  %v7741_v18 = vor.u32 %v8234_v51, %v7740_v42  ;;  %v7838_v42 = vld [vmem:[%s11451_s19 + $0x1d8] sm:$0xf0] }
 0x79f   : > { %5843 = vmatpush.bf16.msra.mxu0 %v7629_v31  ;;  %v7765_v36 = vor.u32 %v8240_v32, %v7764_v6  ;;  %v7641_v31 = vor.u32 %v8207_v57, %v7638_v38  ;;  %v7702_v6 = vld [vmem:[%s11451_s19 + $0xc8] sm:$0xf0]  ;;  %v7841_v51 = vor.u32 %v8257_v5, %v7838_v42  ;;  %v7758_v57 = vld [vmem:[%s11451_s19 + $0x138] sm:$0xf0] }
 0x7a0   : > { %v7705_v32 = vor.u32 %v8223_v56, %v7702_v6 }
 0x7a1   : > { %5854 = vmatpush.bf16.msrb.mxu1 %v7709_v59  ;;  %5868 = vmatpush.bf16.msrb.mxu3 %v7765_v36  ;;  %v7813_v59 = vor.u32 %v8252_v50, %v7812_v4  ;;  %v8243_v36 = vld [vmem:[%s11451_s19 + $0x164] sm:$0xf]  ;;  %v7670_v50 = vld [vmem:[%s11451_s19 + $0x88] sm:$0xf0] }
 0x7a2   : > { %5880 = vmatpush.bf16.msrb.mxu2 %v7837_v39  ;;  %v7697_v39 = vor.u32 %v8221_v47, %v7694_v17  ;;  %v8215_v4 = vld [vmem:[%s11451_s19 + $0x84] sm:$0xf] }
 0x7a3   : > { %5844 = vmatpush.bf16.msra.mxu0 %v7621_v60  ;;  %v7713_v60 = vor.u32 %v8225_v46, %v7710_v40  ;;  %v11273_v46 = vld [vmem:[%s11450_s18] sm:$0xf]  ;;  %v7673_v40 = vor.u32 %v8215_v4, %v7670_v50  ;;  %v8269_v4 = vld [vmem:[%s11453_s21 + $0x30] sm:$0xff]  ;;  %v8268_v50 = vld [vmem:[%s11453_s21 + $0x28] sm:$0xff] }
 0x7a5   : > { %5855 = vmatpush.bf16.msrb.mxu1 %v7701_v24  ;;  %5869 = vmatpush.bf16.msrb.mxu3 %v7757_v26  ;;  %v7733_v24 = vor.u32 %v8232_v13, %v7732_v16  ;;  %v8261_v26 = vld [vmem:[%s11451_s19 + $0x1f4] sm:$0xf]  ;;  %v8235_v13 = vld [vmem:[%s11451_s19 + $0x124] sm:$0xf] }
 0x7a6   : > { %5881 = vmatpush.bf16.msrb.mxu2 %v7829_v21  ;;  %v7857_v30 = vor.u32 %v8261_v26, %v7854_v41  ;;  %v8259_v21 = vld [vmem:[%s11451_s19 + $0x1e4] sm:$0xf] }
 0x7a7   : > { %5845 = vmatpush.bf16.msra.mxu0 %v7613_v1  ;;  %v7633_v1 = vor.u32 %v8205_v20, %v7630_v11  ;;  %v7849_v37 = vor.u32 %v8259_v21, %v7846_v45  ;;  %v4994_v11 = vperm.slane %v11273_v46, 0 }
 0x7a8   : > { %5410 = vmatmul.bf16.vlgmr.msra.gmra.mxu1 %v5014_v23  ;;  %5436 = vmatmul.bf16.vlgmr.msra.gmra.mxu2 %v5014_v23  ;;  %v7649_v23 = vor.u32 %v8209_v48, %v7646_v54  ;;  %v7606_v48 = vld [vmem:[%s11451_s19 + $0x8] sm:$0xf0]  ;;  %v8239_v54 = vld [vmem:[%s11451_s19 + $0x144] sm:$0xf] }
 0x7a9   : > { %5856 = vmatpush.bf16.msrb.mxu1 %v7693_v0  ;;  %5870 = vmatpush.bf16.msrb.mxu3 %v7749_v7  ;;  %v8245_v0 = vld [vmem:[%s11451_s19 + $0x174] sm:$0xf]  ;;  %v8199_v7 = vld [vmem:[%s11451_s19 + $0x4] sm:$0xf]  ;;  %v7769_v8 = vor.u32 %v8239_v54, %v7766_v53 }
 0x7aa   : > { %5882 = vmatpush.bf16.msrb.mxu2 %v7821_v27  ;;  %v8217_v27 = vld [vmem:[%s11451_s19 + $0x94] sm:$0xf] }
 0x7ab   : > { %5846 = vmatpush.bf16.msra.mxu0 %v7605_v52  ;;  %v7805_v52 = vor.u32 %v8250_v62, %v7804_v25  ;;  %v7742_v62 = vld [vmem:[%s11451_s19 + $0x118] sm:$0xf0] }
 0x7ad   : > { %5857 = vmatpush.bf16.msrb.mxu1 %v7685_v19  ;;  %5871 = vmatpush.bf16.msrb.mxu3 %v7741_v18  ;;  %v7793_v19 = vor.u32 %v8245_v0, %v7790_v33  ;;  %v8237_v18 = vld [vmem:[%s11451_s19 + $0x134] sm:$0xf]  ;;  %v7822_v0 = vld [vmem:[%s11451_s19 + $0x1b8] sm:$0xf0] }
 0x7ae   : > { %5883 = vmatpush.bf16.msrb.mxu2 %v7813_v59  ;;  %v8255_v59 = vld [vmem:[%s11451_s19 + $0x1c4] sm:$0xf] }
 0x7af   : > { %5891 = vmatpush.bf16.msrb.mxu0 %v7665_v43  ;;  %v7625_v43 = vor.u32 %v8203_v63, %v7622_v29  ;;  %v8231_v63 = vld [vmem:[%s11451_s19 + $0x104] sm:$0xf] }
 0x7b1   : > { %5858 = vmatpush.bf16.msrb.mxu1 %v7677_v10  ;;  %5872 = vmatpush.bf16.msrb.mxu3 %v7733_v24  ;;  %v7785_v10 = vor.u32 %v8243_v36, %v7782_v2  ;;  %v7750_v24 = vld [vmem:[%s11451_s19 + $0x128] sm:$0xf0] }
 0x7b2   : > { %5884 = vmatpush.bf16.msrb.mxu2 %v7805_v52  ;;  %v7753_v20 = vor.u32 %v8235_v13, %v7750_v24  ;;  %v8251_v52 = vld [vmem:[%s11451_s19 + $0x1a4] sm:$0xf]  ;;  %v8264_v13 = vld [vmem:[%s11453_s21 + $0x8] sm:$0xff] }
 0x7b3   : > { %5892 = vmatpush.bf16.msrb.mxu0 %v7657_v12  ;;  %v8201_v12 = vld [vmem:[%s11451_s19 + $0x14] sm:$0xf]  ;;  %v8276_v24 = vld [vmem:[%s11453_s21 + $0x68] sm:$0xff] }
 0x7b4   : > { %v7617_v35 = vor.u32 %v8201_v12, %v7614_v28 }
 0x7b5   : > { %5859 = vmatpush.bf16.msrb.mxu1 %v7669_v61  ;;  %5917 = vmatpush.bf16.msra.mxu3 %v7793_v19  ;;  %v7774_v61 = vld [vmem:[%s11451_s19 + $0x158] sm:$0xf0]  ;;  %v8233_v19 = vld [vmem:[%s11451_s19 + $0x114] sm:$0xf] }
 0x7b6   : > { %5885 = vmatpush.bf16.msrb.mxu2 %v7797_v49  ;;  %v7777_v14 = vor.u32 %v8241_v44, %v7774_v61  ;;  %v7745_v6 = vor.u32 %v8233_v19, %v7742_v62  ;;  %v7798_v61 = vld [vmem:[%s11451_s19 + $0x188] sm:$0xf0] }
 0x7b7   : > { %5893 = vmatpush.bf16.msrb.mxu0 %v7649_v23  ;;  %v7609_v23 = vor.u32 %v8199_v7, %v7606_v48  ;;  %v8272_v62 = vld [vmem:[%s11453_s21 + $0x48] sm:$0xff] }
 0x7b9   : > { %5904 = vmatpush.bf16.msra.mxu1 %v7729_v9  ;;  %5918 = vmatpush.bf16.msra.mxu3 %v7785_v10  ;;  %v7689_v9 = vor.u32 %v8219_v3, %v7686_v58  ;;  %v4995_v10 = vperm.slane %v11273_v46, 1 }
 0x7ba   : > { %5930 = vmatpush.bf16.msra.mxu2 %v7857_v30 }
 0x7bb   : > { %5894 = vmatpush.bf16.msrb.mxu0 %v7641_v31  ;;  %v7761_v31 = vor.u32 %v8237_v18, %v7758_v57 }
 0x7bd   : > { %5905 = vmatpush.bf16.msra.mxu1 %v7721_v15  ;;  %5919 = vmatpush.bf16.msra.mxu3 %v7777_v14  ;;  %v7681_v15 = vor.u32 %v8217_v27, %v7678_v55 }
 0x7be   : > { %5931 = vmatpush.bf16.msra.mxu2 %v7849_v37 }
 0x7bf   : > { %5895 = vmatpush.bf16.msrb.mxu0 %v7633_v1  ;;  %v8253_v1 = vld [vmem:[%s11451_s19 + $0x1b4] sm:$0xf] }
 0x7c0   : > { %v7825_v25 = vor.u32 %v8253_v1, %v7822_v0  ;;  %v8274_v0 = vld [vmem:[%s11453_s21 + $0x58] sm:$0xff] }
 0x7c1   : > { %5906 = vmatpush.bf16.msra.mxu1 %v7713_v60  ;;  %5920 = vmatpush.bf16.msra.mxu3 %v7769_v8  ;;  %v7830_v60 = vld [vmem:[%s11451_s19 + $0x1c8] sm:$0xf0] }
 0x7c2   : > { %5932 = vmatpush.bf16.msra.mxu2 %v7841_v51  ;;  %v7833_v16 = vor.u32 %v8255_v59, %v7830_v60  ;;  %v8267_v59 = vld [vmem:[%s11453_s21 + $0x20] sm:$0xff]  ;;  %v8265_v60 = vld [vmem:[%s11453_s21 + $0x10] sm:$0xff] }
 0x7c3   : > { %5896 = vmatpush.bf16.msrb.mxu0 %v7625_v43  ;;  %v7734_v43 = vld [vmem:[%s11451_s19 + $0x108] sm:$0xf0] }
 0x7c4   : > { %v7737_v47 = vor.u32 %v8231_v63, %v7734_v43 }
 0x7c5   : > { %5907 = vmatpush.bf16.msra.mxu1 %v7705_v32  ;;  %5921 = vmatpush.bf16.msra.mxu3 %v7761_v31  ;;  %v7814_v32 = vld [vmem:[%s11451_s19 + $0x1a8] sm:$0xf0]  ;;  %v8270_v31 = vld [vmem:[%s11453_s21 + $0x38] sm:$0xff] }
 0x7c6   : > { %5933 = vmatpush.bf16.msra.mxu2 %v7833_v16  ;;  %v7817_v36 = vor.u32 %v8251_v52, %v7814_v32  ;;  %v8277_v16 = vld [vmem:[%s11453_s21 + $0x70] sm:$0xff]  ;;  %v5513_v52 = vld [vmem:[%s11452_s20] sm:$0x3] }
 0x7c7   : > { %5897 = vmatpush.bf16.msrb.mxu0 %v7617_v35  ;;  %v8247_v35 = vld [vmem:[%s11451_s19 + $0x184] sm:$0xf]  ;;  %v5515_v63 = vperm.slane %v5513_v52, 0 }
 0x7c8   : > { %v7801_v3 = vor.u32 %v8247_v35, %v7798_v61 }
 0x7c9   : > { %5908 = vmatpush.bf16.msra.mxu1 %v7697_v39  ;;  %5922 = vmatpush.bf16.msra.mxu3 %v7753_v20  ;;  %v7809_v39 = vor.u32 %v8249_v22, %v7806_v34  ;;  %v8263_v20 = vld [vmem:[%s11453_s21] sm:$0xff] }
 0x7ca   : > { %5934 = vmatpush.bf16.msra.mxu2 %v7825_v25  ;;  %v8273_v25 = vld [vmem:[%s11453_s21 + $0x50] sm:$0xff] }
 0x7cb   : > { %5898 = vmatpush.bf16.msrb.mxu0 %v7609_v23  ;;  %v4997_v23 = vperm.slane %v11273_v46, 3 }
 0x7cd   : > { %5909 = vmatpush.bf16.msra.mxu1 %v7689_v9  ;;  %5923 = vmatpush.bf16.msra.mxu3 %v7745_v6  ;;  %v4996_v9 = vperm.slane %v11273_v46, 2  ;;  %v8266_v46 = vld [vmem:[%s11453_s21 + $0x18] sm:$0xff]  ;;  %v8271_v6 = vld [vmem:[%s11453_s21 + $0x40] sm:$0xff] }
 0x7ce   : > { %5935 = vmatpush.bf16.msra.mxu2 %v7817_v36 }
 0x7d1   : > { %5910 = vmatpush.bf16.msra.mxu1 %v7681_v15  ;;  %5924 = vmatpush.bf16.msra.mxu3 %v7737_v47 }
 0x7d2   : > { %5936 = vmatpush.bf16.msra.mxu2 %v7809_v39 }
 0x7d5   : > { %5911 = vmatpush.bf16.msra.mxu1 %v7673_v40  ;;  %v8278_v40 = vld [vmem:[%s11453_s21 + $0x78] sm:$0xff] }
 0x7d6   : > { %5937 = vmatpush.bf16.msra.mxu2 %v7801_v3 }
 0x80b   : > { %v5346_v38 = vpop.f32.mrf.mxu0 }
 0x80c   : > { %v5347_v29 = vadd.f32 %v5346_v38, %v4994_v11  ;;  %v8275_v11 = vld [vmem:[%s11453_s21 + $0x60] sm:$0xff] }
 0x811   : > { %v5372_v33 = vpop.f32.mrf.mxu3 }
 0x812   : > { %v5373_v41 = vadd.f32 %v5372_v33, %v4995_v10 }
 0x813   : > { %v5348_v56 = vpop.f32.mrf.mxu0 }
 0x815   : > { %v5359_v2 = vpop.f32.mrf.mxu1 }
 0x816   : > { %v5360_v49 = vadd.f32 %v5359_v2, %v5347_v29 }
 0x818   : > { %v5441_v17 = vmax.f32 %v5360_v49, 0.0 }
 0x819   : > { %v5374_v26 = vpop.f32.mrf.mxu3 }
 0x81a   : > { %v5445_v30 = vpack.c.bf16 %v5441_v17, %v5441_v17 }
 0x81b   : > { %v5385_v12 = vpop.f32.mrf.mxu2  ;;  %v5398_v28 = vpop.f32.mrf.mxu0 }
 0x81c   : > { %v5386_v44 = vadd.f32 %v5385_v12, %v5373_v41  ;;  %5847 = vmatmul.bf16.vlgmr.msra.gmra.mxu0 %v5445_v30  ;;  %v5399_v48 = vadd.f32 %v5398_v28, %v4996_v9  ;;  %v5516_v41 = vperm.slane %v5513_v52, 1 }
 0x81d   : > { %v5361_v14 = vpop.f32.mrf.mxu1  ;;  %6079 = vmatpush.bf16.msra.mxu0 %v8270_v31 }
 0x81e   : > { %v5442_v58 = vmax.f32 %v5386_v44, 0.0 }
 0x820   : > { %v5446_v21 = vpack.c.bf16 %v5442_v58, %v5442_v58 }
 0x821   : > { %v5424_v45 = vpop.f32.mrf.mxu3  ;;  %6080 = vmatpush.bf16.msra.mxu0 %v8269_v4 }
 0x822   : > { %5860 = vmatmul.bf16.vlgmr.msrb.gmra.mxu1 %v5446_v21  ;;  %v5425_v55 = vadd.f32 %v5424_v45, %v4997_v23 }
 0x823   : > { %v5387_v37 = vpop.f32.mrf.mxu2  ;;  %v5400_v7 = vpop.f32.mrf.mxu0  ;;  %6092 = vmatpush.bf16.msrb.mxu1 %v8278_v40 }
 0x824   : > { %v8332_v7 = vld [vmem:[%s11454_s22] ss:$0 sm:$0xff] }
 0x825   : > { %v5411_v54 = vpop.f32.mrf.mxu1  ;;  %6081 = vmatpush.bf16.msra.mxu0 %v8268_v50 }
 0x826   : > { %v5412_v53 = vadd.f32 %v5411_v54, %v5399_v48 }
 0x827   : > { %6093 = vmatpush.bf16.msrb.mxu1 %v8277_v16 }
 0x828   : > { %v5443_v8 = vmax.f32 %v5412_v53, 0.0 }
 0x829   : > { %v5426_v27 = vpop.f32.mrf.mxu3  ;;  %6082 = vmatpush.bf16.msra.mxu0 %v8267_v59 }
 0x82a   : > { %v5447_v5 = vpack.c.bf16 %v5443_v8, %v5443_v8 }
 0x82b   : > { %v5437_v15 = vpop.f32.mrf.mxu2  ;;  %6094 = vmatpush.bf16.msrb.mxu1 %v8276_v24 }
 0x82c   : > { %v5438_v42 = vadd.f32 %v5437_v15, %v5425_v55  ;;  %5873 = vmatmul.bf16.vlgmr.msrb.gmra.mxu3 %v5447_v5  ;;  %5899 = vmatmul.bf16.vlgmr.msrb.gmra.mxu0 %v5445_v30 }
 0x82d   : > { %v5413_v51 = vpop.f32.mrf.mxu1  ;;  %6083 = vmatpush.bf16.msra.mxu0 %v8266_v46 }
 0x82e   : > { %v5444_v18 = vmax.f32 %v5438_v42, 0.0 }
 0x82f   : > { %6095 = vmatpush.bf16.msrb.mxu1 %v8275_v11 }
 0x830   : > { %v5448_v57 = vpack.c.bf16 %v5444_v18, %v5444_v18 }
 0x831   : > { %6084 = vmatpush.bf16.msra.mxu0 %v8265_v60 }
 0x832   : > { %5886 = vmatmul.bf16.vlgmr.msrb.gmra.mxu2 %v5448_v57  ;;  %5912 = vmatmul.bf16.vlgmr.msra.gmra.mxu1 %v5446_v21 }
 0x833   : > { %v5439_v38 = vpop.f32.mrf.mxu2  ;;  %6096 = vmatpush.bf16.msrb.mxu1 %v8274_v0 }
 0x835   : > { %6085 = vmatpush.bf16.msra.mxu0 %v8264_v13 }
 0x837   : > { %6097 = vmatpush.bf16.msrb.mxu1 %v8273_v25 }
 0x839   : > { %6086 = vmatpush.bf16.msra.mxu0 %v8263_v20 }
 0x83b   : > { %6098 = vmatpush.bf16.msrb.mxu1 %v8272_v62 }
 0x83c   : > { %5925 = vmatmul.bf16.vlgmr.msra.gmra.mxu3 %v5447_v5 }
 0x83f   : > { %6099 = vmatpush.bf16.msrb.mxu1 %v8271_v6 }
 0x842   : > { %5938 = vmatmul.bf16.vlgmr.msra.gmra.mxu2 %v5448_v57 }
 0x899   : > { %v5848_v1 = vpop.f32.mrf.mxu0 }
 0x89a   : > { %v5849_v43 = vadd.f32 %v5848_v1, %v5515_v63 }
 0x89f   : > { %v5861_v33 = vpop.f32.mrf.mxu1 }
 0x8a0   : > { %v5862_v22 = vadd.f32 %v5861_v33, %v5849_v43 }
 0x8a1   : > { %v5850_v19 = vpop.f32.mrf.mxu0 }
 0x8a7   : > { %v5863_v56 = vpop.f32.mrf.mxu1 }
 0x8a9   : > { %v5900_v32 = vpop.f32.mrf.mxu0 }
 0x8aa   : > { %v5901_v28 = vadd.f32 %v5900_v32, %v5516_v41 }
 0x8af   : > { %v5874_v29 = vpop.f32.mrf.mxu3  ;;  %v5913_v36 = vpop.f32.mrf.mxu1 }
 0x8b0   : > { %v5875_v34 = vadd.f32 %v5874_v29, %v5862_v22  ;;  %v5914_v44 = vadd.f32 %v5913_v36, %v5901_v28 }
 0x8b1   : > { %v5902_v2 = vpop.f32.mrf.mxu0 }
 0x8b5   : > { %v5887_v10 = vpop.f32.mrf.mxu2 }
 0x8b6   : > { %v5888_v49 = vadd.f32 %v5887_v10, %v5875_v34 }
 0x8b7   : > { %v5876_v47 = vpop.f32.mrf.mxu3  ;;  %v5915_v17 = vpop.f32.mrf.mxu1 }
 0x8b8   : > { %v5943_v39 = vmax.f32 %v5888_v49, 0.0 }
 0x8ba   : > { %v5945_v26 = vpack.c.bf16 %v5943_v39, %v5943_v39 }
 0x8bc   : > { %6087 = vmatmul.bf16.vlgmr.msra.gmra.mxu0 %v5945_v26 }
 0x8bd   : > { %v5889_v30 = vpop.f32.mrf.mxu2 }
 0x8bf   : > { %v5926_v12 = vpop.f32.mrf.mxu3 }
 0x8c0   : > { %v5927_v35 = vadd.f32 %v5926_v12, %v5914_v44 }
 0x8c5   : > { %v5939_v61 = vpop.f32.mrf.mxu2 }
 0x8c6   : > { %v5940_v14 = vadd.f32 %v5939_v61, %v5927_v35 }
 0x8c7   : > { %v5928_v3 = vpop.f32.mrf.mxu3 }
 0x8c8   : > { %v5944_v58 = vmax.f32 %v5940_v14, 0.0 }
 0x8ca   : > { %v5946_v21 = vpack.c.bf16 %v5944_v58, %v5944_v58 }
 0x8cc   : > { %6100 = vmatmul.bf16.vlgmr.msrb.gmra.mxu1 %v5946_v21 }
 0x8cd   : > { %v5941_v9 = vpop.f32.mrf.mxu2 }
 0x939   : > { %v6088_v45 = vpop.f32.mrf.mxu0 }
 0x93a   : > { %v6089_v48 = vadd.f32 %v8332_v7, %v6088_v45 }
 0x941   : > { %v6090_v37 = vpop.f32.mrf.mxu0 }
 0x949   : > { %v6101_v54 = vpop.f32.mrf.mxu1 }
 0x94a   : > { %v6102_v23 = vadd.f32 %v6101_v54, %v6089_v48 }
 0x94c   : > { %v6105_v53 = vsel %vm1426_vm0, %v6102_v23, -inf }
 0x94d   : > { %6106 = vmax.xlane.f32.xlu0 %v6105_v53 }
 0x951   : > { %v6103_v8 = vpop.f32.mrf.mxu1 }
 0x9c0   : > { %v6107_v27 = vpop.xlane.xlu0 %6106 }
 0x9c1   : > { %v6108_v55 = vsub.f32 %v6102_v23, %v6107_v27 }
 0x9c3   : > { %v6109_v5 = vmul.f32 1.442695, %v6108_v55 }
 0x9c5   : > { %8335 = vpow2.f32 %v6109_v5 }
 0x9cb   : > { %v8336_v15 = vpop.eup %8335 }
 0x9cc   : > { %v6111_v42 = vsel %vm1426_vm0, %v8336_v15, 0.0 }
 0x9cd   : > { %6112 = vadd.xlane.f32.xlu0 %v6111_v42 }
 0x9ce   : > { %8370 = shalt.err (!%p8367_p3)
}
 0x9cf   : > { %s8440_s25 = smov 256   ;;  %s8441_s28 = smov 16  }
 0x9d0   : > { %8281 = dma.vmem_to_hbm [thread:$0]  (%p8606_p5), %s6143_s7, 512, %s6145_s0, %s6124_s24, %s8440_s25, %s8440_s25, %s8441_s28  }
 0x9d1   : > { %s6273_s1 = sshll.u32 %s10689_s4, 1  ;;  %s11657_s27 = sld [smem:[#allocation69_spill]] }
 0x9d2   : > { %s762_s8 = scalar_lea.vmem [#allocation4], %s6273_s1  ;;  %s6129_s7 = scalar_lea.sflag [#allocation5], %s10689_s4 }
 0x9d3   : > { %s6158_s9 = sshll.u32 %s762_s8, 4  ;;  %s6159_s9 = int_to_ptr.vmem [resolvable:$true] %s6158_s9 }
 0x9d7   : > { %s11658_s29 = smov %s11657_s27  ;;  %s6157_s10 = scalar_lea.hbm %s11657_s27, %s8620_s2 }
 0x9d8   : > { %s6160_s5 = sshll.u32 %s6157_s10, 4  ;;  %s8391_s25 = scalar_lea.hbm %s11658_s29, 4  ;;  %s6161_s5 = int_to_ptr.hbm [resolvable:$true] %s6160_s5 }
 0x9d9   : > { %s8385_s0 = sshra.s32 %s6161_s5, 4  ;;  %s8386_s0 = int_to_ptr.hbm [resolvable:$true] %s8385_s0 }
 0x9da   : > { %s8387_s24 = scalar_lea.hbm %s8386_s0, 2  ;;  %p8392_p9 = scmp.lt.s32.totalorder %s8386_s0, %s11658_s29 }
 0x9db   : > { %p8388_p4 = scmp.ne.s32.totalorder %s8386_s0, %s8387_s24  ;;  %p8393_p10 = scmp.lt.s32.totalorder %s8391_s25, %s8387_s24 }
 0x9dd   : > { %p8389_p7 = pnand %p8388_p4, %p8606_p5  ;;  %p8394_p11 = por %p8393_p10, %p8392_p9 }
 0x9df   : > { %p8390_p8 = pneg %p8389_p7 }
 0x9e1   : > { %p8395_p12 = pnand %p8394_p11, %p8390_p8 }
 0xa40   : > { %v6113_v51 = vpop.xlane.xlu0 %6112 }
 0xa41   : > { %8337 = vlog2.f32 %v6113_v51 }
 0xa47   : > { %v8338_v18 = vpop.eup %8337 }
 0xa48   : > { %v6115_v57 = vmul.f32 0.6931472, %v8338_v18 }
 0xa4a   : > { %v6116_v38 = vadd.f32 %v6115_v57, %v6107_v27 }
 0xa4c   : > { %v6117_v31 = vsub.f32 %v6102_v23, %v6116_v38 }
 0xa4e   : > { %v6119_v4 = vrot.slane %v6117_v31, 1  ;;  %6121 = vst [vmem:[%s762_s8] sm:$0x1] %v6117_v31 }
 0xa50   : > { %6122 = vst [vmem:[%s762_s8 + $0x1] sm:$0x1] %v6119_v4 }
 0xa51   : > { %8398 = shalt.err (!%p8395_p12)
}
 0xa52   : > { %s8442_s4 = smov 1  }
 0xa53   : > { %8282 = dma.vmem_to_hbm [thread:$0]  (%p8606_p5), %s6159_s9, 32, %s6161_s5, %s6129_s7, %s8441_s28, %s8441_s28, %s8442_s4  }
 0xa54 PF: > { %s11659_s12 = sld [smem:[#allocation10_spill]] }
 0xa55   : > { %s11660_s27 = sld [smem:[#allocation8_spill]] }
 0xa5a   : > { %p8292_p13 = scmp.ge.s32.totalorder %s11659_s12, 2 }
 0xa5b   : > { %s6175_s8 = sand.u32 1, %s11660_s27  }
 0xa5c   : > { %p8286_p0 = pnand %p8292_p13, %p8610_p6  ;;  %s6176_s0 = scalar_lea.sflag [#allocation3], %s6175_s8 }
 0xa5e   : > { %p8287_p1 = pneg %p8286_p0 }
 0xa60   : > { %8416 = dma.done.wait (%p8287_p1), %s6176_s0, 512  }
 0xa61   : > { %8418 = vsyncadd (%p8287_p1), %s6176_s0, 4294966784  ;;  %s6186_s24 = scalar_lea.sflag [#allocation5], %s6175_s8 }
 0xa62   : > { %8420 = dma.done.wait (%p8287_p1), %s6186_s24, 32  }
 0xa63   : > { %8422 = vsyncadd (%p8287_p1), %s6186_s24, 4294967264  ;;  %s11662_s28 = sld [smem:[#allocation11_spill]]  ;;  %s11665_s5 = smov %s8429_s26 }
 0xa64   : > { %s11663_s3 = sld [smem:[#allocation9_spill]] }
 0xa65   : > { %s11664_s27 = sld [smem:[#allocation12_spill]] }
 0xa69   : > { %p38_p5 = scmp.ge.s32.totalorder %s11662_s28, 4  }
 0xa6a   : > { %s11666_s26 = smov %s11663_s3 }
 0xa6b   :  { %40 = sbr.rel (!%p38_p5) target bundleno = 20 (0x14), region = 167 }
 0xa70   :  { %6192 = vsyncpa [#allocation3], 1 }
 0xa71   :  { %6194 = vsyncpa [#allocation3 + $0x1], 1 }
 0xa72   :  { %6195 = vsyncpa [#allocation5], 1 }
 0xa73   :  { %6197 = vsyncpa [#allocation5 + $0x1], 1 }

</bundles_post_ra>
